<compile_context>
chip_gen: v5e
topology: v5e:2x2
jax: 0.10.0
libtpu: 0.0.40
codegen_flags: <defaults>
</compile_context>

<pallas_src>
import functools

import jax
import jax.numpy as jnp
from jax.experimental import pallas as pl
from jax.experimental.pallas import tpu as pltpu

KS = 7                      # spatial-attention conv kernel size
PAD = (KS - 1) // 2         # = 3


def cbam_kernel(x_ref, w1_ref, b1_ref, w2_ref, b2_ref, mask_ref, cw_ref,
                cb_ref, o_ref, *, W):
    # x_ref   : (1, C, HW) VMEM   one batch element, HW = H*W flattened
    # w1_ref  : (hid, C)  b1_ref: (hid, 1)  w2_ref: (C, hid)  b2_ref: (C, 1)
    # mask_ref: (KS, HW) VMEM     per-kj column-validity masks (1.0 / 0.0)
    # cw_ref  : (2*KS*KS,) SMEM   conv weight, [ic, ki, kj] flattened
    # cb_ref  : (1,)       SMEM   conv bias
    x = x_ref[0]                                            # (C, HW) f32
    C, HW = x.shape

    # ---------------- channel attention ----------------
    avg_c = jnp.sum(x, axis=1, keepdims=True) * (1.0 / HW)  # (C, 1)
    max_c = jnp.max(x, axis=1, keepdims=True)               # (C, 1)
    pooled = jnp.concatenate([avg_c, max_c], axis=1)        # (C, 2)

    # Shared MLP applied to both pooled vectors at once: 2 MXU dots total.
    h = jnp.dot(w1_ref[...], pooled,
                preferred_element_type=jnp.float32) + b1_ref[...]      # (hid, 2)
    h = jnp.maximum(h, 0.0)
    mlp_out = jnp.dot(w2_ref[...], h,
                      preferred_element_type=jnp.float32) + b2_ref[...]  # (C, 2)
    ca = jax.nn.sigmoid(mlp_out[:, 0:1] + mlp_out[:, 1:2])  # (C, 1)
    x_ca = x * ca                                           # (C, HW)

    # ---------------- spatial attention ----------------
    avg_sp = jnp.sum(x_ca, axis=0, keepdims=True) * (1.0 / C)   # (1, HW)
    max_sp = jnp.max(x_ca, axis=0, keepdims=True)               # (1, HW)

    # 7x7 conv (2 -> 1 channels) computed directly in the flattened (1, HW)
    # domain, register-resident.  A tap (ic, ki, kj) reads
    #   m[p + (ki-PAD)*W + (kj-PAD)]
    # from the zero-padded flat map; row-edge zeros come from the padding,
    # column-edge wraps are zeroed by the host-precomputed per-kj masks.
    base = PAD * W + PAD                       # largest |flat shift| = 3W + 3
    lpad = pl.cdiv(base, 128) * 128            # lane-aligned zero padding
    zpad = jnp.zeros((1, lpad), jnp.float32)
    maps = (jnp.concatenate([zpad, avg_sp, zpad], axis=1),   # (1, lpad+HW+lpad)
            jnp.concatenate([zpad, max_sp, zpad], axis=1))

    mask = mask_ref[...]                                      # (KS, HW), one load
    acc = jnp.zeros((1, HW), jnp.float32) + cb_ref[0]
    for kj in range(KS):
        dw = kj - PAD
        part = jnp.zeros((1, HW), jnp.float32)
        for ic in range(2):
            mp = maps[ic]
            for ki in range(KS):
                off = lpad + (ki - PAD) * W + dw
                w_tap = cw_ref[ic * KS * KS + ki * KS + kj]   # SMEM scalar
                part = part + w_tap * mp[:, off:off + HW]
        acc = acc + mask[kj:kj + 1, :] * part
    sa = jax.nn.sigmoid(acc)                                  # (1, HW)

    o_ref[0] = x_ca * sa                                      # (C, HW)


def cbam_pallas(x_nchw, w1, b1, w2, b2, conv_w, conv_b):
    """x_nchw: (B, C, H, W).  Params use the PyTorch layouts:
    w1:(hid,C) b1:(hid,) w2:(C,hid) b2:(C,) conv_w:(1,2,KS,KS) conv_b:(1,)."""
    B, C, H, W = x_nchw.shape
    hid = w1.shape[0]
    HW = H * W

    # Contiguous reshape NCHW -> (B, C, H*W): free, no transpose HBM traffic.
    x = x_nchw.reshape(B, C, HW).astype(jnp.float32)
    w1f = w1.astype(jnp.float32)                    # (hid, C) used as-is
    w2f = w2.astype(jnp.float32)                    # (C, hid) used as-is
    b1f = b1.reshape(hid, 1).astype(jnp.float32)
    b2f = b2.reshape(C, 1).astype(jnp.float32)
    cwf = conv_w.reshape(-1).astype(jnp.float32)    # (2*KS*KS,)
    cbf = conv_b.astype(jnp.float32)                # (1,)

    # Per-kj column-validity masks (1.0 where w + (kj-PAD) stays inside the
    # image row, else 0.0), precomputed on the host once.
    col = jnp.tile(jnp.arange(W, dtype=jnp.int32), H)             # (HW,)
    masks = jnp.stack(
        [((col + (kj - PAD) >= 0) & (col + (kj - PAD) < W))
         for kj in range(KS)]).astype(jnp.float32)                # (KS, HW)

    kernel = functools.partial(cbam_kernel, W=W)

    out = pl.pallas_call(
        kernel,
        out_shape=jax.ShapeDtypeStruct((B, C, HW), jnp.float32),
        grid=(B,),
        in_specs=[
            pl.BlockSpec((1, C, HW), lambda b: (b, 0, 0)),
            pl.BlockSpec((hid, C), lambda b: (0, 0)),
            pl.BlockSpec((hid, 1), lambda b: (0, 0)),
            pl.BlockSpec((C, hid), lambda b: (0, 0)),
            pl.BlockSpec((C, 1), lambda b: (0, 0)),
            pl.BlockSpec((KS, HW), lambda b: (0, 0)),
            pl.BlockSpec(memory_space=pltpu.MemorySpace.SMEM),
            pl.BlockSpec(memory_space=pltpu.MemorySpace.SMEM),
        ],
        out_specs=pl.BlockSpec((1, C, HW), lambda b: (b, 0, 0)),
        compiler_params=pltpu.CompilerParams(
            # each batch element writes an independent output block ->
            # safe to shard across TensorCores (2x on v7x megacore).
            dimension_semantics=("parallel",)),
    )(x, w1f, b1f, w2f, b2f, masks, cwf, cbf)

    return out.reshape(B, C, H, W)                  # free contiguous reshape


def cbam_ref(x, w1, b1, w2, b2, conv_w, conv_b):
    """Pure-JAX reference matching the PyTorch forward exactly (NCHW)."""
    avg = jnp.mean(x, axis=(2, 3))
    mx = jnp.max(x, axis=(2, 3))

    def mlp(v):
        return jnp.maximum(v @ w1.T + b1, 0.0) @ w2.T + b2

    scale = jax.nn.sigmoid(mlp(avg) + mlp(mx))[:, :, None, None]
    x_ca = x * scale

    avg_sp = jnp.mean(x_ca, axis=1, keepdims=True)
    max_sp = jnp.max(x_ca, axis=1, keepdims=True)
    cat = jnp.concatenate([avg_sp, max_sp], axis=1)
    conv = jax.lax.conv_general_dilated(
        cat, conv_w, window_strides=(1, 1),
        padding=((PAD, PAD), (PAD, PAD)),
        dimension_numbers=("NCHW", "OIHW", "NCHW")) + conv_b.reshape(1, 1, 1, 1)
    sa = jax.nn.sigmoid(conv)
    return x_ca * sa


if __name__ == "__main__":
    B, C, H, W = 2, 32, 16, 16
    reduction = 16
    hidden = C // reduction

    key = jax.random.PRNGKey(0)
    keys = jax.random.split(key, 7)
    x = jax.random.normal(keys[0], (B, C, H, W), jnp.float32)
    w1 = jax.random.normal(keys[1], (hidden, C), jnp.float32) * 0.2
    b1 = jax.random.normal(keys[2], (hidden,), jnp.float32) * 0.1
    w2 = jax.random.normal(keys[3], (C, hidden), jnp.float32) * 0.2
    b2 = jax.random.normal(keys[4], (C,), jnp.float32) * 0.1
    cw = jax.random.normal(keys[5], (1, 2, KS, KS), jnp.float32) * 0.1
    cb = jax.random.normal(keys[6], (1,), jnp.float32) * 0.1

    out = cbam_pallas(x, w1, b1, w2, b2, cw, cb)
    out = jax.block_until_ready(out)

    ref = cbam_ref(x, w1, b1, w2, b2, cw, cb)
    err = float(jnp.max(jnp.abs(out - ref)))
    assert err < 1e-3, f"max abs error {err}"

    print("KERNEL_OK")
</pallas_src>

<mosaic_0001>
module attributes {stable_mosaic.version = 11 : i64} {
  func.func @cbam_kernel(%arg0: i32, %arg1: memref<1x32x256xf32, #tpu.memory_space<vmem>>, %arg2: memref<2x32xf32, #tpu.memory_space<vmem>>, %arg3: memref<2x1xf32, #tpu.memory_space<vmem>>, %arg4: memref<32x2xf32, #tpu.memory_space<vmem>>, %arg5: memref<32x1xf32, #tpu.memory_space<vmem>>, %arg6: memref<7x256xf32, #tpu.memory_space<vmem>>, %arg7: memref<98xf32, #tpu.memory_space<smem>>, %arg8: memref<1xf32, #tpu.memory_space<smem>>, %arg9: memref<1x32x256xf32, #tpu.memory_space<vmem>>) attributes {dimension_semantics = [#tpu.dimension_semantics<parallel>], iteration_bounds = array<i64: 2>, scalar_prefetch = 0 : i64, scratch_operands = 0 : i64, tpu.core_type = #tpu.core_type<tc>, window_params = [{transform_indices = @transform_0, window_bounds = array<i64: 1, 32, 256>}, {pipeline_mode = #tpu.pipeline_mode<synchronous>, transform_indices = @transform_1, window_bounds = array<i64: 2, 32>}, {pipeline_mode = #tpu.pipeline_mode<synchronous>, transform_indices = @transform_2, window_bounds = array<i64: 2, 1>}, {pipeline_mode = #tpu.pipeline_mode<synchronous>, transform_indices = @transform_3, window_bounds = array<i64: 32, 2>}, {pipeline_mode = #tpu.pipeline_mode<synchronous>, transform_indices = @transform_4, window_bounds = array<i64: 32, 1>}, {pipeline_mode = #tpu.pipeline_mode<synchronous>, transform_indices = @transform_5, window_bounds = array<i64: 7, 256>}, {transform_indices = @transform_6, window_bounds = array<i64: 98>}, {transform_indices = @transform_7, window_bounds = array<i64: 1>}, {transform_indices = @transform_8, window_bounds = array<i64: 1, 32, 256>}]} {
    %c0 = arith.constant 0 : index
    %c0_0 = arith.constant 0 : index
    %c0_1 = arith.constant 0 : index
    %0 = vector.load %arg1[%c0, %c0_0, %c0_1] : memref<1x32x256xf32, #tpu.memory_space<vmem>>, vector<1x32x256xf32>
    %1 = vector.shape_cast %0 : vector<1x32x256xf32> to vector<32x256xf32>
    %cst = arith.constant dense<0.000000e+00> : vector<32xf32>
    %2 = vector.multi_reduction <add>, %1, %cst [1] : vector<32x256xf32> to vector<32xf32>
    %3 = vector.shape_cast %2 : vector<32xf32> to vector<32x1xf32>
    %cst_2 = arith.constant 3.906250e-03 : f32
    %4 = vector.broadcast %cst_2 : f32 to vector<32x1xf32>
    %5 = arith.mulf %3, %4 : vector<32x1xf32>
    %cst_3 = arith.constant dense<0xFF800000> : vector<32xf32>
    %6 = vector.multi_reduction <maximumf>, %1, %cst_3 [1] : vector<32x256xf32> to vector<32xf32>
    %7 = vector.shape_cast %6 : vector<32xf32> to vector<32x1xf32>
    %8 = tpu.concatenate %5, %7 in 1 : vector<32x1xf32>, vector<32x1xf32> -> vector<32x2xf32>
    %c0_4 = arith.constant 0 : index
    %c0_5 = arith.constant 0 : index
    %9 = vector.load %arg2[%c0_4, %c0_5] : memref<2x32xf32, #tpu.memory_space<vmem>>, vector<2x32xf32>
    %cst_6 = arith.constant dense<0.000000e+00> : vector<2x2xf32>
    %10 = tpu.matmul %9, %8, %cst_6 {dimension_numbers = #tpu.dot_dimension_numbers<[1], [0], [0], [1], [0, 0, 1, 1], [], []>} : vector<2x32xf32>, vector<32x2xf32>, vector<2x2xf32> -> vector<2x2xf32>
    %c0_7 = arith.constant 0 : index
    %c0_8 = arith.constant 0 : index
    %11 = vector.load %arg3[%c0_7, %c0_8] : memref<2x1xf32, #tpu.memory_space<vmem>>, vector<2x1xf32>
    %12 = vector.broadcast %11 : vector<2x1xf32> to vector<2x2xf32>
    %13 = arith.addf %10, %12 : vector<2x2xf32>
    %cst_9 = arith.constant 0.000000e+00 : f32
    %14 = vector.broadcast %cst_9 : f32 to vector<2x2xf32>
    %15 = arith.maximumf %13, %14 : vector<2x2xf32>
    %c0_10 = arith.constant 0 : index
    %c0_11 = arith.constant 0 : index
    %16 = vector.load %arg4[%c0_10, %c0_11] : memref<32x2xf32, #tpu.memory_space<vmem>>, vector<32x2xf32>
    %cst_12 = arith.constant dense<0.000000e+00> : vector<32x2xf32>
    %17 = tpu.matmul %16, %15, %cst_12 {dimension_numbers = #tpu.dot_dimension_numbers<[1], [0], [0], [1], [0, 0, 1, 1], [], []>} : vector<32x2xf32>, vector<2x2xf32>, vector<32x2xf32> -> vector<32x2xf32>
    %c0_13 = arith.constant 0 : index
    %c0_14 = arith.constant 0 : index
    %18 = vector.load %arg5[%c0_13, %c0_14] : memref<32x1xf32, #tpu.memory_space<vmem>>, vector<32x1xf32>
    %19 = vector.broadcast %18 : vector<32x1xf32> to vector<32x2xf32>
    %20 = arith.addf %17, %19 : vector<32x2xf32>
    %21 = vector.extract_strided_slice %20 {offsets = [0, 0], sizes = [32, 1], strides = [1, 1]} : vector<32x2xf32> to vector<32x1xf32>
    %22 = vector.extract_strided_slice %20 {offsets = [0, 1], sizes = [32, 1], strides = [1, 1]} : vector<32x2xf32> to vector<32x1xf32>
    %23 = arith.addf %21, %22 : vector<32x1xf32>
    %24 = arith.negf %23 : vector<32x1xf32>
    %25 = math.exp %24 : vector<32x1xf32>
    %cst_15 = arith.constant 1.000000e+00 : f32
    %26 = vector.broadcast %cst_15 : f32 to vector<32x1xf32>
    %27 = arith.addf %26, %25 : vector<32x1xf32>
    %28 = arith.divf %26, %27 : vector<32x1xf32>
    %29 = vector.broadcast %28 : vector<32x1xf32> to vector<32x256xf32>
    %30 = arith.mulf %1, %29 : vector<32x256xf32>
    %cst_16 = arith.constant dense<0.000000e+00> : vector<256xf32>
    %31 = vector.multi_reduction <add>, %30, %cst_16 [0] : vector<32x256xf32> to vector<256xf32>
    %32 = vector.shape_cast %31 : vector<256xf32> to vector<1x256xf32>
    %cst_17 = arith.constant 3.125000e-02 : f32
    %33 = vector.broadcast %cst_17 : f32 to vector<1x256xf32>
    %34 = arith.mulf %32, %33 : vector<1x256xf32>
    %cst_18 = arith.constant dense<0xFF800000> : vector<256xf32>
    %35 = vector.multi_reduction <maximumf>, %30, %cst_18 [0] : vector<32x256xf32> to vector<256xf32>
    %36 = vector.shape_cast %35 : vector<256xf32> to vector<1x256xf32>
    %cst_19 = arith.constant 0.000000e+00 : f32
    %37 = vector.broadcast %cst_19 : f32 to vector<1x128xf32>
    %38 = tpu.concatenate %37, %34, %37 in 1 : vector<1x128xf32>, vector<1x256xf32>, vector<1x128xf32> -> vector<1x512xf32>
    %39 = tpu.concatenate %37, %36, %37 in 1 : vector<1x128xf32>, vector<1x256xf32>, vector<1x128xf32> -> vector<1x512xf32>
    %c0_20 = arith.constant 0 : index
    %c0_21 = arith.constant 0 : index
    %40 = vector.load %arg6[%c0_20, %c0_21] : memref<7x256xf32, #tpu.memory_space<vmem>>, vector<7x256xf32>
    %cst_22 = arith.constant 0.000000e+00 : f32
    %41 = vector.broadcast %cst_22 : f32 to vector<1x256xf32>
    %c0_23 = arith.constant 0 : index
    %42 = memref.load %arg8[%c0_23] : memref<1xf32, #tpu.memory_space<smem>>
    %43 = vector.broadcast %42 : f32 to vector<1x256xf32>
    %44 = arith.addf %41, %43 : vector<1x256xf32>
    %cst_24 = arith.constant 0.000000e+00 : f32
    %45 = vector.broadcast %cst_24 : f32 to vector<1x256xf32>
    %c0_25 = arith.constant 0 : index
    %46 = memref.load %arg7[%c0_25] : memref<98xf32, #tpu.memory_space<smem>>
    %47 = vector.extract_strided_slice %38 {offsets = [0, 77], sizes = [1, 256], strides = [1, 1]} : vector<1x512xf32> to vector<1x256xf32>
    %48 = vector.broadcast %46 : f32 to vector<1x256xf32>
    %49 = arith.mulf %48, %47 : vector<1x256xf32>
    %50 = arith.addf %45, %49 : vector<1x256xf32>
    %c7 = arith.constant 7 : index
    %51 = memref.load %arg7[%c7] : memref<98xf32, #tpu.memory_space<smem>>
    %52 = vector.extract_strided_slice %38 {offsets = [0, 93], sizes = [1, 256], strides = [1, 1]} : vector<1x512xf32> to vector<1x256xf32>
    %53 = vector.broadcast %51 : f32 to vector<1x256xf32>
    %54 = arith.mulf %53, %52 : vector<1x256xf32>
    %55 = arith.addf %50, %54 : vector<1x256xf32>
    %c14 = arith.constant 14 : index
    %56 = memref.load %arg7[%c14] : memref<98xf32, #tpu.memory_space<smem>>
    %57 = vector.extract_strided_slice %38 {offsets = [0, 109], sizes = [1, 256], strides = [1, 1]} : vector<1x512xf32> to vector<1x256xf32>
    %58 = vector.broadcast %56 : f32 to vector<1x256xf32>
    %59 = arith.mulf %58, %57 : vector<1x256xf32>
    %60 = arith.addf %55, %59 : vector<1x256xf32>
    %c21 = arith.constant 21 : index
    %61 = memref.load %arg7[%c21] : memref<98xf32, #tpu.memory_space<smem>>
    %62 = vector.extract_strided_slice %38 {offsets = [0, 125], sizes = [1, 256], strides = [1, 1]} : vector<1x512xf32> to vector<1x256xf32>
    %63 = vector.broadcast %61 : f32 to vector<1x256xf32>
    %64 = arith.mulf %63, %62 : vector<1x256xf32>
    %65 = arith.addf %60, %64 : vector<1x256xf32>
    %c28 = arith.constant 28 : index
    %66 = memref.load %arg7[%c28] : memref<98xf32, #tpu.memory_space<smem>>
    %67 = vector.extract_strided_slice %38 {offsets = [0, 141], sizes = [1, 256], strides = [1, 1]} : vector<1x512xf32> to vector<1x256xf32>
    %68 = vector.broadcast %66 : f32 to vector<1x256xf32>
    %69 = arith.mulf %68, %67 : vector<1x256xf32>
    %70 = arith.addf %65, %69 : vector<1x256xf32>
    %c35 = arith.constant 35 : index
    %71 = memref.load %arg7[%c35] : memref<98xf32, #tpu.memory_space<smem>>
    %72 = vector.extract_strided_slice %38 {offsets = [0, 157], sizes = [1, 256], strides = [1, 1]} : vector<1x512xf32> to vector<1x256xf32>
    %73 = vector.broadcast %71 : f32 to vector<1x256xf32>
    %74 = arith.mulf %73, %72 : vector<1x256xf32>
    %75 = arith.addf %70, %74 : vector<1x256xf32>
    %c42 = arith.constant 42 : index
    %76 = memref.load %arg7[%c42] : memref<98xf32, #tpu.memory_space<smem>>
    %77 = vector.extract_strided_slice %38 {offsets = [0, 173], sizes = [1, 256], strides = [1, 1]} : vector<1x512xf32> to vector<1x256xf32>
    %78 = vector.broadcast %76 : f32 to vector<1x256xf32>
    %79 = arith.mulf %78, %77 : vector<1x256xf32>
    %80 = arith.addf %75, %79 : vector<1x256xf32>
    %c49 = arith.constant 49 : index
    %81 = memref.load %arg7[%c49] : memref<98xf32, #tpu.memory_space<smem>>
    %82 = vector.extract_strided_slice %39 {offsets = [0, 77], sizes = [1, 256], strides = [1, 1]} : vector<1x512xf32> to vector<1x256xf32>
    %83 = vector.broadcast %81 : f32 to vector<1x256xf32>
    %84 = arith.mulf %83, %82 : vector<1x256xf32>
    %85 = arith.addf %80, %84 : vector<1x256xf32>
    %c56 = arith.constant 56 : index
    %86 = memref.load %arg7[%c56] : memref<98xf32, #tpu.memory_space<smem>>
    %87 = vector.extract_strided_slice %39 {offsets = [0, 93], sizes = [1, 256], strides = [1, 1]} : vector<1x512xf32> to vector<1x256xf32>
    %88 = vector.broadcast %86 : f32 to vector<1x256xf32>
    %89 = arith.mulf %88, %87 : vector<1x256xf32>
    %90 = arith.addf %85, %89 : vector<1x256xf32>
    %c63 = arith.constant 63 : index
    %91 = memref.load %arg7[%c63] : memref<98xf32, #tpu.memory_space<smem>>
    %92 = vector.extract_strided_slice %39 {offsets = [0, 109], sizes = [1, 256], strides = [1, 1]} : vector<1x512xf32> to vector<1x256xf32>
    %93 = vector.broadcast %91 : f32 to vector<1x256xf32>
    %94 = arith.mulf %93, %92 : vector<1x256xf32>
    %95 = arith.addf %90, %94 : vector<1x256xf32>
    %c70 = arith.constant 70 : index
    %96 = memref.load %arg7[%c70] : memref<98xf32, #tpu.memory_space<smem>>
    %97 = vector.extract_strided_slice %39 {offsets = [0, 125], sizes = [1, 256], strides = [1, 1]} : vector<1x512xf32> to vector<1x256xf32>
    %98 = vector.broadcast %96 : f32 to vector<1x256xf32>
    %99 = arith.mulf %98, %97 : vector<1x256xf32>
    %100 = arith.addf %95, %99 : vector<1x256xf32>
    %c77 = arith.constant 77 : index
    %101 = memref.load %arg7[%c77] : memref<98xf32, #tpu.memory_space<smem>>
    %102 = vector.extract_strided_slice %39 {offsets = [0, 141], sizes = [1, 256], strides = [1, 1]} : vector<1x512xf32> to vector<1x256xf32>
    %103 = vector.broadcast %101 : f32 to vector<1x256xf32>
    %104 = arith.mulf %103, %102 : vector<1x256xf32>
    %105 = arith.addf %100, %104 : vector<1x256xf32>
    %c84 = arith.constant 84 : index
    %106 = memref.load %arg7[%c84] : memref<98xf32, #tpu.memory_space<smem>>
    %107 = vector.extract_strided_slice %39 {offsets = [0, 157], sizes = [1, 256], strides = [1, 1]} : vector<1x512xf32> to vector<1x256xf32>
    %108 = vector.broadcast %106 : f32 to vector<1x256xf32>
    %109 = arith.mulf %108, %107 : vector<1x256xf32>
    %110 = arith.addf %105, %109 : vector<1x256xf32>
    %c91 = arith.constant 91 : index
    %111 = memref.load %arg7[%c91] : memref<98xf32, #tpu.memory_space<smem>>
    %112 = vector.extract_strided_slice %39 {offsets = [0, 173], sizes = [1, 256], strides = [1, 1]} : vector<1x512xf32> to vector<1x256xf32>
    %113 = vector.broadcast %111 : f32 to vector<1x256xf32>
    %114 = arith.mulf %113, %112 : vector<1x256xf32>
    %115 = arith.addf %110, %114 : vector<1x256xf32>
    %116 = vector.extract_strided_slice %40 {offsets = [0, 0], sizes = [1, 256], strides = [1, 1]} : vector<7x256xf32> to vector<1x256xf32>
    %117 = arith.mulf %116, %115 : vector<1x256xf32>
    %118 = arith.addf %44, %117 : vector<1x256xf32>
    %cst_26 = arith.constant 0.000000e+00 : f32
    %119 = vector.broadcast %cst_26 : f32 to vector<1x256xf32>
    %c1 = arith.constant 1 : index
    %120 = memref.load %arg7[%c1] : memref<98xf32, #tpu.memory_space<smem>>
    %121 = vector.extract_strided_slice %38 {offsets = [0, 78], sizes = [1, 256], strides = [1, 1]} : vector<1x512xf32> to vector<1x256xf32>
    %122 = vector.broadcast %120 : f32 to vector<1x256xf32>
    %123 = arith.mulf %122, %121 : vector<1x256xf32>
    %124 = arith.addf %119, %123 : vector<1x256xf32>
    %c8 = arith.constant 8 : index
    %125 = memref.load %arg7[%c8] : memref<98xf32, #tpu.memory_space<smem>>
    %126 = vector.extract_strided_slice %38 {offsets = [0, 94], sizes = [1, 256], strides = [1, 1]} : vector<1x512xf32> to vector<1x256xf32>
    %127 = vector.broadcast %125 : f32 to vector<1x256xf32>
    %128 = arith.mulf %127, %126 : vector<1x256xf32>
    %129 = arith.addf %124, %128 : vector<1x256xf32>
    %c15 = arith.constant 15 : index
    %130 = memref.load %arg7[%c15] : memref<98xf32, #tpu.memory_space<smem>>
    %131 = vector.extract_strided_slice %38 {offsets = [0, 110], sizes = [1, 256], strides = [1, 1]} : vector<1x512xf32> to vector<1x256xf32>
    %132 = vector.broadcast %130 : f32 to vector<1x256xf32>
    %133 = arith.mulf %132, %131 : vector<1x256xf32>
    %134 = arith.addf %129, %133 : vector<1x256xf32>
    %c22 = arith.constant 22 : index
    %135 = memref.load %arg7[%c22] : memref<98xf32, #tpu.memory_space<smem>>
    %136 = vector.extract_strided_slice %38 {offsets = [0, 126], sizes = [1, 256], strides = [1, 1]} : vector<1x512xf32> to vector<1x256xf32>
    %137 = vector.broadcast %135 : f32 to vector<1x256xf32>
    %138 = arith.mulf %137, %136 : vector<1x256xf32>
    %139 = arith.addf %134, %138 : vector<1x256xf32>
    %c29 = arith.constant 29 : index
    %140 = memref.load %arg7[%c29] : memref<98xf32, #tpu.memory_space<smem>>
    %141 = vector.extract_strided_slice %38 {offsets = [0, 142], sizes = [1, 256], strides = [1, 1]} : vector<1x512xf32> to vector<1x256xf32>
    %142 = vector.broadcast %140 : f32 to vector<1x256xf32>
    %143 = arith.mulf %142, %141 : vector<1x256xf32>
    %144 = arith.addf %139, %143 : vector<1x256xf32>
    %c36 = arith.constant 36 : index
    %145 = memref.load %arg7[%c36] : memref<98xf32, #tpu.memory_space<smem>>
    %146 = vector.extract_strided_slice %38 {offsets = [0, 158], sizes = [1, 256], strides = [1, 1]} : vector<1x512xf32> to vector<1x256xf32>
    %147 = vector.broadcast %145 : f32 to vector<1x256xf32>
    %148 = arith.mulf %147, %146 : vector<1x256xf32>
    %149 = arith.addf %144, %148 : vector<1x256xf32>
    %c43 = arith.constant 43 : index
    %150 = memref.load %arg7[%c43] : memref<98xf32, #tpu.memory_space<smem>>
    %151 = vector.extract_strided_slice %38 {offsets = [0, 174], sizes = [1, 256], strides = [1, 1]} : vector<1x512xf32> to vector<1x256xf32>
    %152 = vector.broadcast %150 : f32 to vector<1x256xf32>
    %153 = arith.mulf %152, %151 : vector<1x256xf32>
    %154 = arith.addf %149, %153 : vector<1x256xf32>
    %c50 = arith.constant 50 : index
    %155 = memref.load %arg7[%c50] : memref<98xf32, #tpu.memory_space<smem>>
    %156 = vector.extract_strided_slice %39 {offsets = [0, 78], sizes = [1, 256], strides = [1, 1]} : vector<1x512xf32> to vector<1x256xf32>
    %157 = vector.broadcast %155 : f32 to vector<1x256xf32>
    %158 = arith.mulf %157, %156 : vector<1x256xf32>
    %159 = arith.addf %154, %158 : vector<1x256xf32>
    %c57 = arith.constant 57 : index
    %160 = memref.load %arg7[%c57] : memref<98xf32, #tpu.memory_space<smem>>
    %161 = vector.extract_strided_slice %39 {offsets = [0, 94], sizes = [1, 256], strides = [1, 1]} : vector<1x512xf32> to vector<1x256xf32>
    %162 = vector.broadcast %160 : f32 to vector<1x256xf32>
    %163 = arith.mulf %162, %161 : vector<1x256xf32>
    %164 = arith.addf %159, %163 : vector<1x256xf32>
    %c64 = arith.constant 64 : index
    %165 = memref.load %arg7[%c64] : memref<98xf32, #tpu.memory_space<smem>>
    %166 = vector.extract_strided_slice %39 {offsets = [0, 110], sizes = [1, 256], strides = [1, 1]} : vector<1x512xf32> to vector<1x256xf32>
    %167 = vector.broadcast %165 : f32 to vector<1x256xf32>
    %168 = arith.mulf %167, %166 : vector<1x256xf32>
    %169 = arith.addf %164, %168 : vector<1x256xf32>
    %c71 = arith.constant 71 : index
    %170 = memref.load %arg7[%c71] : memref<98xf32, #tpu.memory_space<smem>>
    %171 = vector.extract_strided_slice %39 {offsets = [0, 126], sizes = [1, 256], strides = [1, 1]} : vector<1x512xf32> to vector<1x256xf32>
    %172 = vector.broadcast %170 : f32 to vector<1x256xf32>
    %173 = arith.mulf %172, %171 : vector<1x256xf32>
    %174 = arith.addf %169, %173 : vector<1x256xf32>
    %c78 = arith.constant 78 : index
    %175 = memref.load %arg7[%c78] : memref<98xf32, #tpu.memory_space<smem>>
    %176 = vector.extract_strided_slice %39 {offsets = [0, 142], sizes = [1, 256], strides = [1, 1]} : vector<1x512xf32> to vector<1x256xf32>
    %177 = vector.broadcast %175 : f32 to vector<1x256xf32>
    %178 = arith.mulf %177, %176 : vector<1x256xf32>
    %179 = arith.addf %174, %178 : vector<1x256xf32>
    %c85 = arith.constant 85 : index
    %180 = memref.load %arg7[%c85] : memref<98xf32, #tpu.memory_space<smem>>
    %181 = vector.extract_strided_slice %39 {offsets = [0, 158], sizes = [1, 256], strides = [1, 1]} : vector<1x512xf32> to vector<1x256xf32>
    %182 = vector.broadcast %180 : f32 to vector<1x256xf32>
    %183 = arith.mulf %182, %181 : vector<1x256xf32>
    %184 = arith.addf %179, %183 : vector<1x256xf32>
    %c92 = arith.constant 92 : index
    %185 = memref.load %arg7[%c92] : memref<98xf32, #tpu.memory_space<smem>>
    %186 = vector.extract_strided_slice %39 {offsets = [0, 174], sizes = [1, 256], strides = [1, 1]} : vector<1x512xf32> to vector<1x256xf32>
    %187 = vector.broadcast %185 : f32 to vector<1x256xf32>
    %188 = arith.mulf %187, %186 : vector<1x256xf32>
    %189 = arith.addf %184, %188 : vector<1x256xf32>
    %190 = vector.extract_strided_slice %40 {offsets = [1, 0], sizes = [1, 256], strides = [1, 1]} : vector<7x256xf32> to vector<1x256xf32>
    %191 = arith.mulf %190, %189 : vector<1x256xf32>
    %192 = arith.addf %118, %191 : vector<1x256xf32>
    %cst_27 = arith.constant 0.000000e+00 : f32
    %193 = vector.broadcast %cst_27 : f32 to vector<1x256xf32>
    %c2 = arith.constant 2 : index
    %194 = memref.load %arg7[%c2] : memref<98xf32, #tpu.memory_space<smem>>
    %195 = vector.extract_strided_slice %38 {offsets = [0, 79], sizes = [1, 256], strides = [1, 1]} : vector<1x512xf32> to vector<1x256xf32>
    %196 = vector.broadcast %194 : f32 to vector<1x256xf32>
    %197 = arith.mulf %196, %195 : vector<1x256xf32>
    %198 = arith.addf %193, %197 : vector<1x256xf32>
    %c9 = arith.constant 9 : index
    %199 = memref.load %arg7[%c9] : memref<98xf32, #tpu.memory_space<smem>>
    %200 = vector.extract_strided_slice %38 {offsets = [0, 95], sizes = [1, 256], strides = [1, 1]} : vector<1x512xf32> to vector<1x256xf32>
    %201 = vector.broadcast %199 : f32 to vector<1x256xf32>
    %202 = arith.mulf %201, %200 : vector<1x256xf32>
    %203 = arith.addf %198, %202 : vector<1x256xf32>
    %c16 = arith.constant 16 : index
    %204 = memref.load %arg7[%c16] : memref<98xf32, #tpu.memory_space<smem>>
    %205 = vector.extract_strided_slice %38 {offsets = [0, 111], sizes = [1, 256], strides = [1, 1]} : vector<1x512xf32> to vector<1x256xf32>
    %206 = vector.broadcast %204 : f32 to vector<1x256xf32>
    %207 = arith.mulf %206, %205 : vector<1x256xf32>
    %208 = arith.addf %203, %207 : vector<1x256xf32>
    %c23 = arith.constant 23 : index
    %209 = memref.load %arg7[%c23] : memref<98xf32, #tpu.memory_space<smem>>
    %210 = vector.extract_strided_slice %38 {offsets = [0, 127], sizes = [1, 256], strides = [1, 1]} : vector<1x512xf32> to vector<1x256xf32>
    %211 = vector.broadcast %209 : f32 to vector<1x256xf32>
    %212 = arith.mulf %211, %210 : vector<1x256xf32>
    %213 = arith.addf %208, %212 : vector<1x256xf32>
    %c30 = arith.constant 30 : index
    %214 = memref.load %arg7[%c30] : memref<98xf32, #tpu.memory_space<smem>>
    %215 = vector.extract_strided_slice %38 {offsets = [0, 143], sizes = [1, 256], strides = [1, 1]} : vector<1x512xf32> to vector<1x256xf32>
    %216 = vector.broadcast %214 : f32 to vector<1x256xf32>
    %217 = arith.mulf %216, %215 : vector<1x256xf32>
    %218 = arith.addf %213, %217 : vector<1x256xf32>
    %c37 = arith.constant 37 : index
    %219 = memref.load %arg7[%c37] : memref<98xf32, #tpu.memory_space<smem>>
    %220 = vector.extract_strided_slice %38 {offsets = [0, 159], sizes = [1, 256], strides = [1, 1]} : vector<1x512xf32> to vector<1x256xf32>
    %221 = vector.broadcast %219 : f32 to vector<1x256xf32>
    %222 = arith.mulf %221, %220 : vector<1x256xf32>
    %223 = arith.addf %218, %222 : vector<1x256xf32>
    %c44 = arith.constant 44 : index
    %224 = memref.load %arg7[%c44] : memref<98xf32, #tpu.memory_space<smem>>
    %225 = vector.extract_strided_slice %38 {offsets = [0, 175], sizes = [1, 256], strides = [1, 1]} : vector<1x512xf32> to vector<1x256xf32>
    %226 = vector.broadcast %224 : f32 to vector<1x256xf32>
    %227 = arith.mulf %226, %225 : vector<1x256xf32>
    %228 = arith.addf %223, %227 : vector<1x256xf32>
    %c51 = arith.constant 51 : index
    %229 = memref.load %arg7[%c51] : memref<98xf32, #tpu.memory_space<smem>>
    %230 = vector.extract_strided_slice %39 {offsets = [0, 79], sizes = [1, 256], strides = [1, 1]} : vector<1x512xf32> to vector<1x256xf32>
    %231 = vector.broadcast %229 : f32 to vector<1x256xf32>
    %232 = arith.mulf %231, %230 : vector<1x256xf32>
    %233 = arith.addf %228, %232 : vector<1x256xf32>
    %c58 = arith.constant 58 : index
    %234 = memref.load %arg7[%c58] : memref<98xf32, #tpu.memory_space<smem>>
    %235 = vector.extract_strided_slice %39 {offsets = [0, 95], sizes = [1, 256], strides = [1, 1]} : vector<1x512xf32> to vector<1x256xf32>
    %236 = vector.broadcast %234 : f32 to vector<1x256xf32>
    %237 = arith.mulf %236, %235 : vector<1x256xf32>
    %238 = arith.addf %233, %237 : vector<1x256xf32>
    %c65 = arith.constant 65 : index
    %239 = memref.load %arg7[%c65] : memref<98xf32, #tpu.memory_space<smem>>
    %240 = vector.extract_strided_slice %39 {offsets = [0, 111], sizes = [1, 256], strides = [1, 1]} : vector<1x512xf32> to vector<1x256xf32>
    %241 = vector.broadcast %239 : f32 to vector<1x256xf32>
    %242 = arith.mulf %241, %240 : vector<1x256xf32>
    %243 = arith.addf %238, %242 : vector<1x256xf32>
    %c72 = arith.constant 72 : index
    %244 = memref.load %arg7[%c72] : memref<98xf32, #tpu.memory_space<smem>>
    %245 = vector.extract_strided_slice %39 {offsets = [0, 127], sizes = [1, 256], strides = [1, 1]} : vector<1x512xf32> to vector<1x256xf32>
    %246 = vector.broadcast %244 : f32 to vector<1x256xf32>
    %247 = arith.mulf %246, %245 : vector<1x256xf32>
    %248 = arith.addf %243, %247 : vector<1x256xf32>
    %c79 = arith.constant 79 : index
    %249 = memref.load %arg7[%c79] : memref<98xf32, #tpu.memory_space<smem>>
    %250 = vector.extract_strided_slice %39 {offsets = [0, 143], sizes = [1, 256], strides = [1, 1]} : vector<1x512xf32> to vector<1x256xf32>
    %251 = vector.broadcast %249 : f32 to vector<1x256xf32>
    %252 = arith.mulf %251, %250 : vector<1x256xf32>
    %253 = arith.addf %248, %252 : vector<1x256xf32>
    %c86 = arith.constant 86 : index
    %254 = memref.load %arg7[%c86] : memref<98xf32, #tpu.memory_space<smem>>
    %255 = vector.extract_strided_slice %39 {offsets = [0, 159], sizes = [1, 256], strides = [1, 1]} : vector<1x512xf32> to vector<1x256xf32>
    %256 = vector.broadcast %254 : f32 to vector<1x256xf32>
    %257 = arith.mulf %256, %255 : vector<1x256xf32>
    %258 = arith.addf %253, %257 : vector<1x256xf32>
    %c93 = arith.constant 93 : index
    %259 = memref.load %arg7[%c93] : memref<98xf32, #tpu.memory_space<smem>>
    %260 = vector.extract_strided_slice %39 {offsets = [0, 175], sizes = [1, 256], strides = [1, 1]} : vector<1x512xf32> to vector<1x256xf32>
    %261 = vector.broadcast %259 : f32 to vector<1x256xf32>
    %262 = arith.mulf %261, %260 : vector<1x256xf32>
    %263 = arith.addf %258, %262 : vector<1x256xf32>
    %264 = vector.extract_strided_slice %40 {offsets = [2, 0], sizes = [1, 256], strides = [1, 1]} : vector<7x256xf32> to vector<1x256xf32>
    %265 = arith.mulf %264, %263 : vector<1x256xf32>
    %266 = arith.addf %192, %265 : vector<1x256xf32>
    %cst_28 = arith.constant 0.000000e+00 : f32
    %267 = vector.broadcast %cst_28 : f32 to vector<1x256xf32>
    %c3 = arith.constant 3 : index
    %268 = memref.load %arg7[%c3] : memref<98xf32, #tpu.memory_space<smem>>
    %269 = vector.extract_strided_slice %38 {offsets = [0, 80], sizes = [1, 256], strides = [1, 1]} : vector<1x512xf32> to vector<1x256xf32>
    %270 = vector.broadcast %268 : f32 to vector<1x256xf32>
    %271 = arith.mulf %270, %269 : vector<1x256xf32>
    %272 = arith.addf %267, %271 : vector<1x256xf32>
    %c10 = arith.constant 10 : index
    %273 = memref.load %arg7[%c10] : memref<98xf32, #tpu.memory_space<smem>>
    %274 = vector.extract_strided_slice %38 {offsets = [0, 96], sizes = [1, 256], strides = [1, 1]} : vector<1x512xf32> to vector<1x256xf32>
    %275 = vector.broadcast %273 : f32 to vector<1x256xf32>
    %276 = arith.mulf %275, %274 : vector<1x256xf32>
    %277 = arith.addf %272, %276 : vector<1x256xf32>
    %c17 = arith.constant 17 : index
    %278 = memref.load %arg7[%c17] : memref<98xf32, #tpu.memory_space<smem>>
    %279 = vector.extract_strided_slice %38 {offsets = [0, 112], sizes = [1, 256], strides = [1, 1]} : vector<1x512xf32> to vector<1x256xf32>
    %280 = vector.broadcast %278 : f32 to vector<1x256xf32>
    %281 = arith.mulf %280, %279 : vector<1x256xf32>
    %282 = arith.addf %277, %281 : vector<1x256xf32>
    %c24 = arith.constant 24 : index
    %283 = memref.load %arg7[%c24] : memref<98xf32, #tpu.memory_space<smem>>
    %284 = vector.extract_strided_slice %38 {offsets = [0, 128], sizes = [1, 256], strides = [1, 1]} : vector<1x512xf32> to vector<1x256xf32>
    %285 = vector.broadcast %283 : f32 to vector<1x256xf32>
    %286 = arith.mulf %285, %284 : vector<1x256xf32>
    %287 = arith.addf %282, %286 : vector<1x256xf32>
    %c31 = arith.constant 31 : index
    %288 = memref.load %arg7[%c31] : memref<98xf32, #tpu.memory_space<smem>>
    %289 = vector.extract_strided_slice %38 {offsets = [0, 144], sizes = [1, 256], strides = [1, 1]} : vector<1x512xf32> to vector<1x256xf32>
    %290 = vector.broadcast %288 : f32 to vector<1x256xf32>
    %291 = arith.mulf %290, %289 : vector<1x256xf32>
    %292 = arith.addf %287, %291 : vector<1x256xf32>
    %c38 = arith.constant 38 : index
    %293 = memref.load %arg7[%c38] : memref<98xf32, #tpu.memory_space<smem>>
    %294 = vector.extract_strided_slice %38 {offsets = [0, 160], sizes = [1, 256], strides = [1, 1]} : vector<1x512xf32> to vector<1x256xf32>
    %295 = vector.broadcast %293 : f32 to vector<1x256xf32>
    %296 = arith.mulf %295, %294 : vector<1x256xf32>
    %297 = arith.addf %292, %296 : vector<1x256xf32>
    %c45 = arith.constant 45 : index
    %298 = memref.load %arg7[%c45] : memref<98xf32, #tpu.memory_space<smem>>
    %299 = vector.extract_strided_slice %38 {offsets = [0, 176], sizes = [1, 256], strides = [1, 1]} : vector<1x512xf32> to vector<1x256xf32>
    %300 = vector.broadcast %298 : f32 to vector<1x256xf32>
    %301 = arith.mulf %300, %299 : vector<1x256xf32>
    %302 = arith.addf %297, %301 : vector<1x256xf32>
    %c52 = arith.constant 52 : index
    %303 = memref.load %arg7[%c52] : memref<98xf32, #tpu.memory_space<smem>>
    %304 = vector.extract_strided_slice %39 {offsets = [0, 80], sizes = [1, 256], strides = [1, 1]} : vector<1x512xf32> to vector<1x256xf32>
    %305 = vector.broadcast %303 : f32 to vector<1x256xf32>
    %306 = arith.mulf %305, %304 : vector<1x256xf32>
    %307 = arith.addf %302, %306 : vector<1x256xf32>
    %c59 = arith.constant 59 : index
    %308 = memref.load %arg7[%c59] : memref<98xf32, #tpu.memory_space<smem>>
    %309 = vector.extract_strided_slice %39 {offsets = [0, 96], sizes = [1, 256], strides = [1, 1]} : vector<1x512xf32> to vector<1x256xf32>
    %310 = vector.broadcast %308 : f32 to vector<1x256xf32>
    %311 = arith.mulf %310, %309 : vector<1x256xf32>
    %312 = arith.addf %307, %311 : vector<1x256xf32>
    %c66 = arith.constant 66 : index
    %313 = memref.load %arg7[%c66] : memref<98xf32, #tpu.memory_space<smem>>
    %314 = vector.extract_strided_slice %39 {offsets = [0, 112], sizes = [1, 256], strides = [1, 1]} : vector<1x512xf32> to vector<1x256xf32>
    %315 = vector.broadcast %313 : f32 to vector<1x256xf32>
    %316 = arith.mulf %315, %314 : vector<1x256xf32>
    %317 = arith.addf %312, %316 : vector<1x256xf32>
    %c73 = arith.constant 73 : index
    %318 = memref.load %arg7[%c73] : memref<98xf32, #tpu.memory_space<smem>>
    %319 = vector.extract_strided_slice %39 {offsets = [0, 128], sizes = [1, 256], strides = [1, 1]} : vector<1x512xf32> to vector<1x256xf32>
    %320 = vector.broadcast %318 : f32 to vector<1x256xf32>
    %321 = arith.mulf %320, %319 : vector<1x256xf32>
    %322 = arith.addf %317, %321 : vector<1x256xf32>
    %c80 = arith.constant 80 : index
    %323 = memref.load %arg7[%c80] : memref<98xf32, #tpu.memory_space<smem>>
    %324 = vector.extract_strided_slice %39 {offsets = [0, 144], sizes = [1, 256], strides = [1, 1]} : vector<1x512xf32> to vector<1x256xf32>
    %325 = vector.broadcast %323 : f32 to vector<1x256xf32>
    %326 = arith.mulf %325, %324 : vector<1x256xf32>
    %327 = arith.addf %322, %326 : vector<1x256xf32>
    %c87 = arith.constant 87 : index
    %328 = memref.load %arg7[%c87] : memref<98xf32, #tpu.memory_space<smem>>
    %329 = vector.extract_strided_slice %39 {offsets = [0, 160], sizes = [1, 256], strides = [1, 1]} : vector<1x512xf32> to vector<1x256xf32>
    %330 = vector.broadcast %328 : f32 to vector<1x256xf32>
    %331 = arith.mulf %330, %329 : vector<1x256xf32>
    %332 = arith.addf %327, %331 : vector<1x256xf32>
    %c94 = arith.constant 94 : index
    %333 = memref.load %arg7[%c94] : memref<98xf32, #tpu.memory_space<smem>>
    %334 = vector.extract_strided_slice %39 {offsets = [0, 176], sizes = [1, 256], strides = [1, 1]} : vector<1x512xf32> to vector<1x256xf32>
    %335 = vector.broadcast %333 : f32 to vector<1x256xf32>
    %336 = arith.mulf %335, %334 : vector<1x256xf32>
    %337 = arith.addf %332, %336 : vector<1x256xf32>
    %338 = vector.extract_strided_slice %40 {offsets = [3, 0], sizes = [1, 256], strides = [1, 1]} : vector<7x256xf32> to vector<1x256xf32>
    %339 = arith.mulf %338, %337 : vector<1x256xf32>
    %340 = arith.addf %266, %339 : vector<1x256xf32>
    %cst_29 = arith.constant 0.000000e+00 : f32
    %341 = vector.broadcast %cst_29 : f32 to vector<1x256xf32>
    %c4 = arith.constant 4 : index
    %342 = memref.load %arg7[%c4] : memref<98xf32, #tpu.memory_space<smem>>
    %343 = vector.extract_strided_slice %38 {offsets = [0, 81], sizes = [1, 256], strides = [1, 1]} : vector<1x512xf32> to vector<1x256xf32>
    %344 = vector.broadcast %342 : f32 to vector<1x256xf32>
    %345 = arith.mulf %344, %343 : vector<1x256xf32>
    %346 = arith.addf %341, %345 : vector<1x256xf32>
    %c11 = arith.constant 11 : index
    %347 = memref.load %arg7[%c11] : memref<98xf32, #tpu.memory_space<smem>>
    %348 = vector.extract_strided_slice %38 {offsets = [0, 97], sizes = [1, 256], strides = [1, 1]} : vector<1x512xf32> to vector<1x256xf32>
    %349 = vector.broadcast %347 : f32 to vector<1x256xf32>
    %350 = arith.mulf %349, %348 : vector<1x256xf32>
    %351 = arith.addf %346, %350 : vector<1x256xf32>
    %c18 = arith.constant 18 : index
    %352 = memref.load %arg7[%c18] : memref<98xf32, #tpu.memory_space<smem>>
    %353 = vector.extract_strided_slice %38 {offsets = [0, 113], sizes = [1, 256], strides = [1, 1]} : vector<1x512xf32> to vector<1x256xf32>
    %354 = vector.broadcast %352 : f32 to vector<1x256xf32>
    %355 = arith.mulf %354, %353 : vector<1x256xf32>
    %356 = arith.addf %351, %355 : vector<1x256xf32>
    %c25 = arith.constant 25 : index
    %357 = memref.load %arg7[%c25] : memref<98xf32, #tpu.memory_space<smem>>
    %358 = vector.extract_strided_slice %38 {offsets = [0, 129], sizes = [1, 256], strides = [1, 1]} : vector<1x512xf32> to vector<1x256xf32>
    %359 = vector.broadcast %357 : f32 to vector<1x256xf32>
    %360 = arith.mulf %359, %358 : vector<1x256xf32>
    %361 = arith.addf %356, %360 : vector<1x256xf32>
    %c32 = arith.constant 32 : index
    %362 = memref.load %arg7[%c32] : memref<98xf32, #tpu.memory_space<smem>>
    %363 = vector.extract_strided_slice %38 {offsets = [0, 145], sizes = [1, 256], strides = [1, 1]} : vector<1x512xf32> to vector<1x256xf32>
    %364 = vector.broadcast %362 : f32 to vector<1x256xf32>
    %365 = arith.mulf %364, %363 : vector<1x256xf32>
    %366 = arith.addf %361, %365 : vector<1x256xf32>
    %c39 = arith.constant 39 : index
    %367 = memref.load %arg7[%c39] : memref<98xf32, #tpu.memory_space<smem>>
    %368 = vector.extract_strided_slice %38 {offsets = [0, 161], sizes = [1, 256], strides = [1, 1]} : vector<1x512xf32> to vector<1x256xf32>
    %369 = vector.broadcast %367 : f32 to vector<1x256xf32>
    %370 = arith.mulf %369, %368 : vector<1x256xf32>
    %371 = arith.addf %366, %370 : vector<1x256xf32>
    %c46 = arith.constant 46 : index
    %372 = memref.load %arg7[%c46] : memref<98xf32, #tpu.memory_space<smem>>
    %373 = vector.extract_strided_slice %38 {offsets = [0, 177], sizes = [1, 256], strides = [1, 1]} : vector<1x512xf32> to vector<1x256xf32>
    %374 = vector.broadcast %372 : f32 to vector<1x256xf32>
    %375 = arith.mulf %374, %373 : vector<1x256xf32>
    %376 = arith.addf %371, %375 : vector<1x256xf32>
    %c53 = arith.constant 53 : index
    %377 = memref.load %arg7[%c53] : memref<98xf32, #tpu.memory_space<smem>>
    %378 = vector.extract_strided_slice %39 {offsets = [0, 81], sizes = [1, 256], strides = [1, 1]} : vector<1x512xf32> to vector<1x256xf32>
    %379 = vector.broadcast %377 : f32 to vector<1x256xf32>
    %380 = arith.mulf %379, %378 : vector<1x256xf32>
    %381 = arith.addf %376, %380 : vector<1x256xf32>
    %c60 = arith.constant 60 : index
    %382 = memref.load %arg7[%c60] : memref<98xf32, #tpu.memory_space<smem>>
    %383 = vector.extract_strided_slice %39 {offsets = [0, 97], sizes = [1, 256], strides = [1, 1]} : vector<1x512xf32> to vector<1x256xf32>
    %384 = vector.broadcast %382 : f32 to vector<1x256xf32>
    %385 = arith.mulf %384, %383 : vector<1x256xf32>
    %386 = arith.addf %381, %385 : vector<1x256xf32>
    %c67 = arith.constant 67 : index
    %387 = memref.load %arg7[%c67] : memref<98xf32, #tpu.memory_space<smem>>
    %388 = vector.extract_strided_slice %39 {offsets = [0, 113], sizes = [1, 256], strides = [1, 1]} : vector<1x512xf32> to vector<1x256xf32>
    %389 = vector.broadcast %387 : f32 to vector<1x256xf32>
    %390 = arith.mulf %389, %388 : vector<1x256xf32>
    %391 = arith.addf %386, %390 : vector<1x256xf32>
    %c74 = arith.constant 74 : index
    %392 = memref.load %arg7[%c74] : memref<98xf32, #tpu.memory_space<smem>>
    %393 = vector.extract_strided_slice %39 {offsets = [0, 129], sizes = [1, 256], strides = [1, 1]} : vector<1x512xf32> to vector<1x256xf32>
    %394 = vector.broadcast %392 : f32 to vector<1x256xf32>
    %395 = arith.mulf %394, %393 : vector<1x256xf32>
    %396 = arith.addf %391, %395 : vector<1x256xf32>
    %c81 = arith.constant 81 : index
    %397 = memref.load %arg7[%c81] : memref<98xf32, #tpu.memory_space<smem>>
    %398 = vector.extract_strided_slice %39 {offsets = [0, 145], sizes = [1, 256], strides = [1, 1]} : vector<1x512xf32> to vector<1x256xf32>
    %399 = vector.broadcast %397 : f32 to vector<1x256xf32>
    %400 = arith.mulf %399, %398 : vector<1x256xf32>
    %401 = arith.addf %396, %400 : vector<1x256xf32>
    %c88 = arith.constant 88 : index
    %402 = memref.load %arg7[%c88] : memref<98xf32, #tpu.memory_space<smem>>
    %403 = vector.extract_strided_slice %39 {offsets = [0, 161], sizes = [1, 256], strides = [1, 1]} : vector<1x512xf32> to vector<1x256xf32>
    %404 = vector.broadcast %402 : f32 to vector<1x256xf32>
    %405 = arith.mulf %404, %403 : vector<1x256xf32>
    %406 = arith.addf %401, %405 : vector<1x256xf32>
    %c95 = arith.constant 95 : index
    %407 = memref.load %arg7[%c95] : memref<98xf32, #tpu.memory_space<smem>>
    %408 = vector.extract_strided_slice %39 {offsets = [0, 177], sizes = [1, 256], strides = [1, 1]} : vector<1x512xf32> to vector<1x256xf32>
    %409 = vector.broadcast %407 : f32 to vector<1x256xf32>
    %410 = arith.mulf %409, %408 : vector<1x256xf32>
    %411 = arith.addf %406, %410 : vector<1x256xf32>
    %412 = vector.extract_strided_slice %40 {offsets = [4, 0], sizes = [1, 256], strides = [1, 1]} : vector<7x256xf32> to vector<1x256xf32>
    %413 = arith.mulf %412, %411 : vector<1x256xf32>
    %414 = arith.addf %340, %413 : vector<1x256xf32>
    %cst_30 = arith.constant 0.000000e+00 : f32
    %415 = vector.broadcast %cst_30 : f32 to vector<1x256xf32>
    %c5 = arith.constant 5 : index
    %416 = memref.load %arg7[%c5] : memref<98xf32, #tpu.memory_space<smem>>
    %417 = vector.extract_strided_slice %38 {offsets = [0, 82], sizes = [1, 256], strides = [1, 1]} : vector<1x512xf32> to vector<1x256xf32>
    %418 = vector.broadcast %416 : f32 to vector<1x256xf32>
    %419 = arith.mulf %418, %417 : vector<1x256xf32>
    %420 = arith.addf %415, %419 : vector<1x256xf32>
    %c12 = arith.constant 12 : index
    %421 = memref.load %arg7[%c12] : memref<98xf32, #tpu.memory_space<smem>>
    %422 = vector.extract_strided_slice %38 {offsets = [0, 98], sizes = [1, 256], strides = [1, 1]} : vector<1x512xf32> to vector<1x256xf32>
    %423 = vector.broadcast %421 : f32 to vector<1x256xf32>
    %424 = arith.mulf %423, %422 : vector<1x256xf32>
    %425 = arith.addf %420, %424 : vector<1x256xf32>
    %c19 = arith.constant 19 : index
    %426 = memref.load %arg7[%c19] : memref<98xf32, #tpu.memory_space<smem>>
    %427 = vector.extract_strided_slice %38 {offsets = [0, 114], sizes = [1, 256], strides = [1, 1]} : vector<1x512xf32> to vector<1x256xf32>
    %428 = vector.broadcast %426 : f32 to vector<1x256xf32>
    %429 = arith.mulf %428, %427 : vector<1x256xf32>
    %430 = arith.addf %425, %429 : vector<1x256xf32>
    %c26 = arith.constant 26 : index
    %431 = memref.load %arg7[%c26] : memref<98xf32, #tpu.memory_space<smem>>
    %432 = vector.extract_strided_slice %38 {offsets = [0, 130], sizes = [1, 256], strides = [1, 1]} : vector<1x512xf32> to vector<1x256xf32>
    %433 = vector.broadcast %431 : f32 to vector<1x256xf32>
    %434 = arith.mulf %433, %432 : vector<1x256xf32>
    %435 = arith.addf %430, %434 : vector<1x256xf32>
    %c33 = arith.constant 33 : index
    %436 = memref.load %arg7[%c33] : memref<98xf32, #tpu.memory_space<smem>>
    %437 = vector.extract_strided_slice %38 {offsets = [0, 146], sizes = [1, 256], strides = [1, 1]} : vector<1x512xf32> to vector<1x256xf32>
    %438 = vector.broadcast %436 : f32 to vector<1x256xf32>
    %439 = arith.mulf %438, %437 : vector<1x256xf32>
    %440 = arith.addf %435, %439 : vector<1x256xf32>
    %c40 = arith.constant 40 : index
    %441 = memref.load %arg7[%c40] : memref<98xf32, #tpu.memory_space<smem>>
    %442 = vector.extract_strided_slice %38 {offsets = [0, 162], sizes = [1, 256], strides = [1, 1]} : vector<1x512xf32> to vector<1x256xf32>
    %443 = vector.broadcast %441 : f32 to vector<1x256xf32>
    %444 = arith.mulf %443, %442 : vector<1x256xf32>
    %445 = arith.addf %440, %444 : vector<1x256xf32>
    %c47 = arith.constant 47 : index
    %446 = memref.load %arg7[%c47] : memref<98xf32, #tpu.memory_space<smem>>
    %447 = vector.extract_strided_slice %38 {offsets = [0, 178], sizes = [1, 256], strides = [1, 1]} : vector<1x512xf32> to vector<1x256xf32>
    %448 = vector.broadcast %446 : f32 to vector<1x256xf32>
    %449 = arith.mulf %448, %447 : vector<1x256xf32>
    %450 = arith.addf %445, %449 : vector<1x256xf32>
    %c54 = arith.constant 54 : index
    %451 = memref.load %arg7[%c54] : memref<98xf32, #tpu.memory_space<smem>>
    %452 = vector.extract_strided_slice %39 {offsets = [0, 82], sizes = [1, 256], strides = [1, 1]} : vector<1x512xf32> to vector<1x256xf32>
    %453 = vector.broadcast %451 : f32 to vector<1x256xf32>
    %454 = arith.mulf %453, %452 : vector<1x256xf32>
    %455 = arith.addf %450, %454 : vector<1x256xf32>
    %c61 = arith.constant 61 : index
    %456 = memref.load %arg7[%c61] : memref<98xf32, #tpu.memory_space<smem>>
    %457 = vector.extract_strided_slice %39 {offsets = [0, 98], sizes = [1, 256], strides = [1, 1]} : vector<1x512xf32> to vector<1x256xf32>
    %458 = vector.broadcast %456 : f32 to vector<1x256xf32>
    %459 = arith.mulf %458, %457 : vector<1x256xf32>
    %460 = arith.addf %455, %459 : vector<1x256xf32>
    %c68 = arith.constant 68 : index
    %461 = memref.load %arg7[%c68] : memref<98xf32, #tpu.memory_space<smem>>
    %462 = vector.extract_strided_slice %39 {offsets = [0, 114], sizes = [1, 256], strides = [1, 1]} : vector<1x512xf32> to vector<1x256xf32>
    %463 = vector.broadcast %461 : f32 to vector<1x256xf32>
    %464 = arith.mulf %463, %462 : vector<1x256xf32>
    %465 = arith.addf %460, %464 : vector<1x256xf32>
    %c75 = arith.constant 75 : index
    %466 = memref.load %arg7[%c75] : memref<98xf32, #tpu.memory_space<smem>>
    %467 = vector.extract_strided_slice %39 {offsets = [0, 130], sizes = [1, 256], strides = [1, 1]} : vector<1x512xf32> to vector<1x256xf32>
    %468 = vector.broadcast %466 : f32 to vector<1x256xf32>
    %469 = arith.mulf %468, %467 : vector<1x256xf32>
    %470 = arith.addf %465, %469 : vector<1x256xf32>
    %c82 = arith.constant 82 : index
    %471 = memref.load %arg7[%c82] : memref<98xf32, #tpu.memory_space<smem>>
    %472 = vector.extract_strided_slice %39 {offsets = [0, 146], sizes = [1, 256], strides = [1, 1]} : vector<1x512xf32> to vector<1x256xf32>
    %473 = vector.broadcast %471 : f32 to vector<1x256xf32>
    %474 = arith.mulf %473, %472 : vector<1x256xf32>
    %475 = arith.addf %470, %474 : vector<1x256xf32>
    %c89 = arith.constant 89 : index
    %476 = memref.load %arg7[%c89] : memref<98xf32, #tpu.memory_space<smem>>
    %477 = vector.extract_strided_slice %39 {offsets = [0, 162], sizes = [1, 256], strides = [1, 1]} : vector<1x512xf32> to vector<1x256xf32>
    %478 = vector.broadcast %476 : f32 to vector<1x256xf32>
    %479 = arith.mulf %478, %477 : vector<1x256xf32>
    %480 = arith.addf %475, %479 : vector<1x256xf32>
    %c96 = arith.constant 96 : index
    %481 = memref.load %arg7[%c96] : memref<98xf32, #tpu.memory_space<smem>>
    %482 = vector.extract_strided_slice %39 {offsets = [0, 178], sizes = [1, 256], strides = [1, 1]} : vector<1x512xf32> to vector<1x256xf32>
    %483 = vector.broadcast %481 : f32 to vector<1x256xf32>
    %484 = arith.mulf %483, %482 : vector<1x256xf32>
    %485 = arith.addf %480, %484 : vector<1x256xf32>
    %486 = vector.extract_strided_slice %40 {offsets = [5, 0], sizes = [1, 256], strides = [1, 1]} : vector<7x256xf32> to vector<1x256xf32>
    %487 = arith.mulf %486, %485 : vector<1x256xf32>
    %488 = arith.addf %414, %487 : vector<1x256xf32>
    %cst_31 = arith.constant 0.000000e+00 : f32
    %489 = vector.broadcast %cst_31 : f32 to vector<1x256xf32>
    %c6 = arith.constant 6 : index
    %490 = memref.load %arg7[%c6] : memref<98xf32, #tpu.memory_space<smem>>
    %491 = vector.extract_strided_slice %38 {offsets = [0, 83], sizes = [1, 256], strides = [1, 1]} : vector<1x512xf32> to vector<1x256xf32>
    %492 = vector.broadcast %490 : f32 to vector<1x256xf32>
    %493 = arith.mulf %492, %491 : vector<1x256xf32>
    %494 = arith.addf %489, %493 : vector<1x256xf32>
    %c13 = arith.constant 13 : index
    %495 = memref.load %arg7[%c13] : memref<98xf32, #tpu.memory_space<smem>>
    %496 = vector.extract_strided_slice %38 {offsets = [0, 99], sizes = [1, 256], strides = [1, 1]} : vector<1x512xf32> to vector<1x256xf32>
    %497 = vector.broadcast %495 : f32 to vector<1x256xf32>
    %498 = arith.mulf %497, %496 : vector<1x256xf32>
    %499 = arith.addf %494, %498 : vector<1x256xf32>
    %c20 = arith.constant 20 : index
    %500 = memref.load %arg7[%c20] : memref<98xf32, #tpu.memory_space<smem>>
    %501 = vector.extract_strided_slice %38 {offsets = [0, 115], sizes = [1, 256], strides = [1, 1]} : vector<1x512xf32> to vector<1x256xf32>
    %502 = vector.broadcast %500 : f32 to vector<1x256xf32>
    %503 = arith.mulf %502, %501 : vector<1x256xf32>
    %504 = arith.addf %499, %503 : vector<1x256xf32>
    %c27 = arith.constant 27 : index
    %505 = memref.load %arg7[%c27] : memref<98xf32, #tpu.memory_space<smem>>
    %506 = vector.extract_strided_slice %38 {offsets = [0, 131], sizes = [1, 256], strides = [1, 1]} : vector<1x512xf32> to vector<1x256xf32>
    %507 = vector.broadcast %505 : f32 to vector<1x256xf32>
    %508 = arith.mulf %507, %506 : vector<1x256xf32>
    %509 = arith.addf %504, %508 : vector<1x256xf32>
    %c34 = arith.constant 34 : index
    %510 = memref.load %arg7[%c34] : memref<98xf32, #tpu.memory_space<smem>>
    %511 = vector.extract_strided_slice %38 {offsets = [0, 147], sizes = [1, 256], strides = [1, 1]} : vector<1x512xf32> to vector<1x256xf32>
    %512 = vector.broadcast %510 : f32 to vector<1x256xf32>
    %513 = arith.mulf %512, %511 : vector<1x256xf32>
    %514 = arith.addf %509, %513 : vector<1x256xf32>
    %c41 = arith.constant 41 : index
    %515 = memref.load %arg7[%c41] : memref<98xf32, #tpu.memory_space<smem>>
    %516 = vector.extract_strided_slice %38 {offsets = [0, 163], sizes = [1, 256], strides = [1, 1]} : vector<1x512xf32> to vector<1x256xf32>
    %517 = vector.broadcast %515 : f32 to vector<1x256xf32>
    %518 = arith.mulf %517, %516 : vector<1x256xf32>
    %519 = arith.addf %514, %518 : vector<1x256xf32>
    %c48 = arith.constant 48 : index
    %520 = memref.load %arg7[%c48] : memref<98xf32, #tpu.memory_space<smem>>
    %521 = vector.extract_strided_slice %38 {offsets = [0, 179], sizes = [1, 256], strides = [1, 1]} : vector<1x512xf32> to vector<1x256xf32>
    %522 = vector.broadcast %520 : f32 to vector<1x256xf32>
    %523 = arith.mulf %522, %521 : vector<1x256xf32>
    %524 = arith.addf %519, %523 : vector<1x256xf32>
    %c55 = arith.constant 55 : index
    %525 = memref.load %arg7[%c55] : memref<98xf32, #tpu.memory_space<smem>>
    %526 = vector.extract_strided_slice %39 {offsets = [0, 83], sizes = [1, 256], strides = [1, 1]} : vector<1x512xf32> to vector<1x256xf32>
    %527 = vector.broadcast %525 : f32 to vector<1x256xf32>
    %528 = arith.mulf %527, %526 : vector<1x256xf32>
    %529 = arith.addf %524, %528 : vector<1x256xf32>
    %c62 = arith.constant 62 : index
    %530 = memref.load %arg7[%c62] : memref<98xf32, #tpu.memory_space<smem>>
    %531 = vector.extract_strided_slice %39 {offsets = [0, 99], sizes = [1, 256], strides = [1, 1]} : vector<1x512xf32> to vector<1x256xf32>
    %532 = vector.broadcast %530 : f32 to vector<1x256xf32>
    %533 = arith.mulf %532, %531 : vector<1x256xf32>
    %534 = arith.addf %529, %533 : vector<1x256xf32>
    %c69 = arith.constant 69 : index
    %535 = memref.load %arg7[%c69] : memref<98xf32, #tpu.memory_space<smem>>
    %536 = vector.extract_strided_slice %39 {offsets = [0, 115], sizes = [1, 256], strides = [1, 1]} : vector<1x512xf32> to vector<1x256xf32>
    %537 = vector.broadcast %535 : f32 to vector<1x256xf32>
    %538 = arith.mulf %537, %536 : vector<1x256xf32>
    %539 = arith.addf %534, %538 : vector<1x256xf32>
    %c76 = arith.constant 76 : index
    %540 = memref.load %arg7[%c76] : memref<98xf32, #tpu.memory_space<smem>>
    %541 = vector.extract_strided_slice %39 {offsets = [0, 131], sizes = [1, 256], strides = [1, 1]} : vector<1x512xf32> to vector<1x256xf32>
    %542 = vector.broadcast %540 : f32 to vector<1x256xf32>
    %543 = arith.mulf %542, %541 : vector<1x256xf32>
    %544 = arith.addf %539, %543 : vector<1x256xf32>
    %c83 = arith.constant 83 : index
    %545 = memref.load %arg7[%c83] : memref<98xf32, #tpu.memory_space<smem>>
    %546 = vector.extract_strided_slice %39 {offsets = [0, 147], sizes = [1, 256], strides = [1, 1]} : vector<1x512xf32> to vector<1x256xf32>
    %547 = vector.broadcast %545 : f32 to vector<1x256xf32>
    %548 = arith.mulf %547, %546 : vector<1x256xf32>
    %549 = arith.addf %544, %548 : vector<1x256xf32>
    %c90 = arith.constant 90 : index
    %550 = memref.load %arg7[%c90] : memref<98xf32, #tpu.memory_space<smem>>
    %551 = vector.extract_strided_slice %39 {offsets = [0, 163], sizes = [1, 256], strides = [1, 1]} : vector<1x512xf32> to vector<1x256xf32>
    %552 = vector.broadcast %550 : f32 to vector<1x256xf32>
    %553 = arith.mulf %552, %551 : vector<1x256xf32>
    %554 = arith.addf %549, %553 : vector<1x256xf32>
    %c97 = arith.constant 97 : index
    %555 = memref.load %arg7[%c97] : memref<98xf32, #tpu.memory_space<smem>>
    %556 = vector.extract_strided_slice %39 {offsets = [0, 179], sizes = [1, 256], strides = [1, 1]} : vector<1x512xf32> to vector<1x256xf32>
    %557 = vector.broadcast %555 : f32 to vector<1x256xf32>
    %558 = arith.mulf %557, %556 : vector<1x256xf32>
    %559 = arith.addf %554, %558 : vector<1x256xf32>
    %560 = vector.extract_strided_slice %40 {offsets = [6, 0], sizes = [1, 256], strides = [1, 1]} : vector<7x256xf32> to vector<1x256xf32>
    %561 = arith.mulf %560, %559 : vector<1x256xf32>
    %562 = arith.addf %488, %561 : vector<1x256xf32>
    %563 = arith.negf %562 : vector<1x256xf32>
    %564 = math.exp %563 : vector<1x256xf32>
    %cst_32 = arith.constant 1.000000e+00 : f32
    %565 = vector.broadcast %cst_32 : f32 to vector<1x256xf32>
    %566 = arith.addf %565, %564 : vector<1x256xf32>
    %567 = arith.divf %565, %566 : vector<1x256xf32>
    %568 = vector.broadcast %567 : vector<1x256xf32> to vector<32x256xf32>
    %569 = arith.mulf %30, %568 : vector<32x256xf32>
    %c0_33 = arith.constant 0 : index
    %c0_34 = arith.constant 0 : index
    %c0_35 = arith.constant 0 : index
    %570 = vector.load %arg9[%c0_33, %c0_34, %c0_35] : memref<1x32x256xf32, #tpu.memory_space<vmem>>, vector<1x32x256xf32>
    %571 = vector.shape_cast %570 : vector<1x32x256xf32> to vector<32x256xf32>
    %572 = vector.shape_cast %569 : vector<32x256xf32> to vector<1x32x256xf32>
    tpu.vector_store %arg9[%c0_33, %c0_34, %c0_35], %572 {strides = array<i32>} : memref<1x32x256xf32, #tpu.memory_space<vmem>>, vector<1x32x256xf32>,
    return
  }
  func.func @transform_0(%arg0: i32) -> (i32, i32, i32) {
    %c0_i32 = arith.constant 0 : i32
    %c0_i32_0 = arith.constant 0 : i32
    %c0_i32_1 = arith.constant 0 : i32
    return %arg0, %c0_i32, %c0_i32_0 : i32, i32, i32
  }
  func.func @transform_1(%arg0: i32) -> (i32, i32) {
    %c0_i32 = arith.constant 0 : i32
    %c0_i32_0 = arith.constant 0 : i32
    %c0_i32_1 = arith.constant 0 : i32
    return %c0_i32, %c0_i32_0 : i32, i32
  }
  func.func @transform_2(%arg0: i32) -> (i32, i32) {
    %c0_i32 = arith.constant 0 : i32
    %c0_i32_0 = arith.constant 0 : i32
    %c0_i32_1 = arith.constant 0 : i32
    return %c0_i32, %c0_i32_0 : i32, i32
  }
  func.func @transform_3(%arg0: i32) -> (i32, i32) {
    %c0_i32 = arith.constant 0 : i32
    %c0_i32_0 = arith.constant 0 : i32
    %c0_i32_1 = arith.constant 0 : i32
    return %c0_i32, %c0_i32_0 : i32, i32
  }
  func.func @transform_4(%arg0: i32) -> (i32, i32) {
    %c0_i32 = arith.constant 0 : i32
    %c0_i32_0 = arith.constant 0 : i32
    %c0_i32_1 = arith.constant 0 : i32
    return %c0_i32, %c0_i32_0 : i32, i32
  }
  func.func @transform_5(%arg0: i32) -> (i32, i32) {
    %c0_i32 = arith.constant 0 : i32
    %c0_i32_0 = arith.constant 0 : i32
    %c0_i32_1 = arith.constant 0 : i32
    return %c0_i32, %c0_i32_0 : i32, i32
  }
  func.func @transform_6(%arg0: i32) -> i32 {
    %c0_i32 = arith.constant 0 : i32
    %c0_i32_0 = arith.constant 0 : i32
    return %c0_i32 : i32
  }
  func.func @transform_7(%arg0: i32) -> i32 {
    %c0_i32 = arith.constant 0 : i32
    %c0_i32_0 = arith.constant 0 : i32
    return %c0_i32 : i32
  }
  func.func @transform_8(%arg0: i32) -> (i32, i32, i32) {
    %c0_i32 = arith.constant 0 : i32
    %c0_i32_0 = arith.constant 0 : i32
    %c0_i32_1 = arith.constant 0 : i32
    return %arg0, %c0_i32, %c0_i32_0 : i32, i32, i32
  }
}

</mosaic_0001>

<bundles_post_ra>
// kernel: tpu_custom_call.1
= control target key start
LH: loop header
LB: loop body
LE: loop exit
PB: predicated region body
PF: predicated region fallthrough
CT: control target
= control target key end

     0   :  { %s5534_s0 = inlined_call_operand.hbm [shape: f32[2,32,256], index: 0, kind: input, shape index: {}]   ;;  %s5535_s1 = inlined_call_operand.vmem [shape: f32[2,32], index: 1, kind: input, shape index: {}]   ;;  %s5536_s2 = inlined_call_operand.vmem [shape: f32[2,1], index: 2, kind: input, shape index: {}]   ;;  %s5537_s3 = inlined_call_operand.vmem [shape: f32[32,2], index: 3, kind: input, shape index: {}]   ;;  %s5538_s4 = inlined_call_operand.vmem [shape: f32[32,1], index: 4, kind: input, shape index: {}]   ;;  %s5539_s5 = inlined_call_operand.vmem [shape: f32[7,256], index: 5, kind: input, shape index: {}]   ;;  %s5540_s6 = inlined_call_operand.vmem [shape: f32[98], index: 6, kind: input, shape index: {}]   ;;  %s5541_s7 = inlined_call_operand.<no memory space> [shape: f32[1], index: 7, kind: input, shape index: {}]   ;;  %s5542_s8 = inlined_call_operand.hbm [shape: f32[2,32,256], index: 8, kind: output, shape index: {}]  }
   0x1   :  { %5727 = sst [smem:[#allocation188_spill]] %s5540_s6 }
   0x2   :  { %13 = sst [smem:[#allocation2]] %s5541_s7 }
   0x3   :  { %14 = vsyncpa [#allocation4], 0 }
   0x4   :  { %16 = vsyncpa [#allocation4 + $0x1], 0 }
   0x5   :  { %17 = vsyncpa [#allocation6], 0 }
   0x6   :  { %18 = vsyncpa [#allocation5], 0 }
   0x7   :  { %20 = vsyncpa [#allocation5 + $0x1], 0  ;;  %s3369_s29 = smov 0   ;;  %s3371_s30 = smov 0  }
   0x8   :  { %s3373_s9 = smov 0   ;;  %s3375_s10 = smov 0  }
   0x9 LB: > { %5728 = sst [smem:[#allocation12_spill]] %s3296_s9  ;;  %s3390_s7 = sadd.s32 4294967295, %s3300_s10   ;;  %s3300_s10 = sphi %s3375_s10, %s6200_s10   ;;  %s3296_s9 = sphi %s3373_s9, %s6202_s9   ;;  %s3292_s30 = sphi %s3371_s30, %s6204_s30   ;;  %s3288_s29 = sphi %s3369_s29, %s6203_s29  }
   0xa   : > { %s2946_s11 = sadd.s32 4294967294, %s3300_s10   ;;  %s3394_s12 = sadd.s32 1, %s3300_s10  }
   0xb   : > { %5729 = sst [smem:[#allocation13_spill]] %s3394_s12  ;;  %s33_s13 = sadd.s32 1, %s3296_s9 }
   0xc   : > { %s30_s14 = ssub.s32 %s3300_s10, %s3394_s12  ;;  %p40_p0 = scmp.ne.s32.totalorder %s3296_s9, %s3292_s30 }
   0xd   : > { %p31_p1 = scmp.eq.s32.totalorder %s30_s14, 0  ;;  %p41_p2 = scmp.eq.s32.totalorder %s3300_s10, 0 }
   0xe   : > { %p46_p3 = scmp.ne.s32.totalorder %s3292_s30, %s3288_s29  ;;  %p47_p4 = scmp.eq.s32.totalorder %s3390_s7, 0 }
   0xf   : > { %s3406_s15 = scalar_select %p31_p1, %s3296_s9, %s33_s13  }
  0x10   : > { %p3408_p5 = por %p41_p2, %p40_p0  ;;  %p3414_p6 = por %p47_p4, %p46_p3 }
  0x11   : > { %5730 = sst [smem:[#allocation14_spill]] %s3406_s15  ;;  %p217_p7 = scmp.eq.s32.totalorder %s3390_s7, 1 }
  0x12   : > { %p223_p8 = scmp.eq.s32.totalorder %s2946_s11, 1  ;;  %p2947_p9 = scmp.ge.s32.totalorder %s3300_s10, 1 }
  0x13   : > { %p230_p10 = scmp.lt.s32.totalorder %s3300_s10, 3  ;;  %p3421_p11 = por %p217_p7, %p40_p0 }
  0x14   : > { %p3425_p12 = por %p223_p8, %p46_p3  ;;  %s5736_s6 = sld [smem:[#allocation188_spill]] }
  0x15   : > { %p3429_p13 = pnand %p2947_p9, %p230_p10  ;;  %p3096_p2 = scmp.lt.s32.totalorder %s3300_s10, 2 }
  0x16   : > { %s271_s24 = sand.u32 1, %s3296_s9   ;;  %s3302_s27 = smov [#allocation7]  }
  0x17   : > { %p3083_p1 = pneg %p3429_p13  ;;  %p3445_p3 = pnand %p3096_p2, %p3408_p5 }
  0x18   : > { %s2950_s26 = sshll.u32 %s271_s24, 6  ;;  %s3071_s28 = sshll.u32 %s3300_s10, 6 }
  0x19   : > { %p3084_p7 = pnand %p3083_p1, %p47_p4  ;;  %s275_s11 = scalar_lea.vmem [#allocation3], %s2950_s26 }
  0x1a   : > { %s257_s23 = sshll.u32 %s5736_s6, 4  ;;  %s283_s13 = sshll.u32 %s275_s11, 4  ;;  %s258_s23 = int_to_ptr.vmem [resolvable:$true] %s257_s23  ;;  %s284_s13 = int_to_ptr.vmem [resolvable:$true] %s283_s13 }
  0x1b   : > { %3086 = dma.vmem_to_smem (!%p3084_p7), %s258_s23, 16, %s3302_s27, [#allocation6]  }
  0x1c   : > { %s280_s22 = scalar_lea.hbm %s5534_s0, %s3071_s28  ;;  %s272_s15 = scalar_lea.sflag [#allocation4], %s271_s24 }
  0x1d   : > { %s281_s6 = sshll.u32 %s280_s22, 4  ;;  %p3204_p8 = pneg %p3445_p3  ;;  %s282_s6 = int_to_ptr.hbm [resolvable:$true] %s281_s6 }
  0x1e   : > { %s3200_s16 = sshra.s32 %s282_s6, 4  ;;  %s3207_s26 = scalar_lea.hbm %s5534_s0, 128  ;;  %s3201_s16 = int_to_ptr.hbm [resolvable:$true] %s3200_s16 }
  0x1f   : > { %s3202_s9 = scalar_lea.hbm %s3201_s16, 64  ;;  %p3208_p1 = scmp.lt.s32.totalorder %s3201_s16, %s5534_s0 }
  0x20   : > { %p3203_p5 = scmp.ne.s32.totalorder %s3201_s16, %s3202_s9  ;;  %p3209_p2 = scmp.lt.s32.totalorder %s3207_s26, %s3202_s9 }
  0x22   : > { %p3205_p9 = pnand %p3204_p8, %p3203_p5  ;;  %p3210_p7 = por %p3209_p2, %p3208_p1 }
  0x24   : > { %p3206_p10 = pneg %p3205_p9 }
  0x26   : > { %p3211_p0 = pnand %p3210_p7, %p3206_p10 }
  0x28   : > { %3214 = shalt.err (!%p3211_p0)
}
  0x29   : > { %s3303_s24 = smov 256   ;;  %s3304_s28 = smov 16  }
  0x2a   : > { %3090 = dma.hbm_to_vmem [thread:$0]  (!%p3445_p3), %s282_s6, 1024, %s284_s13, %s272_s15, %s3303_s24, %s3303_s24, %s3304_s28  }
  0x2b   : > { %295 = sbr.rel (%p3429_p13) target bundleno = 1602 (0x642), region = 52 }
  0x30   : > { %s3466_s14 = sand.u32 1, %s3292_s30  }
  0x31   : > { %s2954_s12 = sshll.u32 %s3466_s14, 6  ;;  %s298_s9 = scalar_lea.sflag [#allocation4], %s3466_s14 }
  0x32   : > { %s3472_s21 = scalar_lea.vmem [#allocation3], %s2954_s12 }
  0x33   : > { %3275 = dma.done.wait (%p3414_p6), %s298_s9, 1024  }
  0x34   : > { %3277 = vsyncadd (%p3414_p6), %s298_s9, 4294966272 }
  0x35   : > { %3279 = dma.done.wait (%p47_p4), [#allocation6], 16  }
  0x36   : > { %3281 = vsyncadd (%p47_p4), [#allocation6], 4294967280 }
  0x37   : > { %312 = sfence }
  0x38   : > { %v345_v0 = vld [vmem:[%s3472_s21 + $0x20] sm:$0xff]  ;;  %v346_v1 = vld [vmem:[%s3472_s21 + $0x28] sm:$0xff]  ;;  %v3305_v5 = vmov 0   ;;  %v347_v8 = vld [vmem:[%s3472_s21 + $0x30] sm:$0xff]  ;;  %s2967_s6 = sld [smem:[#allocation7 + $0x7]]  ;;  %s3306_s25 = smov 112  }
  0x39   : > { %v341_v2 = vld [vmem:[%s3472_s21] sm:$0xff]  ;;  %v355_v3 = vadd.f32 %v346_v1, %v345_v0  ;;  %v342_v4 = vld [vmem:[%s3472_s21 + $0x8] sm:$0xff]  ;;  %3152 = vset.pattern.permute.xlu1 %v3305_v5  ;;  %3150 = vset.pattern.permute.xlu2 %v3305_v5  ;;  %v348_v9 = vld [vmem:[%s3472_s21 + $0x38] sm:$0xff]  ;;  %v371_v16 = vmax.f32 %v345_v0, %v346_v1  ;;  %s2968_s20 = sld [smem:[#allocation7 + $0xe]]  ;;  %s3307_s22 = smov 96   ;;  %vm377_vm0 = vcmask 7168  }
  0x3a   : > { %v349_v6 = vadd.f32 %v342_v4, %v341_v2  ;;  %v365_v7 = vmax.f32 %v341_v2, %v342_v4  ;;  %3151 = vset.pattern.permute.xlu0 %v3305_v5  ;;  %v343_v10 = vld [vmem:[%s3472_s21 + $0x10] sm:$0xff]  ;;  %v344_v11 = vld [vmem:[%s3472_s21 + $0x18] sm:$0xff]  ;;  %v358_v12 = vadd.f32 %v348_v9, %v347_v8  ;;  %v374_v15 = vmax.f32 %v347_v8, %v348_v9  ;;  %v419_v17 = vld [vmem:[%s5538_s4 + $0x8] sm:$0xff]  ;;  %s2969_s13 = sld [smem:[#allocation7 + $0x15]]  ;;  %s3308_s23 = smov 80  }
  0x3b   : > { %356 = vadd.xlane.f32.xlu1 %v355_v3  ;;  %v352_v13 = vadd.f32 %v344_v11, %v343_v10  ;;  %v368_v14 = vmax.f32 %v343_v10, %v344_v11  ;;  %s2974_s16 = sld [smem:[#allocation7 + $0x38]]  ;;  %v383_v35 = vld [vmem:[%s5536_s2] sm:$0x3]  ;;  %v420_v38 = vld [vmem:[%s5538_s4 + $0x10] sm:$0xff]  ;;  %v421_v43 = vld [vmem:[%s5538_s4 + $0x18] sm:$0xff]  ;;  %vm389_vm1 = vcmask 261120  }
  0x3c   : > { %350 = vadd.xlane.f32.xlu0 %v349_v6  ;;  %366 = vmax.xlane.f32.xlu2 %v365_v7  ;;  %s2975_s27 = sld [smem:[#allocation7 + $0x3f]]  ;;  %v382_v60 = vld [vmem:[%s5535_s1] sm:$0x3]  ;;  %vm455_vm2 = vcmask 1041408   ;;  %vm442_vm3 = vcmask 15360  }
  0x3d   : > { %s2976_s26 = sld [smem:[#allocation7 + $0x46]] }
  0x3e   : > { %v3493_v18 = vstv %s2967_s6  ;;  %s2981_s11 = sld [smem:[#allocation7 + $0x8]] }
  0x3f   : > { %5738 = vst [vmem:[#allocation15_spill] sm:$0xff] %v3493_v18  ;;  %v665_v19 = vmul.f32 0.0, %v3493_v18  ;;  %v3497_v20 = vstv %s2968_s20  ;;  %s2982_s24 = sld [smem:[#allocation7 + $0xf]]  ;;  %s3309_s20 = smov 64  }
  0x40   : > { %5739 = vst [vmem:[#allocation16_spill] sm:$0xff] %v3497_v20  ;;  %v688_v21 = vmul.f32 0.0, %v3497_v20  ;;  %v3501_v22 = vstv %s2969_s13  ;;  %s2983_s28 = sld [smem:[#allocation7 + $0x16]] }
  0x41   : > { %5740 = vst [vmem:[#allocation17_spill] sm:$0xff] %v3501_v22  ;;  %v711_v23 = vmul.f32 0.0, %v3501_v22  ;;  %v3505_v24 = vstv %s2974_s16  ;;  %s2988_s9 = sld [smem:[#allocation7 + $0x39]] }
  0x42   : > { %v810_v25 = vmul.f32 0.0, %v3505_v24  ;;  %v3509_v26 = vstv %s2975_s27  ;;  %s2989_s17 = sld [smem:[#allocation7 + $0x40]]  ;;  %s3310_s27 = smov 48  }
  0x43   : > { %359 = vadd.xlane.f32.xlu1 %v358_v12  ;;  %v832_v27 = vmul.f32 0.0, %v3509_v26  ;;  %v3513_v28 = vstv %s2976_s26  ;;  %s2990_s16 = sld [smem:[#allocation7 + $0x47]] }
  0x44   : > { %353 = vadd.xlane.f32.xlu0 %v352_v13  ;;  %369 = vmax.xlane.f32.xlu2 %v368_v14  ;;  %v854_v29 = vmul.f32 0.0, %v3513_v28  ;;  %v3517_v30 = vstv %s2981_s11  ;;  %s2995_s11 = sld [smem:[#allocation7 + $0x9]] }
  0x45   : > { %5741 = vst [vmem:[#allocation18_spill] sm:$0xff] %v3517_v30  ;;  %v968_v31 = vmul.f32 0.0, %v3517_v30  ;;  %v3521_v32 = vstv %s2982_s24  ;;  %s2970_s6 = sld [smem:[#allocation7 + $0x1c]]  ;;  %s3311_s24 = smov 32  }
  0x46   : > { %5742 = vst [vmem:[#allocation19_spill] sm:$0xff] %v3521_v32  ;;  %v990_v33 = vmul.f32 0.0, %v3521_v32  ;;  %v3525_v34 = vstv %s2983_s28  ;;  %s2997_s15 = sld [smem:[#allocation7 + $0x17]] }
  0x47   : > { %5743 = vst [vmem:[#allocation20_spill] sm:$0xff] %v3525_v34  ;;  %v1012_v36 = vmul.f32 0.0, %v3525_v34  ;;  %v3532_v37 = vstv %s2988_s9  ;;  %s2996_s9 = sld [smem:[#allocation7 + $0x10]] }
  0x48   : > { %v1108_v41 = vmul.f32 0.0, %v3532_v37  ;;  %v3539_v42 = vstv %s2989_s17  ;;  %s2971_s17 = sld [smem:[#allocation7 + $0x23]] }
  0x49   : > { %v1130_v47 = vmul.f32 0.0, %v3539_v42  ;;  %v3546_v49 = vstv %s2990_s16  ;;  %s3002_s13 = sld [smem:[#allocation7 + $0x3a]] }
  0x4a   : > { %v1152_v56 = vmul.f32 0.0, %v3546_v49  ;;  %v3557_v62 = vstv %s2995_s11  ;;  %s2972_s16 = sld [smem:[#allocation7 + $0x2a]] }
  0x4b   : > { %375 = vmax.xlane.f32.xlu1 %v374_v15  ;;  %5744 = vst [vmem:[#allocation21_spill] sm:$0xff] %v3557_v62  ;;  %v1275_v63 = vmul.f32 0.0, %v3557_v62  ;;  %v3564_v1 = vstv %s2970_s6  ;;  %s3003_s26 = sld [smem:[#allocation7 + $0x41]] }
  0x4c   : > { %372 = vmax.xlane.f32.xlu0 %v371_v16  ;;  %v736_v2 = vmul.f32 0.0, %v3564_v1  ;;  %v3570_v4 = vstv %s2997_s15  ;;  %s2977_s11 = sld [smem:[#allocation7 + $0x4d]] }
  0x4d   : > { %v3562_v0 = vstv %s2996_s9  ;;  %5746 = vst [vmem:[#allocation23_spill] sm:$0xff] %v3570_v4  ;;  %v1319_v8 = vmul.f32 0.0, %v3570_v4  ;;  %s3004_s28 = sld [smem:[#allocation7 + $0x48]] }
  0x4e   : > { %5745 = vst [vmem:[#allocation22_spill] sm:$0xff] %v3562_v0  ;;  %v1297_v3 = vmul.f32 0.0, %v3562_v0  ;;  %v3574_v6 = vstv %s2971_s17  ;;  %s2978_s9 = sld [smem:[#allocation7 + $0x54]] }
  0x4f   : > { %v759_v7 = vmul.f32 0.0, %v3574_v6  ;;  %v3580_v9 = vstv %s3002_s13  ;;  %s3009_s6 = sld [smem:[#allocation7 + $0xa]] }
  0x50   : > { %v3584_v11 = vstv %s2972_s16  ;;  %v1415_v13 = vmul.f32 0.0, %v3580_v9  ;;  %s2979_s15 = sld [smem:[#allocation7 + $0x5b]] }
  0x51   : > { %v782_v12 = vmul.f32 0.0, %v3584_v11  ;;  %v3590_v14 = vstv %s3003_s26  ;;  %s3010_s17 = sld [smem:[#allocation7 + $0x11]] }
  0x52   : > { %v3594_v16 = vstv %s2977_s11  ;;  %s2984_s13 = sld [smem:[#allocation7 + $0x1d]] }
  0x53   : > { %s3019_s16 = sld [smem:[#allocation7 + $0x50]] }
  0x54   : > { %s3020_s26 = sld [smem:[#allocation7 + $0x57]] }
  0x55   : > { %s3021_s11 = sld [smem:[#allocation7 + $0x5e]] }
  0x5c   : > { %386 = vperm.xlu2 %3150, %v383_v35   ;;  %v3614_v35 = vstv %s2979_s15  ;;  %s2986_s15 = sld [smem:[#allocation7 + $0x2b]] }
  0x64   : > { %429 = vperm.xlu1 %3152, %v419_v17   ;;  %434 = vperm.xlu2 %3150, %v420_v38   ;;  %v878_v17 = vmul.f32 0.0, %v3594_v16 }
  0x6c   : > { %671 = vrot.lane.b32.xlu1 %v665_v19, %s3306_s25  ;;  %439 = vperm.xlu2 %3150, %v421_v43   ;;  %v1437_v19 = vmul.f32 0.0, %v3590_v14 }
  0x74   : > { %694 = vrot.lane.b32.xlu1 %v688_v21, %s3307_s22  ;;  %744 = vrot.lane.b32.xlu2 %v736_v2, %s3309_s20  ;;  %v3600_v21 = vstv %s3004_s28  ;;  %s3025_s28 = sld [smem:[#allocation7 + $0x19]] }
  0x7c   : > { %717 = vrot.lane.b32.xlu1 %v711_v23, %s3308_s23  ;;  %767 = vrot.lane.b32.xlu2 %v759_v7, %s3310_s27  ;;  %v3665_v7 = vstv %s2986_s15  ;;  %s2993_s15 = sld [smem:[#allocation7 + $0x5c]] }
  0x7d   : > { %5761 = vst [vmem:[#allocation38_spill] sm:$0xff] %v3665_v7 }
  0x84   : > { %816 = vrot.lane.b32.xlu1 %v810_v25, %s3306_s25  ;;  %790 = vrot.lane.b32.xlu2 %v782_v12, %s3311_s24  ;;  %v3604_v25 = vstv %s2978_s9  ;;  %s2985_s9 = sld [smem:[#allocation7 + $0x24]] }
  0x8c   : > { %838 = vrot.lane.b32.xlu1 %v832_v27, %s3307_s22  ;;  %886 = vrot.lane.b32.xlu2 %v878_v17, %s3309_s20  ;;  %v900_v27 = vmul.f32 0.0, %v3604_v25 }
  0x94   : > { %860 = vrot.lane.b32.xlu1 %v854_v29, %s3308_s23  ;;  %v1459_v29 = vmul.f32 0.0, %v3600_v21  ;;  %908 = vrot.lane.b32.xlu2 %v900_v27, %s3310_s27 }
  0x9c   : > { %974 = vrot.lane.b32.xlu1 %v968_v31, %s3306_s25  ;;  %v3610_v31 = vstv %s3009_s6  ;;  %s3026_s6 = sld [smem:[#allocation7 + $0x20]] }
  0x9d   : > { %5750 = vst [vmem:[#allocation27_spill] sm:$0xff] %v3610_v31  ;;  %v1582_v38 = vmul.f32 0.0, %v3610_v31 }
  0xa4   : > { %996 = vrot.lane.b32.xlu1 %v990_v33, %s3307_s22 }
  0xac   : > { %1018 = vrot.lane.b32.xlu1 %v1012_v36, %s3308_s23  ;;  %v922_v36 = vmul.f32 0.0, %v3614_v35 }
  0xae   : > { %v357_v39 = vpop.xlane.xlu1 %356  ;;  %930 = vrot.lane.b32.xlu2 %v922_v36, %s3311_s24 }
  0xaf   : > { %v351_v40 = vpop.xlane.xlu0 %350  ;;  %v367_v44 = vpop.xlane.xlu2 %366  ;;  %v363_v51 = vmul.f32 0.00390625, %v357_v39  ;;  %v3620_v39 = vstv %s3010_s17  ;;  %s3027_s17 = sld [smem:[#allocation7 + $0x27]] }
  0xb0   : > { %v361_v57 = vmul.f32 0.00390625, %v351_v40  ;;  %5752 = vst [vmem:[#allocation29_spill] sm:$0xff] %v3620_v39 }
  0xb2   : > { %v378_v61 = vsel %vm377_vm0, %v361_v57, %v367_v44  ;;  %v1604_v44 = vmul.f32 0.0, %v3620_v39 }
  0xb4   : > { %1114 = vrot.lane.b32.xlu1 %v1108_v41, %s3306_s25  ;;  %v3624_v41 = vstv %s2984_s13  ;;  %s2991_s13 = sld [smem:[#allocation7 + $0x4e]] }
  0xb5   : > { %v1036_v43 = vmul.f32 0.0, %v3624_v41  ;;  %v3669_v12 = vstv %s3027_s17  ;;  %s3013_s17 = sld [smem:[#allocation7 + $0x26]] }
  0xb6   : > { %v360_v45 = vpop.xlane.xlu1 %359  ;;  %5762 = vst [vmem:[#allocation39_spill] sm:$0xff] %v3669_v12  ;;  %v1968_v17 = vmul.f32 0.0, %v3669_v12 }
  0xb7   : > { %v354_v46 = vpop.xlane.xlu0 %353  ;;  %v364_v48 = vmul.f32 0.00390625, %v360_v45  ;;  %v370_v55 = vpop.xlane.xlu2 %369  ;;  %1044 = vrot.lane.b32.xlu2 %v1036_v43, %s3309_s20  ;;  %v3630_v45 = vstv %s3019_s16  ;;  %s3028_s16 = sld [smem:[#allocation7 + $0x2e]] }
  0xb8   : > { %v362_v52 = vmul.f32 0.00390625, %v354_v46 }
  0xba   : > { %v379_v59 = vsel %vm377_vm0, %v362_v52, %v370_v55  ;;  %v3642_v52 = vstv %s3021_s11  ;;  %v3648_v55 = vstv %s3025_s28  ;;  %v3678_v27 = vstv %s2991_s13  ;;  %s3033_s13 = sld [smem:[#allocation7 + $0x51]] }
  0xbb   : > { %5757 = vst [vmem:[#allocation34_spill] sm:$0xff] %v3648_v55  ;;  %v1924_v57 = vmul.f32 0.0, %v3648_v55  ;;  %v1176_v36 = vmul.f32 0.0, %v3678_v27  ;;  %s3034_s11 = sld [smem:[#allocation7 + $0x58]] }
  0xbc   : > { %1136 = vrot.lane.b32.xlu1 %v1130_v47, %s3307_s22  ;;  %v1780_v47 = vmul.f32 0.0, %v3630_v45  ;;  %s2999_s28 = sld [smem:[#allocation7 + $0x25]] }
  0xbe   : > { %v376_v50 = vpop.xlane.xlu1 %375 }
  0xbf   : > { %v373_v53 = vpop.xlane.xlu0 %372  ;;  %v381_v54 = vsel %vm377_vm0, %v364_v48, %v376_v50  ;;  %v3636_v48 = vstv %s3020_s26  ;;  %s2992_s26 = sld [smem:[#allocation7 + $0x55]] }
  0xc0   : > { %405 = vmatpush.msra.mxu0 %v381_v54  ;;  %v380_v58 = vsel %vm377_vm0, %v363_v51, %v373_v53  ;;  %v1802_v51 = vmul.f32 0.0, %v3636_v48  ;;  %v1824_v54 = vmul.f32 0.0, %v3642_v52 }
  0xc2   : > { %406 = vmatpush.msra.mxu0 %v380_v58  ;;  %v387_v58 = vpop.permute.xlu2 %386 }
  0xc4   : > { %407 = vmatpush.msra.mxu0 %v379_v59  ;;  %1158 = vrot.lane.b32.xlu1 %v1152_v56, %s3308_s23 }
  0xc6   : > { %408 = vmatpush.msra.mxu0 %v378_v61 }
  0xc7   : > { %2957 = vmatmul.msk.f32.vlgmr.msra.gmra.mxu0 %vm389_vm1, %v382_v60  ;;  %v3656_v60 = vstv %s2985_s9  ;;  %s3012_s9 = sld [smem:[#allocation7 + $0x1f]] }
  0xc8   : > { %v1058_v61 = vmul.f32 0.0, %v3656_v60 }
  0xca   : > { %1066 = vrot.lane.b32.xlu2 %v1058_v61, %s3310_s27 }
  0xcc   : > { %1281 = vrot.lane.b32.xlu1 %v1275_v63, %s3306_s25  ;;  %v3659_v63 = vstv %s3026_s6  ;;  %s3032_s6 = sld [smem:[#allocation7 + $0x4a]] }
  0xcd   : > { %5760 = vst [vmem:[#allocation37_spill] sm:$0xff] %v3659_v63  ;;  %v1946_v2 = vmul.f32 0.0, %v3659_v63 }
  0xd4   : > { %1303 = vrot.lane.b32.xlu1 %v1297_v3, %s3307_s22  ;;  %v3663_v3 = vpop.permute.xlu2 %434 }
  0xd6   : > { %v3572_v5 = vpop.permute.xlu1 %429 }
  0xdc   : > { %1325 = vrot.lane.b32.xlu1 %v1319_v8, %s3308_s23  ;;  %v1080_v8 = vmul.f32 0.0, %v3665_v7 }
  0xde   : > { %v3582_v10 = vpop.permute.xlu1 %671  ;;  %1088 = vrot.lane.b32.xlu2 %v1080_v8, %s3311_s24 }
  0xdf   : > { %5747 = vst [vmem:[#allocation24_spill] sm:$0xff] %v3582_v10 }
  0xe4   : > { %1421 = vrot.lane.b32.xlu1 %v1415_v13, %s3306_s25 }
  0xe6   : > { %v3592_v15 = vpop.permute.xlu1 %694  ;;  %1184 = vrot.lane.b32.xlu2 %v1176_v36, %s3309_s20  ;;  %v3709_v36 = vstv %s3013_s17  ;;  %s3041_s17 = sld [smem:[#allocation7 + $0x28]] }
  0xe7   : > { %5748 = vst [vmem:[#allocation25_spill] sm:$0xff] %v3592_v15 }
  0xe8   : > { %5769 = vst [vmem:[#allocation46_spill] sm:$0xff] %v3709_v36 }
  0xec   : > { %1443 = vrot.lane.b32.xlu1 %v1437_v19, %s3307_s22  ;;  %v418_v19 = vld [vmem:[%s5538_s4] sm:$0xff]  ;;  %v3808_v10 = vstv %s3041_s17  ;;  %s3051_s17 = sld [smem:[#allocation7 + $0xd]] }
  0xed   : > { %424 = vperm.xlu0 %3151, %v418_v19   ;;  %5787 = vst [vmem:[#allocation64_spill] sm:$0xff] %v3808_v10 }
  0xee   : > { %v3602_v23 = vpop.permute.xlu1 %717 }
  0xef   : > { %5749 = vst [vmem:[#allocation26_spill] sm:$0xff] %v3602_v23 }
  0xf4   : > { %1465 = vrot.lane.b32.xlu1 %v1459_v29, %s3308_s23  ;;  %v3681_v29 = vpop.permute.xlu2 %439 }
  0xf6   : > { %v3612_v33 = vpop.permute.xlu1 %816 }
  0xf7   : > { %5751 = vst [vmem:[#allocation28_spill] sm:$0xff] %v3612_v33 }
  0xfc   : > { %1588 = vrot.lane.b32.xlu1 %v1582_v38, %s3306_s25  ;;  %v3684_v38 = vstv %s3028_s16  ;;  %v3698_v61 = vpop.permute.xlu2 %744  ;;  %s3706_s16 = sld [smem:[#allocation7 + $0x1e]] }
  0xfd   : > { %5764 = vst [vmem:[#allocation41_spill] sm:$0xff] %v3684_v38 }
  0xfe   : > { %v3622_v40 = vpop.permute.xlu1 %838  ;;  %5767 = vst [vmem:[#allocation44_spill] sm:$0xff] %v3698_v61 }
  0xff   : > { %5753 = vst [vmem:[#allocation30_spill] sm:$0xff] %v3622_v40 }
 0x104   : > { %1610 = vrot.lane.b32.xlu1 %v1604_v44, %s3307_s22  ;;  %v1990_v44 = vmul.f32 0.0, %v3684_v38 }
 0x106   : > { %v3632_v46 = vpop.permute.xlu1 %860 }
 0x107   : > { %5754 = vst [vmem:[#allocation31_spill] sm:$0xff] %v3632_v46 }
 0x10c   : > { %1788 = vrot.lane.b32.xlu1 %v1780_v47, %s3309_s20  ;;  %v3690_v47 = vstv %s2992_s26  ;;  %s3014_s26 = sld [smem:[#allocation7 + $0x2d]] }
 0x10e   : > { %v3638_v50 = vpop.permute.xlu1 %974 }
 0x10f   : > { %5755 = vst [vmem:[#allocation32_spill] sm:$0xff] %v3638_v50 }
 0x114   : > { %1810 = vrot.lane.b32.xlu1 %v1802_v51, %s3310_s27  ;;  %v3693_v51 = vstv %s3012_s9  ;;  %s3023_s9 = sld [smem:[#allocation7 + $0xb]] }
 0x115   : > { %5766 = vst [vmem:[#allocation43_spill] sm:$0xff] %v3693_v51 }
 0x116   : > { %v3644_v53 = vpop.permute.xlu1 %996 }
 0x117   : > { %5756 = vst [vmem:[#allocation33_spill] sm:$0xff] %v3644_v53  ;;  %v3742_v53 = vstv %s3034_s11  ;;  %s3039_s11 = sld [smem:[#allocation7 + $0x1a]] }
 0x11c   : > { %1832 = vrot.lane.b32.xlu1 %v1824_v54, %s3311_s24  ;;  %v1198_v54 = vmul.f32 0.0, %v3690_v47 }
 0x11d   : > { %v3778_v33 = vstv %s3039_s11  ;;  %s3042_s11 = sld [smem:[#allocation7 + $0x2f]] }
 0x11e   : > { %v3650_v56 = vpop.permute.xlu1 %1018  ;;  %1206 = vrot.lane.b32.xlu2 %v1198_v54, %s3310_s27  ;;  %5782 = vst [vmem:[#allocation59_spill] sm:$0xff] %v3778_v33 }
 0x11f   : > { %5758 = vst [vmem:[#allocation35_spill] sm:$0xff] %v3650_v56  ;;  %v3740_v56 = vstv %s3706_s16  ;;  %s3000_s16 = sld [smem:[#allocation7 + $0x2c]] }
 0x120   : > { %5773 = vst [vmem:[#allocation50_spill] sm:$0xff] %v3740_v56 }
 0x123   : > { %v3824_v63 = vstv %s3042_s11  ;;  %s3054_s11 = sld [smem:[#allocation7 + $0x22]] }
 0x124   : > { %1932 = vrot.lane.b32.xlu1 %v1924_v57, %s3308_s23  ;;  %v3696_v57 = vstv %s3032_s6  ;;  %s3035_s6 = sld [smem:[#allocation7 + $0x5f]]  ;;  %5791 = vst [vmem:[#allocation68_spill] sm:$0xff] %v3824_v63 }
 0x125   : > { %v3776_v40 = vstv %s3000_s16  ;;  %s3007_s16 = sld [smem:[#allocation7 + $0x5d]] }
 0x126   : > { %v3654_v59 = vpop.permute.xlu1 %1114  ;;  %5781 = vst [vmem:[#allocation58_spill] sm:$0xff] %v3776_v40 }
 0x127   : > { %5759 = vst [vmem:[#allocation36_spill] sm:$0xff] %v3654_v59 }
 0x12a   : > { %v3762_v50 = vstv %s3035_s6  ;;  %s3006_s6 = sld [smem:[#allocation7 + $0x56]] }
 0x12b   : > { %v3822_v12 = vstv %s3007_s16  ;;  %s3053_s16 = sld [smem:[#allocation7 + $0x1b]] }
 0x12c   : > { %1954 = vrot.lane.b32.xlu1 %v1946_v2, %s3309_s20  ;;  %v1645_v2 = vmul.f32 0.0, %v3693_v51 }
 0x12e   : > { %v3671_v13 = vpop.permute.xlu1 %1136  ;;  %1653 = vrot.lane.b32.xlu0 %v1645_v2, %s3309_s20  ;;  %v1667_v2 = vmul.f32 0.0, %v3709_v36 }
 0x12f   : > { %5763 = vst [vmem:[#allocation40_spill] sm:$0xff] %v3671_v13  ;;  %v3713_v13 = vstv %s3033_s13  ;;  %s3005_s13 = sld [smem:[#allocation7 + $0x4f]] }
 0x134   : > { %1976 = vrot.lane.b32.xlu1 %v1968_v17, %s3310_s27  ;;  %v2064_v17 = vmul.f32 0.0, %v3696_v57 }
 0x135   : > { %v3790_v61 = vstv %s3005_s13  ;;  %s3016_s13 = sld [smem:[#allocation7 + $0x3b]] }
 0x136   : > { %v3686_v43 = vpop.permute.xlu1 %1158  ;;  %1675 = vrot.lane.b32.xlu0 %v1667_v2, %s3310_s27  ;;  %v3737_v2 = vstv %s3014_s26  ;;  %s3024_s26 = sld [smem:[#allocation7 + $0x12]] }
 0x137   : > { %5765 = vst [vmem:[#allocation42_spill] sm:$0xff] %v3686_v43  ;;  %v3711_v43 = vstv %s2993_s15  ;;  %s3031_s15 = sld [smem:[#allocation7 + $0x43]] }
 0x138   : > { %5772 = vst [vmem:[#allocation49_spill] sm:$0xff] %v3737_v2 }
 0x13b   : > { %v3838_v55 = vstv %s3016_s13  ;;  %s3058_s13 = sld [smem:[#allocation7 + $0x3e]] }
 0x13c   : > { %1998 = vrot.lane.b32.xlu1 %v1990_v44, %s3311_s24 }
 0x13e   : > { %v3701_v8 = vpop.permute.xlu1 %1281 }
 0x13f   : > { %5768 = vst [vmem:[#allocation45_spill] sm:$0xff] %v3701_v8  ;;  %v414_v8 = vld [vmem:[%s5537_s3] sm:$0xff] }
 0x144   : > { %v410_v19 = vpop.f32.mrf.mxu0  ;;  %2072 = vrot.lane.b32.xlu1 %v2064_v17, %s3308_s23  ;;  %v3721_v17 = vpop.permute.xlu2 %767 }
 0x145   : > { %v411_v44 = vadd.f32 %v410_v19, %v387_v58  ;;  %5771 = vst [vmem:[#allocation48_spill] sm:$0xff] %v3721_v17  ;;  %v415_v58 = vld [vmem:[%s5537_s3 + $0x8] sm:$0xff]  ;;  %v417_v19 = vld [vmem:[%s5537_s3 + $0x18] sm:$0xff] }
 0x146   : > { %v3716_v59 = vpop.permute.xlu1 %1303 }
 0x147   : > { %5770 = vst [vmem:[#allocation47_spill] sm:$0xff] %v3716_v59  ;;  %v413_v54 = vmax.f32 %v411_v44, 0.0  ;;  %v1220_v44 = vmul.f32 0.0, %v3711_v43  ;;  %v2086_v59 = vmul.f32 0.0, %v3713_v13 }
 0x149   : > { %2958 = vmatpush.msk.msra.mxu1 %vm455_vm2, %v413_v54  ;;  %3073 = vmatpush.msk.msra.mxu2 %vm455_vm2, %v413_v54 }
 0x14a   : > { %3074 = vmatpush.msk.msra.mxu3 %vm455_vm2, %v413_v54  ;;  %2959 = vmatmul.msk.f32.vlgmr.msra.gmra.mxu1 %vm442_vm3, %v414_v8  ;;  %v1689_v54 = vmul.f32 0.0, %v3737_v2 }
 0x14b   : > { %2960 = vmatmul.msk.f32.vlgmr.msra.gmra.mxu2 %vm442_vm3, %v415_v58  ;;  %2962 = vmatmul.msk.f32.vlgmr.msra.gmra.mxu3 %vm442_vm3, %v417_v19  ;;  %v416_v58 = vld [vmem:[%s5537_s3 + $0x10] sm:$0xff]  ;;  %v2108_v19 = vmul.f32 0.0, %v3742_v53 }
 0x14c   : > { %1228 = vrot.lane.b32.xlu2 %v1220_v44, %s3311_s24  ;;  %2094 = vrot.lane.b32.xlu1 %v2086_v59, %s3309_s20  ;;  %v1343_v59 = vmul.f32 0.0, %v3740_v56  ;;  %v3753_v44 = vpop.permute.xlu2 %790 }
 0x14d   : > { %1697 = vrot.lane.b32.xlu0 %v1689_v54, %s3311_s24  ;;  %5775 = vst [vmem:[#allocation52_spill] sm:$0xff] %v3753_v44  ;;  %v3760_v54 = vstv %s2999_s28  ;;  %s3030_s28 = sld [smem:[#allocation7 + $0x3c]] }
 0x14e   : > { %v3745_v8 = vpop.permute.xlu1 %1325  ;;  %5777 = vst [vmem:[#allocation54_spill] sm:$0xff] %v3760_v54 }
 0x14f   : > { %5774 = vst [vmem:[#allocation51_spill] sm:$0xff] %v3745_v8  ;;  %v3758_v8 = vstv %s3023_s9  ;;  %s3040_s9 = sld [smem:[#allocation7 + $0x21]] }
 0x150   : > { %5776 = vst [vmem:[#allocation53_spill] sm:$0xff] %v3758_v8  ;;  %v1878_v17 = vmul.f32 0.0, %v3758_v8 }
 0x153   : > { %2961 = vmatmul.msk.f32.gmra.mxu2 %vm442_vm3, %v416_v58  ;;  %v1365_v58 = vmul.f32 0.0, %v3760_v54 }
 0x154   : > { %1351 = vrot.lane.b32.xlu2 %v1343_v59, %s3309_s20  ;;  %2116 = vrot.lane.b32.xlu1 %v2108_v19, %s3310_s27  ;;  %v2130_v59 = vmul.f32 0.0, %v3762_v50  ;;  %v3770_v44 = vpop.permute.xlu2 %886  ;;  %v3774_v19 = vstv %s3024_s26  ;;  %s3037_s26 = sld [smem:[#allocation7 + $0xc]] }
 0x155   : > { %1884 = vrot.lane.b32.xlu0 %v1878_v17, %s3306_s25  ;;  %5779 = vst [vmem:[#allocation56_spill] sm:$0xff] %v3770_v44  ;;  %v1900_v17 = vmul.f32 0.0, %v3774_v19  ;;  %v1387_v44 = vmul.f32 0.0, %v3776_v40  ;;  %v3792_v23 = vstv %s3040_s9  ;;  %s3046_s9 = sld [smem:[#allocation7 + $0x4b]] }
 0x156   : > { %v3765_v46 = vpop.permute.xlu1 %1421  ;;  %5780 = vst [vmem:[#allocation57_spill] sm:$0xff] %v3774_v19 }
 0x157   : > { %5778 = vst [vmem:[#allocation55_spill] sm:$0xff] %v3765_v46 }
 0x158   : > { %5784 = vst [vmem:[#allocation61_spill] sm:$0xff] %v3792_v23 }
 0x15b   : > { %v3840_v39 = vstv %s3046_s9  ;;  %s3059_s9 = sld [smem:[#allocation7 + $0x45]] }
 0x15c   : > { %1373 = vrot.lane.b32.xlu2 %v1365_v58, %s3310_s27  ;;  %2138 = vrot.lane.b32.xlu1 %v2130_v59, %s3311_s24  ;;  %v2231_v58 = vmul.f32 0.0, %v3778_v33  ;;  %v3788_v59 = vstv %s3030_s28  ;;  %v3794_v15 = vpop.permute.xlu2 %908  ;;  %v3804_v33 = vstv %s3031_s15  ;;  %s3038_s28 = sld [smem:[#allocation7 + $0x13]] }
 0x15d   : > { %1906 = vrot.lane.b32.xlu0 %v1900_v17, %s3307_s22  ;;  %5785 = vst [vmem:[#allocation62_spill] sm:$0xff] %v3794_v15  ;;  %v2018_v17 = vmul.f32 0.0, %v3788_v59  ;;  %v3806_v15 = vstv %s3006_s6  ;;  %s3017_s6 = sld [smem:[#allocation7 + $0x42]] }
 0x15e   : > { %v3781_v46 = vpop.permute.xlu1 %1443  ;;  %s3044_s15 = sld [smem:[#allocation7 + $0x3d]] }
 0x15f   : > { %5783 = vst [vmem:[#allocation60_spill] sm:$0xff] %v3781_v46 }
 0x163   : > { %v3854_v31 = vstv %s3017_s6  ;;  %s3056_s6 = sld [smem:[#allocation7 + $0x30]] }
 0x164   : > { %1395 = vrot.lane.b32.xlu2 %v1387_v44, %s3311_s24  ;;  %2239 = vrot.lane.b32.xlu1 %v2231_v58, %s3308_s23  ;;  %v1483_v44 = vmul.f32 0.0, %v3790_v61  ;;  %v2253_v58 = vmul.f32 0.0, %v3792_v23  ;;  %v3813_v38 = vpop.permute.xlu2 %930  ;;  %v3820_v23 = vstv %s3037_s26  ;;  %s3052_s26 = sld [smem:[#allocation7 + $0x14]] }
 0x165   : > { %2024 = vrot.lane.b32.xlu0 %v2018_v17, %s3306_s25  ;;  %5789 = vst [vmem:[#allocation66_spill] sm:$0xff] %v3813_v38  ;;  %v1527_v38 = vmul.f32 0.0, %v3822_v12 }
 0x166   : > { %v3797_v46 = vpop.permute.xlu1 %1465  ;;  %5790 = vst [vmem:[#allocation67_spill] sm:$0xff] %v3820_v23 }
 0x167   : > { %5786 = vst [vmem:[#allocation63_spill] sm:$0xff] %v3797_v46  ;;  %v2040_v46 = vmul.f32 0.0, %v3804_v33 }
 0x16c   : > { %1491 = vrot.lane.b32.xlu2 %v1483_v44, %s3309_s20  ;;  %2261 = vrot.lane.b32.xlu1 %v2253_v58, %s3309_s20  ;;  %v1505_v44 = vmul.f32 0.0, %v3806_v15  ;;  %v2275_v58 = vmul.f32 0.0, %v3808_v10  ;;  %v3832_v10 = vpop.permute.xlu2 %1044 }
 0x16d   : > { %2046 = vrot.lane.b32.xlu0 %v2040_v46, %s3307_s22  ;;  %5793 = vst [vmem:[#allocation70_spill] sm:$0xff] %v3832_v10  ;;  %v1717_v10 = vmul.f32 0.0, %v3838_v55 }
 0x16e   : > { %v3811_v17 = vpop.permute.xlu1 %1588 }
 0x16f   : > { %5788 = vst [vmem:[#allocation65_spill] sm:$0xff] %v3811_v17  ;;  %v2185_v17 = vmul.f32 0.0, %v3820_v23  ;;  %v3870_v23 = vstv %s3052_s26  ;;  %s3047_s26 = sld [smem:[#allocation7 + $0x52]] }
 0x170   : > { %5801 = vst [vmem:[#allocation78_spill] sm:$0xff] %v3870_v23 }
 0x174   : > { %1513 = vrot.lane.b32.xlu2 %v1505_v44, %s3310_s27  ;;  %2283 = vrot.lane.b32.xlu1 %v2275_v58, %s3310_s27  ;;  %v2297_v44 = vmul.f32 0.0, %v3824_v63  ;;  %v3836_v58 = vstv %s3038_s28  ;;  %v3848_v63 = vpop.permute.xlu2 %1066  ;;  %s3055_s28 = sld [smem:[#allocation7 + $0x29]] }
 0x175   : > { %2191 = vrot.lane.b32.xlu0 %v2185_v17, %s3306_s25  ;;  %5794 = vst [vmem:[#allocation71_spill] sm:$0xff] %v3836_v58  ;;  %v2207_v17 = vmul.f32 0.0, %v3836_v58  ;;  %v3856_v58 = vstv %s3051_s17  ;;  %s3312_s17 = smov 127  }
 0x176   : > { %v3827_v46 = vpop.permute.xlu1 %1610  ;;  %5796 = vst [vmem:[#allocation73_spill] sm:$0xff] %v3848_v63  ;;  %v1739_v63 = vmul.f32 0.0, %v3854_v31 }
 0x177   : > { %5792 = vst [vmem:[#allocation69_spill] sm:$0xff] %v3827_v46 }
 0x178   : > { %5797 = vst [vmem:[#allocation74_spill] sm:$0xff] %v3856_v58 }
 0x17c   : > { %1535 = vrot.lane.b32.xlu2 %v1527_v38, %s3311_s24  ;;  %2305 = vrot.lane.b32.xlu1 %v2297_v44, %s3311_s24  ;;  %v2371_v38 = vmul.f32 0.0, %v3840_v39  ;;  %v3852_v44 = vstv %s3044_s15  ;;  %v3864_v4 = vpop.permute.xlu2 %1088  ;;  %s3045_s15 = sld [smem:[#allocation7 + $0x44]] }
 0x17d   : > { %2213 = vrot.lane.b32.xlu0 %v2207_v17, %s3307_s22  ;;  %v2325_v17 = vmul.f32 0.0, %v3852_v44  ;;  %5799 = vst [vmem:[#allocation76_spill] sm:$0xff] %v3864_v4  ;;  %v3882_v4 = vstv %s3058_s13  ;;  %s3048_s13 = sld [smem:[#allocation7 + $0x59]] }
 0x17e   : > { %v3843_v46 = vpop.permute.xlu1 %1788  ;;  %5805 = vst [vmem:[#allocation82_spill] sm:$0xff] %v3882_v4 }
 0x17f   : > { %5795 = vst [vmem:[#allocation72_spill] sm:$0xff] %v3843_v46 }
 0x182   : > { %v3906_v19 = vstv %s3045_s15  ;;  %s655_s15 = sld [smem:[#allocation7]] }
 0x183   : > { %v2347_v62 = vmul.f32 0.0, %v3906_v19 }
 0x184   : > { %1723 = vrot.lane.b32.xlu2 %v1717_v10, %s3306_s25  ;;  %2379 = vrot.lane.b32.xlu1 %v2371_v38, %s3308_s23  ;;  %v2492_v10 = vmul.f32 0.0, %v3856_v58  ;;  %v3868_v38 = vstv %s3053_s16  ;;  %s3018_s16 = sld [smem:[#allocation7 + $0x49]] }
 0x185   : > { %2331 = vrot.lane.b32.xlu0 %v2325_v17, %s3306_s25  ;;  %5800 = vst [vmem:[#allocation77_spill] sm:$0xff] %v3868_v38  ;;  %v2538_v17 = vmul.f32 0.0, %v3868_v38  ;;  %v2632_v38 = vmul.f32 0.0, %v3882_v4 }
 0x186   : > { %v3859_v46 = vpop.permute.xlu1 %1810 }
 0x187   : > { %5798 = vst [vmem:[#allocation75_spill] sm:$0xff] %v3859_v46  ;;  %v2514_v46 = vmul.f32 0.0, %v3870_v23 }
 0x18c   : > { %1745 = vrot.lane.b32.xlu2 %v1739_v63, %s3307_s22  ;;  %2498 = vrot.lane.b32.xlu1 %v2492_v10, %s3306_s25  ;;  %v3878_v63 = vpop.permute.xlu2 %1184  ;;  %v3880_v10 = vstv %s3054_s11  ;;  %s3060_s11 = sld [smem:[#allocation7 + $0x4c]] }
 0x18d   : > { %5803 = vst [vmem:[#allocation80_spill] sm:$0xff] %v3878_v63  ;;  %2353 = vrot.lane.b32.xlu0 %v2347_v62, %s3307_s22 }
 0x18e   : > { %v3872_v0 = vpop.permute.xlu1 %1832  ;;  %5804 = vst [vmem:[#allocation81_spill] sm:$0xff] %v3880_v10 }
 0x18f   : > { %5802 = vst [vmem:[#allocation79_spill] sm:$0xff] %v3872_v0  ;;  %v2560_v0 = vmul.f32 0.0, %v3880_v10 }
 0x194   : > { %2546 = vrot.lane.b32.xlu2 %v2538_v17, %s3308_s23  ;;  %2520 = vrot.lane.b32.xlu1 %v2514_v46, %s3307_s22  ;;  %v3890_v17 = vstv %s3055_s28  ;;  %v3892_v46 = vstv %s3059_s9  ;;  %v3896_v23 = vpop.permute.xlu2 %1206  ;;  %s3061_s28 = sld [smem:[#allocation7 + $0x53]] }
 0x195   : > { %5807 = vst [vmem:[#allocation84_spill] sm:$0xff] %v3890_v17  ;;  %v2654_v10 = vmul.f32 0.0, %v3892_v46  ;;  %s3049_s9 = sld [smem:[#allocation7 + $0x60]] }
 0x196   : > { %v3884_v58 = vpop.permute.xlu1 %1932  ;;  %5808 = vst [vmem:[#allocation85_spill] sm:$0xff] %v3892_v46 }
 0x197   : > { %5806 = vst [vmem:[#allocation83_spill] sm:$0xff] %v3884_v58  ;;  %v2582_v58 = vmul.f32 0.0, %v3890_v17  ;;  %v425_v17 = vpop.permute.xlu0 %424 }
 0x198   : > { %5810 = vst [vmem:[#allocation87_spill] sm:$0xff] %v3896_v23 }
 0x19c   : > { %2568 = vrot.lane.b32.xlu2 %v2560_v0, %s3309_s20  ;;  %2638 = vrot.lane.b32.xlu1 %v2632_v38, %s3306_s25  ;;  %v3904_v38 = vstv %s3056_s6  ;;  %s3022_s6 = sld [smem:[#allocation7 + $0x4]] }
 0x19d   : > { %5812 = vst [vmem:[#allocation89_spill] sm:$0xff] %v3904_v38 }
 0x19e   : > { %v3894_v63 = vpop.permute.xlu1 %1954 }
 0x19f   : > { %5809 = vst [vmem:[#allocation86_spill] sm:$0xff] %v3894_v63  ;;  %v2604_v63 = vmul.f32 0.0, %v3904_v38 }
 0x1a4   : > { %2590 = vrot.lane.b32.xlu2 %v2582_v58, %s3310_s27  ;;  %2660 = vrot.lane.b32.xlu1 %v2654_v10, %s3307_s22 }
 0x1a6   : > { %v3902_v0 = vpop.permute.xlu1 %1976  ;;  %v3910_v8 = vpop.permute.xlu2 %1228 }
 0x1a7   : > { %5811 = vst [vmem:[#allocation88_spill] sm:$0xff] %v3902_v0 }
 0x1a8   : > { %5813 = vst [vmem:[#allocation90_spill] sm:$0xff] %v3910_v8 }
 0x1ac   : > { %2612 = vrot.lane.b32.xlu2 %v2604_v63, %s3311_s24 }
 0x1ae   : > { %v3914_v23 = vpop.permute.xlu1 %1998  ;;  %v3916_v58 = vpop.permute.xlu2 %1351 }
 0x1af   : > { %5814 = vst [vmem:[#allocation91_spill] sm:$0xff] %v3914_v23 }
 0x1b0   : > { %5815 = vst [vmem:[#allocation92_spill] sm:$0xff] %v3916_v58 }
 0x1b6   : > { %v3918_v10 = vpop.permute.xlu1 %2072  ;;  %v3920_v0 = vpop.permute.xlu2 %1373 }
 0x1b7   : > { %5816 = vst [vmem:[#allocation93_spill] sm:$0xff] %v3918_v10 }
 0x1b8   : > { %5817 = vst [vmem:[#allocation94_spill] sm:$0xff] %v3920_v0 }
 0x1be   : > { %v3922_v46 = vpop.permute.xlu1 %2094  ;;  %v3924_v2 = vpop.permute.xlu2 %1395 }
 0x1bf   : > { %5818 = vst [vmem:[#allocation95_spill] sm:$0xff] %v3922_v46  ;;  %v3932_v46 = vpop.permute.xlu0 %1653 }
 0x1c0   : > { %5819 = vst [vmem:[#allocation96_spill] sm:$0xff] %v3924_v2 }
 0x1c1   : > { %5822 = vst [vmem:[#allocation99_spill] sm:$0xff] %v3932_v46 }
 0x1c6   : > { %v3926_v62 = vpop.permute.xlu1 %2116  ;;  %v3930_v10 = vpop.permute.xlu2 %1491 }
 0x1c7   : > { %v476_v34 = vpop.f32.mrf.mxu1  ;;  %5820 = vst [vmem:[#allocation97_spill] sm:$0xff] %v3926_v62  ;;  %v3942_v62 = vpop.permute.xlu0 %1675 }
 0x1c8   : > { %v477_v38 = vadd.f32 %v476_v34, %v425_v17  ;;  %5821 = vst [vmem:[#allocation98_spill] sm:$0xff] %v3930_v10 }
 0x1c9   : > { %5825 = vst [vmem:[#allocation102_spill] sm:$0xff] %v3942_v62 }
 0x1ca   : > { %492 = vrot.lane.b32.xlu1 %v477_v38, %s3312_s17 }
 0x1ce   : > { %v479_v63 = vpop.f32.mrf.mxu2  ;;  %v485_v8 = vpop.f32.mrf.mxu3 }
 0x1cf   : > { %v480_v23 = vadd.f32 %v479_v63, %v3572_v5  ;;  %v486_v58 = vadd.f32 %v485_v8, %v3681_v29  ;;  %v3937_v34 = vpop.permute.xlu1 %2138  ;;  %v3940_v17 = vpop.permute.xlu2 %1513 }
 0x1d0   : > { %5823 = vst [vmem:[#allocation100_spill] sm:$0xff] %v3937_v34  ;;  %v3948_v8 = vpop.permute.xlu0 %1697 }
 0x1d1   : > { %498 = vrot.lane.b32.xlu0 %v486_v58, %s3312_s17  ;;  %494 = vrot.lane.b32.xlu2 %v480_v23, %s3312_s17  ;;  %5824 = vst [vmem:[#allocation101_spill] sm:$0xff] %v3940_v17 }
 0x1d2   : > { %5828 = vst [vmem:[#allocation105_spill] sm:$0xff] %v3948_v8 }
 0x1d6   : > { %v482_v0 = vpop.f32.mrf.mxu2 }
 0x1d7   : > { %v3935_v2 = vadd.f32 %v482_v0, %v3663_v3  ;;  %v3944_v5 = vpop.permute.xlu1 %2239  ;;  %v3946_v29 = vpop.permute.xlu2 %1535 }
 0x1d8   : > { %5826 = vst [vmem:[#allocation103_spill] sm:$0xff] %v3944_v5  ;;  %v3954_v3 = vpop.permute.xlu0 %1884 }
 0x1d9   : > { %496 = vrot.lane.b32.xlu1 %v3935_v2, %s3312_s17  ;;  %5827 = vst [vmem:[#allocation104_spill] sm:$0xff] %v3946_v29  ;;  %s3062_s17 = sld [smem:[#allocation7 + $0x5a]] }
 0x1da   : > { %5831 = vst [vmem:[#allocation108_spill] sm:$0xff] %v3954_v3 }
 0x1df   : > { %v3950_v63 = vpop.permute.xlu1 %2261  ;;  %v3952_v46 = vpop.permute.xlu2 %1723 }
 0x1e0   : > { %5829 = vst [vmem:[#allocation106_spill] sm:$0xff] %v3950_v63  ;;  %v3960_v10 = vpop.permute.xlu0 %1906 }
 0x1e1   : > { %5830 = vst [vmem:[#allocation107_spill] sm:$0xff] %v3952_v46 }
 0x1e2   : > { %5834 = vst [vmem:[#allocation111_spill] sm:$0xff] %v3960_v10 }
 0x1e7   : > { %v3956_v0 = vpop.permute.xlu1 %2283  ;;  %v3958_v34 = vpop.permute.xlu2 %1745 }
 0x1e8   : > { %5832 = vst [vmem:[#allocation109_spill] sm:$0xff] %v3956_v0  ;;  %v3966_v5 = vpop.permute.xlu0 %2024 }
 0x1e9   : > { %5833 = vst [vmem:[#allocation110_spill] sm:$0xff] %v3958_v34 }
 0x1ea   : > { %5837 = vst [vmem:[#allocation114_spill] sm:$0xff] %v3966_v5 }
 0x1ef   : > { %v3962_v17 = vpop.permute.xlu1 %2305  ;;  %v3964_v62 = vpop.permute.xlu2 %2546 }
 0x1f0   : > { %5835 = vst [vmem:[#allocation112_spill] sm:$0xff] %v3962_v17  ;;  %v3972_v63 = vpop.permute.xlu0 %2046 }
 0x1f1   : > { %5836 = vst [vmem:[#allocation113_spill] sm:$0xff] %v3964_v62 }
 0x1f2   : > { %5840 = vst [vmem:[#allocation117_spill] sm:$0xff] %v3972_v63 }
 0x1f7   : > { %v3968_v29 = vpop.permute.xlu1 %2379  ;;  %v3970_v8 = vpop.permute.xlu2 %2568 }
 0x1f8   : > { %5838 = vst [vmem:[#allocation115_spill] sm:$0xff] %v3968_v29  ;;  %v3978_v0 = vpop.permute.xlu0 %2191 }
 0x1f9   : > { %5839 = vst [vmem:[#allocation116_spill] sm:$0xff] %v3970_v8 }
 0x1fa   : > { %5843 = vst [vmem:[#allocation120_spill] sm:$0xff] %v3978_v0 }
 0x1ff   : > { %v3974_v46 = vpop.permute.xlu1 %2498  ;;  %v3976_v3 = vpop.permute.xlu2 %2590 }
 0x200   : > { %5841 = vst [vmem:[#allocation118_spill] sm:$0xff] %v3974_v46  ;;  %v3984_v17 = vpop.permute.xlu0 %2213 }
 0x201   : > { %5842 = vst [vmem:[#allocation119_spill] sm:$0xff] %v3976_v3 }
 0x202   : > { %5846 = vst [vmem:[#allocation123_spill] sm:$0xff] %v3984_v17 }
 0x207   : > { %v3980_v34 = vpop.permute.xlu1 %2520  ;;  %v3982_v10 = vpop.permute.xlu2 %2612 }
 0x208   : > { %5844 = vst [vmem:[#allocation121_spill] sm:$0xff] %v3980_v34  ;;  %v3988_v8 = vpop.permute.xlu0 %2331 }
 0x209   : > { %5845 = vst [vmem:[#allocation122_spill] sm:$0xff] %v3982_v10 }
 0x20a   : > { %5848 = vst [vmem:[#allocation125_spill] sm:$0xff] %v3988_v8 }
 0x20f   : > { %v3986_v62 = vpop.permute.xlu1 %2638 }
 0x210   : > { %5847 = vst [vmem:[#allocation124_spill] sm:$0xff] %v3986_v62  ;;  %v3992_v0 = vpop.permute.xlu0 %2353 }
 0x211   : > { %5850 = vst [vmem:[#allocation127_spill] sm:$0xff] %v3992_v0 }
 0x217   : > { %v3990_v63 = vpop.permute.xlu1 %2660 }
 0x218   : > { %5849 = vst [vmem:[#allocation126_spill] sm:$0xff] %v3990_v63 }
 0x22b   : > { %v495_v5 = vpop.permute.xlu2 %494 }
 0x22c   : > { %v505_v29 = vadd.f32 %v495_v5, %v480_v23 }
 0x22e   : > { %v2964_v32 = vmul.f32 -1.442695, %v505_v29 }
 0x230   : > { %3153 = vpow2.f32 %v2964_v32 }
 0x236   : > { %v3154_v46 = vpop.eup %3153 }
 0x237   : > { %v521_v3 = vadd.f32 1.0, %v3154_v46 }
 0x239   : > { %3155 = vrcp.f32 %v521_v3  ;;  %v550_v23 = vand.u32 2147483648, %v521_v3  ;;  %v548_v32 = vand.u32 2147483647, %v521_v3  ;;  %vm544_vm5 = vweird.f32 %v521_v3 }
 0x23b   : > { %v551_v22 = vor.u32 1.1754944e-38, %v550_v23  ;;  %vm549_vm7 = vcmp.eq.f32.partialorder %v548_v32, 8.507059e+37 }
 0x23c   : > { %v493_v34 = vpop.permute.xlu1 %492 }
 0x23d   : > { %v504_v36 = vadd.f32 %v493_v34, %v477_v38 }
 0x23f   : > { %v3156_v10 = vpop.eup %3155  ;;  %v2963_v30 = vmul.f32 -1.442695, %v504_v36 }
 0x240   : > { %v540_v17 = vmul.f32 %v3156_v10, %v521_v3  ;;  %vm545_vm4 = vweird.f32 %v3156_v10 }
 0x241   : > { %3157 = vpow2.f32 %v2963_v30  ;;  %vm546_vm6 = vmor %vm544_vm5, %vm545_vm4  ;;  %vm677_vm5 = vcmask 916480  }
 0x242   : > { %v541_v62 = vsub.f32 1.0, %v540_v17 }
 0x243   : > { %v499_v51 = vpop.permute.xlu0 %498 }
 0x244   : > { %v507_v5 = vadd.f32 %v499_v51, %v486_v58  ;;  %v542_v29 = vmul.f32 %v3156_v10, %v541_v62 }
 0x246   : > { %v2966_v8 = vmul.f32 -1.442695, %v507_v5  ;;  %v543_v63 = vadd.f32 %v3156_v10, %v542_v29 }
 0x247   : > { %v3158_v46 = vpop.eup %3157 }
 0x248   : > { %v520_v0 = vadd.f32 1.0, %v3158_v46  ;;  %3159 = vpow2.f32 %v2966_v8  ;;  %v547_v38 = vsel %vm546_vm6, %v3156_v10, %v543_v63  ;;  %vm700_vm6 = vcmask 785408  }
 0x249   : > { %v552_v36 = vsel %vm549_vm7, %v551_v22, %v547_v38  ;;  %vm723_vm7 = vcmask 654336  }
 0x24a   : > { %3161 = vrcp.f32 %v520_v0  ;;  %591 = vperm.xlu1 %3152, %v552_v36   ;;  %v535_v29 = vand.u32 2147483648, %v520_v0  ;;  %v533_v8 = vand.u32 2147483647, %v520_v0  ;;  %vm529_vm9 = vweird.f32 %v520_v0 }
 0x24b   : > { %v497_v30 = vpop.permute.xlu1 %496 }
 0x24c   : > { %v506_v34 = vadd.f32 %v497_v30, %v3935_v2  ;;  %v536_v46 = vor.u32 1.1754944e-38, %v535_v29  ;;  %vm534_vm11 = vcmp.eq.f32.partialorder %v533_v8, 8.507059e+37 }
 0x24e   : > { %v3160_v51 = vpop.eup %3159  ;;  %v2965_v58 = vmul.f32 -1.442695, %v506_v34 }
 0x24f   : > { %v523_v62 = vadd.f32 1.0, %v3160_v51 }
 0x250   : > { %v3162_v17 = vpop.eup %3161  ;;  %3163 = vpow2.f32 %v2965_v58 }
 0x251   : > { %3165 = vrcp.f32 %v523_v62  ;;  %v525_v3 = vmul.f32 %v3162_v17, %v520_v0  ;;  %vm530_vm8 = vweird.f32 %v3162_v17  ;;  %v580_v51 = vand.u32 2147483648, %v523_v62 }
 0x252   : > { %vm531_vm10 = vmor %vm529_vm9, %vm530_vm8  ;;  %v578_v58 = vand.u32 2147483647, %v523_v62  ;;  %vm574_vm13 = vweird.f32 %v523_v62  ;;  %vm746_vm8 = vcmask 523264   ;;  %vm769_vm9 = vcmask 392192  }
 0x253   : > { %v526_v5 = vsub.f32 1.0, %v525_v3 }
 0x254   : > { %vm579_vm15 = vcmp.eq.f32.partialorder %v578_v58, 8.507059e+37 }
 0x255   : > { %v527_v23 = vmul.f32 %v3162_v17, %v526_v5 }
 0x256   : > { %v3164_v10 = vpop.eup %3163 }
 0x257   : > { %v3166_v63 = vpop.eup %3165  ;;  %v522_v22 = vadd.f32 1.0, %v3164_v10  ;;  %v528_v32 = vadd.f32 %v3162_v17, %v527_v23  ;;  %v581_v23 = vor.u32 1.1754944e-38, %v580_v51  ;;  %v3178_v51 = vld [vmem:[%s3472_s21 + $0x38] sm:$0xff] }
 0x258   : > { %v570_v2 = vmul.f32 %v3166_v63, %v523_v62  ;;  %vm575_vm12 = vweird.f32 %v3166_v63 }
 0x259   : > { %3167 = vrcp.f32 %v522_v22  ;;  %v532_v38 = vsel %vm531_vm10, %v3162_v17, %v528_v32  ;;  %vm576_vm14 = vmor %vm574_vm13, %vm575_vm12  ;;  %v565_v17 = vand.u32 2147483648, %v522_v22  ;;  %v563_v32 = vand.u32 2147483647, %v522_v22 }
 0x25a   : > { %v537_v36 = vsel %vm534_vm11, %v536_v46, %v532_v38  ;;  %v571_v30 = vsub.f32 1.0, %v570_v2  ;;  %vm559_vm2 = vweird.f32 %v522_v22  ;;  %vm1250_vm10 = vcmask 408576  }
 0x25b   : > { %586 = vperm.xlu2 %3150, %v537_v36   ;;  %v566_v62 = vor.u32 1.1754944e-38, %v565_v17  ;;  %vm564_vm4 = vcmp.eq.f32.partialorder %v563_v32, 8.507059e+37  ;;  %v3182_v17 = vld [vmem:[%s3472_s21 + $0x18] sm:$0xff]  ;;  %v3183_v32 = vld [vmem:[%s3472_s21 + $0x20] sm:$0xff]  ;;  %vm1557_vm11 = vcmask 400384   ;;  %vm2160_vm12 = vcmask 384000  }
 0x25c   : > { %v572_v34 = vmul.f32 %v3166_v63, %v571_v30  ;;  %vm2467_vm13 = vcmask 375808  }
 0x25e   : > { %v573_v3 = vadd.f32 %v3166_v63, %v572_v34 }
 0x25f   : > { %v3168_v5 = vpop.eup %3167 }
 0x260   : > { %v577_v10 = vsel %vm576_vm14, %v3166_v63, %v573_v3  ;;  %v555_v0 = vmul.f32 %v3168_v5, %v522_v22  ;;  %vm560_vm0 = vweird.f32 %v3168_v5  ;;  %v3179_v22 = vld [vmem:[%s3472_s21] sm:$0xff]  ;;  %vm2774_vm14 = vcmask 367616  }
 0x261   : > { %v582_v29 = vsel %vm579_vm15, %v581_v23, %v577_v10  ;;  %vm561_vm3 = vmor %vm559_vm2, %vm560_vm0 }
 0x262   : > { %v556_v20 = vsub.f32 1.0, %v555_v0  ;;  %v3181_v0 = vld [vmem:[%s3472_s21 + $0x10] sm:$0xff] }
 0x263   : > { %601 = vperm.xlu2 %3150, %v582_v29  }
 0x264   : > { %v557_v8 = vmul.f32 %v3168_v5, %v556_v20  ;;  %v3177_v20 = vld [vmem:[%s3472_s21 + $0x30] sm:$0xff] }
 0x266   : > { %v558_v46 = vadd.f32 %v3168_v5, %v557_v8 }
 0x268   : > { %v562_v2 = vsel %vm561_vm3, %v3168_v5, %v558_v46  ;;  %v3180_v5 = vld [vmem:[%s3472_s21 + $0x8] sm:$0xff] }
 0x269   : > { %v567_v63 = vsel %vm564_vm4, %v566_v62, %v562_v2  ;;  %v3184_v62 = vld [vmem:[%s3472_s21 + $0x28] sm:$0xff]  ;;  %s4071_s21 = sld [smem:[#allocation7 + $0x18]] }
 0x26a   : > { %596 = vperm.xlu0 %3151, %v567_v63  }
 0x2b5   : > { %v587_v38 = vpop.permute.xlu2 %586 }
 0x2b6   : > { %v4002_v3 = vmul.f32 %v3179_v22, %v587_v38  ;;  %v4005_v10 = vmul.f32 %v3180_v5, %v587_v38 }
 0x2b8   : > { %5853 = vst [vmem:[#allocation130_spill] sm:$0xff] %v4002_v3 }
 0x2b9   : > { %5854 = vst [vmem:[#allocation131_spill] sm:$0xff] %v4005_v10 }
 0x2bc   : > { %v592_v30 = vpop.permute.xlu1 %591 }
 0x2bd   : > { %v602_v36 = vpop.permute.xlu2 %601  ;;  %v4008_v29 = vmul.f32 %v3181_v0, %v592_v30  ;;  %v4011_v8 = vmul.f32 %v3182_v17, %v592_v30 }
 0x2be   : > { %v3996_v34 = vmul.f32 %v3177_v20, %v602_v36  ;;  %v3999_v58 = vmul.f32 %v3178_v51, %v602_v36 }
 0x2bf   : > { %5855 = vst [vmem:[#allocation132_spill] sm:$0xff] %v4008_v29 }
 0x2c0   : > { %5851 = vst [vmem:[#allocation128_spill] sm:$0xff] %v3996_v34  ;;  %v633_v63 = vmax.f32 %v4008_v29, %v3996_v34  ;;  %v642_v38 = vmax.f32 %v4011_v8, %v3999_v58 }
 0x2c1   : > { %5852 = vst [vmem:[#allocation129_spill] sm:$0xff] %v3999_v58 }
 0x2c2   : > { %5856 = vst [vmem:[#allocation133_spill] sm:$0xff] %v4011_v8 }
 0x2dc   : > { %v597_v23 = vpop.permute.xlu0 %596 }
 0x2dd   : > { %v4014_v46 = vmul.f32 %v3183_v32, %v597_v23  ;;  %v4017_v2 = vmul.f32 %v3184_v62, %v597_v23 }
 0x2df   : > { %5857 = vst [vmem:[#allocation134_spill] sm:$0xff] %v4014_v46  ;;  %v632_v36 = vmax.f32 %v4002_v3, %v4014_v46  ;;  %v641_v20 = vmax.f32 %v4005_v10, %v4017_v2 }
 0x2e0   : > { %5858 = vst [vmem:[#allocation135_spill] sm:$0xff] %v4017_v2 }
 0x2e1   : > { %v634_v30 = vmax.f32 %v632_v36, %v633_v63  ;;  %v643_v51 = vmax.f32 %v641_v20, %v642_v38  ;;  %v621_v38 = vadd.f32 %v4011_v8, %v4005_v10  ;;  %v5899_v8 = vstv %s4071_s21 }
 0x2e3   : > { %v635_v22 = vrot.slane %v634_v30, 4  ;;  %v644_v5 = vrot.slane %v643_v51, 4 }
 0x2e5   : > { %v636_v0 = vmax.f32 %v634_v30, %v635_v22  ;;  %v645_v17 = vmax.f32 %v643_v51, %v644_v5 }
 0x2e7   : > { %v637_v23 = vrot.slane %v636_v0, 2  ;;  %v646_v32 = vrot.slane %v645_v17, 2 }
 0x2e9   : > { %v638_v62 = vmax.f32 %v636_v0, %v637_v23  ;;  %v647_v40 = vmax.f32 %v645_v17, %v646_v32 }
 0x2eb   : > { %v639_v18 = vrot.slane %v638_v62, 1  ;;  %v648_v54 = vrot.slane %v647_v40, 1 }
 0x2ed   : > { %v4027_v4 = vmax.f32 %v638_v62, %v639_v18  ;;  %v4029_v56 = vmax.f32 %v647_v40, %v648_v54  ;;  %v622_v18 = vadd.f32 %v621_v38, %v4017_v2 }
 0x2ef   : > { %5859 = vst [vmem:[#allocation136_spill] sm:$0xff] %v4029_v56  ;;  %v812_v7 = vmul.f32 %v3505_v24, %v4029_v56  ;;  %v876_v63 = vmul.f32 %v3594_v16, %v4027_v4  ;;  %v811_v36 = vmul.f32 %v3505_v24, %v4027_v4  ;;  %v623_v40 = vadd.f32 %v622_v18, %v3999_v58  ;;  %v5898_v58 = vld [vmem:[#allocation16_spill] sm:$0xff] }
 0x2f0   : > { %v834_v54 = vmul.f32 %v3509_v26, %v4029_v56  ;;  %v898_v20 = vmul.f32 %v3604_v25, %v4027_v4  ;;  %v833_v30 = vmul.f32 %v3509_v26, %v4027_v4  ;;  %v856_v51 = vmul.f32 %v3513_v28, %v4029_v56 }
 0x2f1   : > { %820 = vrot.lane.b32.xlu2 %v812_v7, %s3306_s25  ;;  %882 = vrot.lane.b32.xlu1 %v876_v63, %s3309_s20  ;;  %v624_v24 = vrot.slane %v623_v40, 4  ;;  %v920_v22 = vmul.f32 %v3614_v35, %v4027_v4  ;;  %v855_v5 = vmul.f32 %v3513_v28, %v4027_v4  ;;  %v1110_v17 = vmul.f32 %v3532_v37, %v4029_v56 }
 0x2f2   : > { %818 = vrot.lane.b32.xlu0 %v811_v36, %s3306_s25  ;;  %v1174_v23 = vmul.f32 %v3678_v27, %v4027_v4  ;;  %v877_v32 = vmul.f32 %v3594_v16, %v4029_v56  ;;  %v1132_v63 = vmul.f32 %v3539_v42, %v4029_v56  ;;  %v1196_v38 = vmul.f32 %v3690_v47, %v4027_v4 }
 0x2f3   : > { %v625_v7 = vadd.f32 %v624_v24, %v623_v40  ;;  %v899_v16 = vmul.f32 %v3604_v25, %v4029_v56  ;;  %v5622_v18 = vstv %s4071_s21  ;;  %v921_v25 = vmul.f32 %v3614_v35, %v4029_v56  ;;  %s3063_s21 = sld [smem:[#allocation7 + $0x61]] }
 0x2f4   : > { %v1481_v24 = vmul.f32 %v3790_v61, %v4027_v4  ;;  %v1439_v35 = vmul.f32 %v3590_v14, %v4029_v56 }
 0x2f5   : > { %v626_v26 = vrot.slane %v625_v7, 2 }
 0x2f7   : > { %v627_v0 = vadd.f32 %v626_v26, %v625_v7  ;;  %v1109_v7 = vmul.f32 %v3532_v37, %v4027_v4  ;;  %v1461_v37 = vmul.f32 %v3600_v21, %v4029_v56  ;;  %v1153_v26 = vmul.f32 %v3546_v49, %v4027_v4 }
 0x2f9   : > { %842 = vrot.lane.b32.xlu2 %v834_v54, %s3307_s22  ;;  %904 = vrot.lane.b32.xlu1 %v898_v20, %s3310_s27  ;;  %v628_v28 = vrot.slane %v627_v0, 1  ;;  %v1154_v54 = vmul.f32 %v3546_v49, %v4029_v56  ;;  %v1218_v20 = vmul.f32 %v3711_v43, %v4027_v4  ;;  %v1779_v49 = vmul.f32 %v3630_v45, %v4029_v56 }
 0x2fa   : > { %840 = vrot.lane.b32.xlu0 %v833_v30, %s3307_s22  ;;  %v1417_v30 = vmul.f32 %v3580_v9, %v4029_v56 }
 0x2fb   : > { %v629_v62 = vadd.f32 %v628_v28, %v627_v0  ;;  %v1197_v28 = vmul.f32 %v3690_v47, %v4029_v56 }
 0x2fd   : > { %v4081_v36 = vmul.f32 0.03125, %v629_v62  ;;  %v1801_v62 = vmul.f32 %v3636_v48, %v4029_v56 }
 0x2ff   : > { %5860 = vst [vmem:[#allocation137_spill] sm:$0xff] %v4081_v36  ;;  %v4088_v40 = vmul.f32 %v5622_v18, %v4081_v36  ;;  %v690_v2 = vmul.f32 %v5898_v58, %v4081_v36 }
 0x301   : > { %864 = vrot.lane.b32.xlu2 %v856_v51, %s3308_s23  ;;  %926 = vrot.lane.b32.xlu1 %v920_v22, %s3311_s24  ;;  %v1503_v51 = vmul.f32 %v3806_v15, %v4027_v4  ;;  %v1131_v22 = vmul.f32 %v3539_v42, %v4027_v4  ;;  %v1760_v42 = vstv %s3018_s16  ;;  %s2973_s16 = sld [smem:[#allocation7 + $0x31]] }
 0x302   : > { %862 = vrot.lane.b32.xlu0 %v855_v5, %s3308_s23  ;;  %v1525_v5 = vmul.f32 %v3822_v12, %v4027_v4  ;;  %v1761_v0 = vmul.f32 %v1760_v42, %v4027_v4 }
 0x309   : > { %1118 = vrot.lane.b32.xlu2 %v1110_v17, %s3306_s25  ;;  %1180 = vrot.lane.b32.xlu1 %v1174_v23, %s3309_s20  ;;  %v1718_v17 = vmul.f32 %v3838_v55, %v4027_v4  ;;  %v1175_v23 = vmul.f32 %v3678_v27, %v4029_v56  ;;  %v1762_v27 = vmul.f32 %v1760_v42, %v4029_v56 }
 0x30a   : > { %884 = vrot.lane.b32.xlu0 %v877_v32, %s3309_s20  ;;  %v1740_v32 = vmul.f32 %v3854_v31, %v4027_v4  ;;  %v1460_v42 = vmul.f32 %v3600_v21, %v4027_v4  ;;  %v2349_v21 = vmul.f32 %v3906_v19, %v4029_v56 }
 0x311   : > { %1140 = vrot.lane.b32.xlu2 %v1132_v63, %s3307_s22  ;;  %1202 = vrot.lane.b32.xlu1 %v1196_v38, %s3310_s27  ;;  %v1219_v63 = vmul.f32 %v3711_v43, %v4029_v56  ;;  %v612_v38 = vadd.f32 %v4008_v29, %v4002_v3  ;;  %v2020_v43 = vmul.f32 %v3788_v59, %v4029_v56  ;;  %v5894_v29 = vld [vmem:[#allocation58_spill] sm:$0xff] }
 0x312   : > { %906 = vrot.lane.b32.xlu0 %v899_v16, %s3310_s27 }
 0x313   : > { %v613_v47 = vadd.f32 %v612_v38, %v4014_v46  ;;  %v2085_v38 = vmul.f32 %v3713_v13, %v4029_v56 }
 0x319   : > { %1162 = vrot.lane.b32.xlu2 %v1154_v54, %s3308_s23  ;;  %1224 = vrot.lane.b32.xlu1 %v1218_v20, %s3311_s24  ;;  %v614_v54 = vadd.f32 %v613_v47, %v3996_v34  ;;  %v1823_v20 = vmul.f32 %v3642_v52, %v4029_v56  ;;  %v1504_v47 = vmul.f32 %v3806_v15, %v4029_v56  ;;  %v5893_v34 = vld [vmem:[#allocation15_spill] sm:$0xff] }
 0x31a   : > { %928 = vrot.lane.b32.xlu0 %v921_v25, %s3311_s24  ;;  %v1416_v25 = vmul.f32 %v3580_v9, %v4027_v4  ;;  %v1526_v15 = vmul.f32 %v3822_v12, %v4029_v56  ;;  %v1719_v12 = vmul.f32 %v3838_v55, %v4029_v56  ;;  %v1741_v55 = vmul.f32 %v3854_v31, %v4029_v56 }
 0x31b   : > { %v1778_v31 = vmul.f32 %v3630_v45, %v4027_v4  ;;  %v1800_v45 = vmul.f32 %v3636_v48, %v4027_v4  ;;  %v667_v46 = vmul.f32 %v5893_v34, %v4081_v36 }
 0x321   : > { %1425 = vrot.lane.b32.xlu2 %v1417_v30, %s3306_s25  ;;  %1487 = vrot.lane.b32.xlu1 %v1481_v24, %s3309_s20  ;;  %v615_v30 = vrot.slane %v614_v54, 4 }
 0x322   : > { %1116 = vrot.lane.b32.xlu0 %v1109_v7, %s3306_s25 }
 0x323   : > { %v616_v7 = vadd.f32 %v615_v30, %v614_v54 }
 0x325   : > { %v617_v9 = vrot.slane %v616_v7, 2 }
 0x329   : > { %1447 = vrot.lane.b32.xlu2 %v1439_v35, %s3307_s22  ;;  %1509 = vrot.lane.b32.xlu1 %v1503_v51, %s3310_s27  ;;  %v2019_v35 = vmul.f32 %v3788_v59, %v4027_v4  ;;  %v2042_v51 = vmul.f32 %v3804_v33, %v4029_v56  ;;  %v2327_v59 = vmul.f32 %v3852_v44, %v4029_v56 }
 0x32a   : > { %1138 = vrot.lane.b32.xlu0 %v1131_v22, %s3307_s22  ;;  %v1438_v22 = vmul.f32 %v3590_v14, %v4027_v4 }
 0x331   : > { %1469 = vrot.lane.b32.xlu2 %v1461_v37, %s3308_s23  ;;  %1531 = vrot.lane.b32.xlu1 %v1525_v5, %s3311_s24  ;;  %v618_v5 = vadd.f32 %v617_v9, %v616_v7 }
 0x332   : > { %1160 = vrot.lane.b32.xlu0 %v1153_v26, %s3308_s23  ;;  %v2041_v26 = vmul.f32 %v3804_v33, %v4027_v4 }
 0x333   : > { %v619_v14 = vrot.slane %v618_v5, 1 }
 0x335   : > { %v620_v33 = vadd.f32 %v619_v14, %v618_v5 }
 0x339   : > { %1765 = vrot.lane.b32.xlu2 %v1761_v0, %s3308_s23  ;;  %1725 = vrot.lane.b32.xlu1 %v1718_v17, %s3306_s25 }
 0x33a   : > { %1182 = vrot.lane.b32.xlu0 %v1175_v23, %s3309_s20 }
 0x341   : > { %1786 = vrot.lane.b32.xlu2 %v1779_v49, %s3309_s20  ;;  %1747 = vrot.lane.b32.xlu1 %v1740_v32, %s3307_s22  ;;  %v2063_v49 = vmul.f32 %v3696_v57, %v4029_v56  ;;  %v1482_v32 = vmul.f32 %v3790_v61, %v4029_v56 }
 0x342   : > { %1204 = vrot.lane.b32.xlu0 %v1197_v28, %s3310_s27  ;;  %v4203_v28 = vmul.f32 0.03125, %v620_v33 }
 0x344   : > { %5863 = vst [vmem:[#allocation140_spill] sm:$0xff] %v4203_v28  ;;  %v734_v61 = vmul.f32 %v3564_v1, %v4203_v28  ;;  %v757_v30 = vmul.f32 %v3574_v6, %v4203_v28  ;;  %v780_v9 = vmul.f32 %v3584_v11, %v4203_v28  ;;  %v1034_v14 = vmul.f32 %v3624_v41, %v4203_v28 }
 0x345   : > { %v1385_v3 = vmul.f32 %v5894_v29, %v4203_v28  ;;  %v1626_v10 = vmul.f32 %v5899_v8, %v4203_v28  ;;  %v5904_v8 = vld [vmem:[#allocation43_spill] sm:$0xff] }
 0x349   : > { %1808 = vrot.lane.b32.xlu2 %v1801_v62, %s3310_s27  ;;  %1767 = vrot.lane.b32.xlu1 %v1762_v27, %s3308_s23 }
 0x34a   : > { %1226 = vrot.lane.b32.xlu0 %v1219_v63, %s3311_s24 }
 0x34b   : > { %v4154_v16 = vpop.permute.xlu2 %820 }
 0x351   : > { %1830 = vrot.lane.b32.xlu2 %v1823_v20, %s3311_s24  ;;  %2028 = vrot.lane.b32.xlu1 %v2020_v43, %s3306_s25 }
 0x352   : > { %1423 = vrot.lane.b32.xlu0 %v1416_v25, %s3306_s25  ;;  %v2107_v25 = vmul.f32 %v3742_v53, %v4029_v56 }
 0x353   : > { %v4166_v24 = vpop.permute.xlu2 %842 }
 0x359   : > { %2026 = vrot.lane.b32.xlu2 %v2019_v35, %s3306_s25  ;;  %2050 = vrot.lane.b32.xlu1 %v2042_v51, %s3307_s22 }
 0x35a   : > { %1445 = vrot.lane.b32.xlu0 %v1438_v22, %s3307_s22  ;;  %v2129_v22 = vmul.f32 %v3762_v50, %v4029_v56 }
 0x35b   : > { %v4177_v37 = vpop.permute.xlu2 %864 }
 0x35c   : > { %5861 = vst [vmem:[#allocation138_spill] sm:$0xff] %v4177_v37 }
 0x361   : > { %2048 = vrot.lane.b32.xlu2 %v2041_v26, %s3307_s22  ;;  %2335 = vrot.lane.b32.xlu1 %v2327_v59, %s3306_s25 }
 0x362   : > { %1467 = vrot.lane.b32.xlu0 %v1460_v42, %s3308_s23  ;;  %v2326_v42 = vmul.f32 %v3852_v44, %v4027_v4  ;;  %v2348_v44 = vmul.f32 %v3906_v19, %v4027_v4  ;;  %v2370_v19 = vmul.f32 %v3840_v39, %v4029_v56 }
 0x363   : > { %v4188_v0 = vpop.permute.xlu2 %1118  ;;  %v4190_v17 = vpop.permute.xlu1 %882 }
 0x364   : > { %5862 = vst [vmem:[#allocation139_spill] sm:$0xff] %v4190_v17  ;;  %v4192_v23 = vpop.permute.xlu0 %818 }
 0x369   : > { %2070 = vrot.lane.b32.xlu2 %v2063_v49, %s3308_s23  ;;  %2357 = vrot.lane.b32.xlu1 %v2349_v21, %s3307_s22 }
 0x36a   : > { %1489 = vrot.lane.b32.xlu0 %v1482_v32, %s3309_s20  ;;  %v1056_v32 = vmul.f32 %v3656_v60, %v4203_v28 }
 0x36b   : > { %v4205_v27 = vpop.permute.xlu2 %1140  ;;  %v4207_v62 = vpop.permute.xlu1 %904 }
 0x36c   : > { %5864 = vst [vmem:[#allocation141_spill] sm:$0xff] %v4205_v27  ;;  %v4209_v63 = vpop.permute.xlu0 %840 }
 0x36d   : > { %5865 = vst [vmem:[#allocation142_spill] sm:$0xff] %v4207_v62 }
 0x371   : > { %2092 = vrot.lane.b32.xlu2 %v2085_v38, %s3309_s20  ;;  %740 = vrot.lane.b32.xlu1 %v734_v61, %s3309_s20 }
 0x372   : > { %1511 = vrot.lane.b32.xlu0 %v1504_v47, %s3310_s27 }
 0x373   : > { %v4220_v54 = vpop.permute.xlu2 %1162  ;;  %v4222_v20 = vpop.permute.xlu1 %926 }
 0x374   : > { %5866 = vst [vmem:[#allocation143_spill] sm:$0xff] %v4220_v54  ;;  %v4224_v43 = vpop.permute.xlu0 %862 }
 0x375   : > { %5867 = vst [vmem:[#allocation144_spill] sm:$0xff] %v4222_v20 }
 0x376   : > { %5868 = vst [vmem:[#allocation145_spill] sm:$0xff] %v4224_v43 }
 0x379   : > { %2114 = vrot.lane.b32.xlu2 %v2107_v25, %s3310_s27  ;;  %763 = vrot.lane.b32.xlu1 %v757_v30, %s3310_s27  ;;  %v5880_v25 = vld [vmem:[#allocation38_spill] sm:$0xff] }
 0x37a   : > { %1533 = vrot.lane.b32.xlu0 %v1526_v15, %s3311_s24  ;;  %v1078_v30 = vmul.f32 %v5880_v25, %v4203_v28 }
 0x37b   : > { %v4235_v7 = vpop.permute.xlu2 %1425  ;;  %v4237_v35 = vpop.permute.xlu1 %1180 }
 0x37c   : > { %5869 = vst [vmem:[#allocation146_spill] sm:$0xff] %v4235_v7  ;;  %v4239_v51 = vpop.permute.xlu0 %884 }
 0x37d   : > { %5870 = vst [vmem:[#allocation147_spill] sm:$0xff] %v4237_v35  ;;  %v5913_v35 = vld [vmem:[#allocation19_spill] sm:$0xff] }
 0x381   : > { %2136 = vrot.lane.b32.xlu2 %v2129_v22, %s3311_s24  ;;  %786 = vrot.lane.b32.xlu1 %v780_v9, %s3311_s24 }
 0x382   : > { %1727 = vrot.lane.b32.xlu0 %v1719_v12, %s3306_s25  ;;  %v4301_v12 = vstv %s3047_s26  ;;  %s2980_s26 = sld [smem:[#allocation7 + $0x1]] }
 0x383   : > { %v4250_v5 = vpop.permute.xlu2 %1447  ;;  %v4252_v26 = vpop.permute.xlu1 %1202 }
 0x384   : > { %5871 = vst [vmem:[#allocation148_spill] sm:$0xff] %v4250_v5  ;;  %v4254_v59 = vpop.permute.xlu0 %906 }
 0x385   : > { %5872 = vst [vmem:[#allocation149_spill] sm:$0xff] %v4252_v26 }
 0x386   : > { %5873 = vst [vmem:[#allocation150_spill] sm:$0xff] %v4254_v59 }
 0x389   : > { %2333 = vrot.lane.b32.xlu2 %v2326_v42, %s3306_s25  ;;  %1040 = vrot.lane.b32.xlu1 %v1034_v14, %s3309_s20  ;;  %v2392_v42 = vmul.f32 %v4301_v12, %v4029_v56  ;;  %v5884_v14 = vld [vmem:[#allocation50_spill] sm:$0xff] }
 0x38a   : > { %1749 = vrot.lane.b32.xlu0 %v1741_v55, %s3307_s22  ;;  %v1341_v48 = vmul.f32 %v5884_v14, %v4203_v28  ;;  %v1822_v55 = vmul.f32 %v3642_v52, %v4027_v4  ;;  %v2062_v52 = vmul.f32 %v3696_v57, %v4027_v4  ;;  %v2084_v57 = vmul.f32 %v3713_v13, %v4027_v4 }
 0x38b   : > { %v4265_v33 = vpop.permute.xlu2 %1469  ;;  %v4267_v49 = vpop.permute.xlu1 %1224  ;;  %v2106_v13 = vmul.f32 %v3742_v53, %v4027_v4  ;;  %v2128_v53 = vmul.f32 %v3762_v50, %v4027_v4  ;;  %v2369_v50 = vmul.f32 %v3840_v39, %v4027_v4  ;;  %v2391_v39 = vmul.f32 %v4301_v12, %v4027_v4 }
 0x38c   : > { %5874 = vst [vmem:[#allocation151_spill] sm:$0xff] %v4265_v33  ;;  %v4269_v21 = vpop.permute.xlu0 %928 }
 0x38d   : > { %5875 = vst [vmem:[#allocation152_spill] sm:$0xff] %v4267_v49  ;;  %v5908_v49 = vld [vmem:[#allocation18_spill] sm:$0xff] }
 0x38e   : > { %5876 = vst [vmem:[#allocation153_spill] sm:$0xff] %v4269_v21  ;;  %v970_v26 = vmul.f32 %v5908_v49, %v4081_v36 }
 0x391   : > { %2355 = vrot.lane.b32.xlu2 %v2348_v44, %s3307_s22  ;;  %1062 = vrot.lane.b32.xlu1 %v1056_v32, %s3310_s27 }
 0x392   : > { %1784 = vrot.lane.b32.xlu0 %v1778_v31, %s3309_s20 }
 0x393   : > { %v4280_v38 = vpop.permute.xlu2 %1765  ;;  %v4282_v61 = vpop.permute.xlu1 %1487 }
 0x394   : > { %5877 = vst [vmem:[#allocation154_spill] sm:$0xff] %v4280_v38  ;;  %v4284_v47 = vpop.permute.xlu0 %1116  ;;  %v5928_v38 = vld [vmem:[#allocation67_spill] sm:$0xff] }
 0x395   : > { %5878 = vst [vmem:[#allocation155_spill] sm:$0xff] %v4282_v61  ;;  %v1644_v61 = vmul.f32 %v5904_v8, %v4081_v36 }
 0x396   : > { %5879 = vst [vmem:[#allocation156_spill] sm:$0xff] %v4284_v47 }
 0x399   : > { %2377 = vrot.lane.b32.xlu2 %v2370_v19, %s3308_s23  ;;  %1084 = vrot.lane.b32.xlu1 %v1078_v30, %s3311_s24  ;;  %v5888_v19 = vld [vmem:[#allocation82_spill] sm:$0xff] }
 0x39a   : > { %1806 = vrot.lane.b32.xlu0 %v1800_v45, %s3310_s27  ;;  %v2634_v30 = vmul.f32 %v5888_v19, %v4029_v56  ;;  %v5889_v45 = vld [vmem:[#allocation54_spill] sm:$0xff] }
 0x39b   : > { %v4295_v15 = vpop.permute.xlu2 %1786  ;;  %v4297_v22 = vpop.permute.xlu1 %1509  ;;  %v1363_v18 = vmul.f32 %v5889_v45, %v4203_v28 }
 0x39c   : > { %5881 = vst [vmem:[#allocation38_spill] sm:$0xff] %v4295_v15  ;;  %v4299_v9 = vpop.permute.xlu0 %1138 }
 0x39d   : > { %5882 = vst [vmem:[#allocation157_spill] sm:$0xff] %v4297_v22 }
 0x39e   : > { %5883 = vst [vmem:[#allocation158_spill] sm:$0xff] %v4299_v9 }
 0x3a1   : > { %2399 = vrot.lane.b32.xlu2 %v2392_v42, %s3309_s20  ;;  %1347 = vrot.lane.b32.xlu1 %v1341_v48, %s3309_s20 }
 0x3a2   : > { %1828 = vrot.lane.b32.xlu0 %v1822_v55, %s3311_s24 }
 0x3a3   : > { %v4312_v44 = vpop.permute.xlu2 %1808  ;;  %v4314_v32 = vpop.permute.xlu1 %1531 }
 0x3a4   : > { %5885 = vst [vmem:[#allocation50_spill] sm:$0xff] %v4312_v44  ;;  %v4316_v31 = vpop.permute.xlu0 %1160  ;;  %v2633_v44 = vmul.f32 %v5888_v19, %v4027_v4  ;;  %v666_v19 = vmul.f32 %v5893_v34, %v4203_v28  ;;  %v689_v34 = vmul.f32 %v5898_v58, %v4203_v28 }
 0x3a5   : > { %5886 = vst [vmem:[#allocation159_spill] sm:$0xff] %v4314_v32  ;;  %v5903_v32 = vld [vmem:[#allocation17_spill] sm:$0xff] }
 0x3a6   : > { %5887 = vst [vmem:[#allocation160_spill] sm:$0xff] %v4316_v31  ;;  %v713_v22 = vmul.f32 %v5903_v32, %v4081_v36  ;;  %v5914_v31 = vld [vmem:[#allocation49_spill] sm:$0xff]  ;;  %v712_v58 = vmul.f32 %v5903_v32, %v4203_v28  ;;  %v735_v32 = vmul.f32 %v3564_v1, %v4081_v36  ;;  %v758_v1 = vmul.f32 %v3574_v6, %v4081_v36 }
 0x3a7   : > { %v1688_v9 = vmul.f32 %v5914_v31, %v4081_v36  ;;  %v781_v6 = vmul.f32 %v3584_v11, %v4081_v36  ;;  %v969_v11 = vmul.f32 %v5908_v49, %v4203_v28  ;;  %v991_v49 = vmul.f32 %v5913_v35, %v4203_v28 }
 0x3a9   : > { %2642 = vrot.lane.b32.xlu2 %v2634_v30, %s3306_s25  ;;  %1369 = vrot.lane.b32.xlu1 %v1363_v18, %s3310_s27 }
 0x3aa   : > { %2068 = vrot.lane.b32.xlu0 %v2062_v52, %s3308_s23 }
 0x3ab   : > { %v4327_v42 = vpop.permute.xlu2 %1830  ;;  %v4329_v48 = vpop.permute.xlu1 %1725 }
 0x3ac   : > { %5890 = vst [vmem:[#allocation82_spill] sm:$0xff] %v4327_v42  ;;  %v4331_v55 = vpop.permute.xlu0 %1182  ;;  %v5919_v42 = vld [vmem:[#allocation53_spill] sm:$0xff] }
 0x3ad   : > { %5891 = vst [vmem:[#allocation54_spill] sm:$0xff] %v4329_v48 }
 0x3ae   : > { %5892 = vst [vmem:[#allocation161_spill] sm:$0xff] %v4331_v55  ;;  %v5971_v55 = vld [vmem:[#allocation59_spill] sm:$0xff] }
 0x3af   : > { %v2230_v59 = vmul.f32 %v5971_v55, %v4081_v36 }
 0x3b1   : > { %675 = vrot.lane.b32.xlu2 %v667_v46, %s3306_s25  ;;  %1391 = vrot.lane.b32.xlu1 %v1385_v3, %s3311_s24 }
 0x3b2   : > { %2090 = vrot.lane.b32.xlu0 %v2084_v57, %s3309_s20 }
 0x3b3   : > { %v4342_v18 = vpop.permute.xlu2 %2026  ;;  %v4344_v30 = vpop.permute.xlu1 %1747 }
 0x3b4   : > { %5895 = vst [vmem:[#allocation15_spill] sm:$0xff] %v4342_v18  ;;  %v4346_v52 = vpop.permute.xlu0 %1204 }
 0x3b5   : > { %5896 = vst [vmem:[#allocation58_spill] sm:$0xff] %v4344_v30  ;;  %v5932_v30 = vld [vmem:[#allocation71_spill] sm:$0xff] }
 0x3b6   : > { %5897 = vst [vmem:[#allocation162_spill] sm:$0xff] %v4346_v52  ;;  %v4655_v52 = vstv %s3063_s21  ;;  %s3008_s21 = sld [smem:[#allocation7 + $0x3]] }
 0x3b7   : > { %5968 = vst [vmem:[#allocation186_spill] sm:$0xff] %v4655_v52 }
 0x3b9   : > { %698 = vrot.lane.b32.xlu2 %v690_v2, %s3307_s22  ;;  %1630 = vrot.lane.b32.xlu1 %v1626_v10, %s3308_s23 }
 0x3ba   : > { %2112 = vrot.lane.b32.xlu0 %v2106_v13, %s3310_s27 }
 0x3bb   : > { %v4358_v3 = vpop.permute.xlu2 %2048  ;;  %v4360_v46 = vpop.permute.xlu1 %1767 }
 0x3bc   : > { %5900 = vst [vmem:[#allocation16_spill] sm:$0xff] %v4358_v3  ;;  %v4362_v57 = vpop.permute.xlu0 %1226  ;;  %v5909_v3 = vld [vmem:[#allocation46_spill] sm:$0xff] }
 0x3bd   : > { %5901 = vst [vmem:[#allocation163_spill] sm:$0xff] %v4360_v46  ;;  %v1666_v18 = vmul.f32 %v5909_v3, %v4081_v36  ;;  %v2187_v46 = vmul.f32 %v5928_v38, %v4081_v36 }
 0x3be   : > { %5902 = vst [vmem:[#allocation164_spill] sm:$0xff] %v4362_v57 }
 0x3c1   : > { %721 = vrot.lane.b32.xlu2 %v713_v22, %s3308_s23  ;;  %1651 = vrot.lane.b32.xlu1 %v1644_v61, %s3309_s20 }
 0x3c2   : > { %2134 = vrot.lane.b32.xlu0 %v2128_v53, %s3311_s24 }
 0x3c3   : > { %v4373_v10 = vpop.permute.xlu2 %2070  ;;  %v4375_v2 = vpop.permute.xlu1 %2028 }
 0x3c4   : > { %5905 = vst [vmem:[#allocation17_spill] sm:$0xff] %v4373_v10  ;;  %v4377_v13 = vpop.permute.xlu0 %1423 }
 0x3c5   : > { %5906 = vst [vmem:[#allocation43_spill] sm:$0xff] %v4375_v2  ;;  %v5936_v2 = vld [vmem:[#allocation77_spill] sm:$0xff] }
 0x3c6   : > { %5907 = vst [vmem:[#allocation165_spill] sm:$0xff] %v4377_v13  ;;  %v992_v13 = vmul.f32 %v5913_v35, %v4081_v36 }
 0x3c9   : > { %978 = vrot.lane.b32.xlu2 %v970_v26, %s3306_s25  ;;  %1673 = vrot.lane.b32.xlu1 %v1666_v18, %s3310_s27 }
 0x3ca   : > { %2375 = vrot.lane.b32.xlu0 %v2369_v50, %s3308_s23 }
 0x3cb   : > { %v4388_v61 = vpop.permute.xlu2 %2092  ;;  %v4390_v22 = vpop.permute.xlu1 %2050 }
 0x3cc   : > { %5910 = vst [vmem:[#allocation18_spill] sm:$0xff] %v4388_v61  ;;  %v4392_v53 = vpop.permute.xlu0 %1445  ;;  %v1880_v61 = vmul.f32 %v5919_v42, %v4081_v36 }
 0x3cd   : > { %5911 = vst [vmem:[#allocation46_spill] sm:$0xff] %v4390_v22  ;;  %v2209_v22 = vmul.f32 %v5932_v30, %v4081_v36 }
 0x3ce   : > { %5912 = vst [vmem:[#allocation166_spill] sm:$0xff] %v4392_v53  ;;  %v5918_v53 = vld [vmem:[#allocation20_spill] sm:$0xff] }
 0x3cf   : > { %v1014_v47 = vmul.f32 %v5918_v53, %v4081_v36 }
 0x3d1   : > { %1000 = vrot.lane.b32.xlu2 %v992_v13, %s3307_s22  ;;  %1695 = vrot.lane.b32.xlu1 %v1688_v9, %s3311_s24 }
 0x3d2   : > { %2397 = vrot.lane.b32.xlu0 %v2391_v39, %s3309_s20 }
 0x3d3   : > { %v4403_v26 = vpop.permute.xlu2 %2114  ;;  %v4405_v18 = vpop.permute.xlu1 %2335 }
 0x3d4   : > { %5915 = vst [vmem:[#allocation19_spill] sm:$0xff] %v4403_v26  ;;  %v4407_v50 = vpop.permute.xlu0 %1467 }
 0x3d5   : > { %5916 = vst [vmem:[#allocation49_spill] sm:$0xff] %v4405_v18  ;;  %v5924_v18 = vld [vmem:[#allocation57_spill] sm:$0xff] }
 0x3d6   : > { %5917 = vst [vmem:[#allocation167_spill] sm:$0xff] %v4407_v50  ;;  %v5923_v50 = vld [vmem:[#allocation21_spill] sm:$0xff]  ;;  %v1902_v15 = vmul.f32 %v5924_v18, %v4081_v36 }
 0x3d7   : > { %v1277_v26 = vmul.f32 %v5923_v50, %v4081_v36 }
 0x3d9   : > { %1022 = vrot.lane.b32.xlu2 %v1014_v47, %s3308_s23  ;;  %1888 = vrot.lane.b32.xlu1 %v1880_v61, %s3306_s25 }
 0x3da   : > { %2640 = vrot.lane.b32.xlu0 %v2633_v44, %s3306_s25 }
 0x3db   : > { %v4418_v9 = vpop.permute.xlu2 %2136  ;;  %v4420_v13 = vpop.permute.xlu1 %2357 }
 0x3dc   : > { %5920 = vst [vmem:[#allocation20_spill] sm:$0xff] %v4418_v9  ;;  %v4422_v39 = vpop.permute.xlu0 %1489  ;;  %v5927_v9 = vld [vmem:[#allocation22_spill] sm:$0xff] }
 0x3dd   : > { %5921 = vst [vmem:[#allocation53_spill] sm:$0xff] %v4420_v13  ;;  %v1299_v13 = vmul.f32 %v5927_v9, %v4081_v36 }
 0x3de   : > { %5922 = vst [vmem:[#allocation168_spill] sm:$0xff] %v4422_v39 }
 0x3e1   : > { %1285 = vrot.lane.b32.xlu2 %v1277_v26, %s3306_s25  ;;  %1910 = vrot.lane.b32.xlu1 %v1902_v15, %s3307_s22 }
 0x3e2   : > { %673 = vrot.lane.b32.xlu0 %v666_v19, %s3306_s25 }
 0x3e3   : > { %v4433_v47 = vpop.permute.xlu2 %2333  ;;  %v4435_v44 = vpop.permute.xlu1 %740 }
 0x3e4   : > { %5925 = vst [vmem:[#allocation21_spill] sm:$0xff] %v4433_v47  ;;  %v4437_v61 = vpop.permute.xlu0 %1511  ;;  %v5931_v47 = vld [vmem:[#allocation23_spill] sm:$0xff] }
 0x3e5   : > { %5926 = vst [vmem:[#allocation57_spill] sm:$0xff] %v4437_v61  ;;  %v1321_v10 = vmul.f32 %v5931_v47, %v4081_v36  ;;  %v5940_v61 = vld [vmem:[#allocation81_spill] sm:$0xff] }
 0x3e6   : > { %v2558_v39 = vmul.f32 %v5940_v61, %v4203_v28 }
 0x3e9   : > { %1307 = vrot.lane.b32.xlu2 %v1299_v13, %s3307_s22  ;;  %2195 = vrot.lane.b32.xlu1 %v2187_v46, %s3306_s25 }
 0x3ea   : > { %696 = vrot.lane.b32.xlu0 %v689_v34, %s3307_s22 }
 0x3eb   : > { %v4448_v15 = vpop.permute.xlu2 %2355  ;;  %v4450_v26 = vpop.permute.xlu1 %763 }
 0x3ec   : > { %5929 = vst [vmem:[#allocation22_spill] sm:$0xff] %v4448_v15  ;;  %v4452_v19 = vpop.permute.xlu0 %1533  ;;  %v5935_v15 = vld [vmem:[#allocation27_spill] sm:$0xff] }
 0x3ed   : > { %5930 = vst [vmem:[#allocation67_spill] sm:$0xff] %v4452_v19  ;;  %v1584_v48 = vmul.f32 %v5935_v15, %v4081_v36  ;;  %v2536_v19 = vmul.f32 %v5936_v2, %v4203_v28  ;;  %v4620_v2 = vstv %s3022_s6  ;;  %s2994_s6 = sld [smem:[#allocation7 + $0x2]] }
 0x3f1   : > { %1329 = vrot.lane.b32.xlu2 %v1321_v10, %s3308_s23  ;;  %2217 = vrot.lane.b32.xlu1 %v2209_v22, %s3307_s22 }
 0x3f2   : > { %719 = vrot.lane.b32.xlu0 %v712_v58, %s3308_s23 }
 0x3f3   : > { %v4463_v46 = vpop.permute.xlu2 %2377  ;;  %v4465_v13 = vpop.permute.xlu1 %786 }
 0x3f4   : > { %5933 = vst [vmem:[#allocation23_spill] sm:$0xff] %v4463_v46  ;;  %v4467_v34 = vpop.permute.xlu0 %1727  ;;  %v5939_v46 = vld [vmem:[#allocation29_spill] sm:$0xff] }
 0x3f5   : > { %5934 = vst [vmem:[#allocation71_spill] sm:$0xff] %v4467_v34  ;;  %v1606_v34 = vmul.f32 %v5939_v46, %v4081_v36 }
 0x3f9   : > { %1592 = vrot.lane.b32.xlu2 %v1584_v48, %s3306_s25  ;;  %2542 = vrot.lane.b32.xlu1 %v2536_v19, %s3308_s23 }
 0x3fa   : > { %742 = vrot.lane.b32.xlu0 %v735_v32, %s3309_s20 }
 0x3fb   : > { %v4478_v10 = vpop.permute.xlu2 %2399  ;;  %v4480_v22 = vpop.permute.xlu1 %1040 }
 0x3fc   : > { %5937 = vst [vmem:[#allocation27_spill] sm:$0xff] %v4478_v10  ;;  %v4482_v58 = vpop.permute.xlu0 %1749  ;;  %v1643_v10 = vmul.f32 %v5904_v8, %v4203_v28  ;;  %v1665_v8 = vmul.f32 %v5909_v3, %v4203_v28  ;;  %v2393_v3 = vmul.f32 0.0, %v4301_v12  ;;  %v1879_v12 = vmul.f32 %v5919_v42, %v4203_v28 }
 0x3fd   : > { %5938 = vst [vmem:[#allocation169_spill] sm:$0xff] %v4482_v58  ;;  %v5943_v58 = vld [vmem:[#allocation84_spill] sm:$0xff]  ;;  %v1035_v42 = vmul.f32 %v3624_v41, %v4081_v36  ;;  %v1057_v41 = vmul.f32 %v3656_v60, %v4081_v36  ;;  %v1079_v60 = vmul.f32 %v5880_v25, %v4081_v36  ;;  %v1276_v25 = vmul.f32 %v5923_v50, %v4203_v28 }
 0x3fe   : > { %v2580_v33 = vmul.f32 %v5943_v58, %v4203_v28  ;;  %v1872_v50 = vmul.f32 %v4620_v2, %v4081_v36 }
 0x401   : > { %1614 = vrot.lane.b32.xlu2 %v1606_v34, %s3307_s22  ;;  %2564 = vrot.lane.b32.xlu1 %v2558_v39, %s3309_s20 }
 0x402   : > { %765 = vrot.lane.b32.xlu0 %v758_v1, %s3310_s27 }
 0x403   : > { %v4493_v48 = vpop.permute.xlu2 %2642  ;;  %v4495_v19 = vpop.permute.xlu1 %1062 }
 0x404   : > { %5941 = vst [vmem:[#allocation29_spill] sm:$0xff] %v4493_v48  ;;  %v4497_v32 = vpop.permute.xlu0 %1784  ;;  %v5945_v48 = vld [vmem:[#allocation89_spill] sm:$0xff] }
 0x405   : > { %5942 = vst [vmem:[#allocation170_spill] sm:$0xff] %v4497_v32  ;;  %v2602_v32 = vmul.f32 %v5945_v48, %v4203_v28 }
 0x409   : > { %1649 = vrot.lane.b32.xlu2 %v1643_v10, %s3309_s20  ;;  %2586 = vrot.lane.b32.xlu1 %v2580_v33, %s3310_s27 }
 0x40a   : > { %788 = vrot.lane.b32.xlu0 %v781_v6, %s3311_s24 }
 0x40b   : > { %v4508_v39 = vpop.permute.xlu2 %675  ;;  %v4510_v34 = vpop.permute.xlu1 %1084 }
 0x40c   : > { %v4512_v1 = vpop.permute.xlu0 %1806 }
 0x40d   : > { %5944 = vst [vmem:[#allocation171_spill] sm:$0xff] %v4512_v1  ;;  %v1687_v1 = vmul.f32 %v5914_v31, %v4203_v28  ;;  %v1013_v31 = vmul.f32 %v5918_v53, %v4203_v28 }
 0x411   : > { %1671 = vrot.lane.b32.xlu2 %v1665_v8, %s3310_s27  ;;  %2608 = vrot.lane.b32.xlu1 %v2602_v32, %s3311_s24 }
 0x412   : > { %976 = vrot.lane.b32.xlu0 %v969_v11, %s3306_s25 }
 0x413   : > { %v4523_v33 = vpop.permute.xlu2 %698  ;;  %v4525_v10 = vpop.permute.xlu1 %1347 }
 0x414   : > { %5946 = vst [vmem:[#allocation172_spill] sm:$0xff] %v4525_v10  ;;  %v4527_v6 = vpop.permute.xlu0 %1828 }
 0x415   : > { %5947 = vst [vmem:[#allocation173_spill] sm:$0xff] %v4527_v6 }
 0x419   : > { %1693 = vrot.lane.b32.xlu2 %v1687_v1, %s3311_s24  ;;  %2401 = vrot.lane.b32.xlu1 %v2393_v3, %s3309_s20 }
 0x41a   : > { %998 = vrot.lane.b32.xlu0 %v991_v49, %s3307_s22  ;;  %v1901_v49 = vmul.f32 %v5924_v18, %v4203_v28  ;;  %v5954_v18 = vld [vmem:[#allocation34_spill] sm:$0xff] }
 0x41b   : > { %v4537_v32 = vpop.permute.xlu2 %721  ;;  %v4539_v8 = vpop.permute.xlu1 %1369  ;;  %v1923_v6 = vmul.f32 %v5954_v18, %v4081_v36 }
 0x41c   : > { %5948 = vst [vmem:[#allocation174_spill] sm:$0xff] %v4539_v8  ;;  %v4541_v11 = vpop.permute.xlu0 %2068  ;;  %v4643_v8 = vstv %s3062_s17  ;;  %s3001_s17 = sld [smem:[#allocation7 + $0x33]] }
 0x41d   : > { %5949 = vst [vmem:[#allocation175_spill] sm:$0xff] %v4541_v11  ;;  %v4567_v11 = vstv %s3060_s11  ;;  %v2722_v10 = vmul.f32 0.0, %v4643_v8  ;;  %s3313_s11 = smov 51  }
 0x41e   : > { %5966 = vst [vmem:[#allocation184_spill] sm:$0xff] %v4643_v8 }
 0x421   : > { %1886 = vrot.lane.b32.xlu2 %v1879_v12, %s3306_s25 }
 0x422   : > { %1020 = vrot.lane.b32.xlu0 %v1013_v31, %s3308_s23 }
 0x423   : > { %v4549_v35 = vpop.permute.xlu2 %978  ;;  %v4551_v1 = vpop.permute.xlu1 %1391 }
 0x424   : > { %5950 = vst [vmem:[#allocation176_spill] sm:$0xff] %v4551_v1  ;;  %v4553_v3 = vpop.permute.xlu0 %2090  ;;  %v5963_v1 = vld [vmem:[#allocation41_spill] sm:$0xff] }
 0x425   : > { %5951 = vst [vmem:[#allocation177_spill] sm:$0xff] %v4553_v3  ;;  %v2678_v3 = vmul.f32 0.0, %v4567_v11 }
 0x427   : > { %2686 = vrot.lane.b32.xlu1 %v2678_v3, %s3308_s23  ;;  %v5957_v3 = vld [vmem:[#allocation37_spill] sm:$0xff] }
 0x428   : > { %v1945_v58 = vmul.f32 %v5957_v3, %v4081_v36 }
 0x429   : > { %1908 = vrot.lane.b32.xlu2 %v1901_v49, %s3307_s22 }
 0x42a   : > { %1042 = vrot.lane.b32.xlu0 %v1035_v42, %s3309_s20 }
 0x42b   : > { %v4561_v53 = vpop.permute.xlu2 %1000  ;;  %v4563_v12 = vpop.permute.xlu1 %1630 }
 0x42c   : > { %5952 = vst [vmem:[#allocation178_spill] sm:$0xff] %v4563_v12  ;;  %v4565_v31 = vpop.permute.xlu0 %2112 }
 0x42d   : > { %5953 = vst [vmem:[#allocation179_spill] sm:$0xff] %v4565_v31  ;;  %v4581_v31 = vstv %s3048_s13  ;;  %s3029_s13 = sld [smem:[#allocation7 + $0x35]] }
 0x42e   : > { %v2415_v48 = vmul.f32 0.0, %v4581_v31 }
 0x430   : > { %2423 = vrot.lane.b32.xlu1 %v2415_v48, %s3310_s27  ;;  %v5960_v48 = vld [vmem:[#allocation39_spill] sm:$0xff] }
 0x431   : > { %1930 = vrot.lane.b32.xlu2 %v1923_v6, %s3308_s23  ;;  %v1967_v7 = vmul.f32 %v5960_v48, %v4081_v36 }
 0x432   : > { %1064 = vrot.lane.b32.xlu0 %v1057_v41, %s3310_s27 }
 0x433   : > { %v4577_v49 = vpop.permute.xlu2 %1022  ;;  %v4579_v42 = vpop.permute.xlu1 %1651 }
 0x434   : > { %5955 = vst [vmem:[#allocation34_spill] sm:$0xff] %v4579_v42  ;;  %v4583_v12 = vpop.permute.xlu0 %2134  ;;  %v4597_v42 = vstv %s3061_s28  ;;  %s3036_s28 = sld [smem:[#allocation7 + $0x5]] }
 0x435   : > { %5956 = vst [vmem:[#allocation180_spill] sm:$0xff] %v4583_v12  ;;  %v2700_v5 = vmul.f32 0.0, %v4597_v42 }
 0x438   : > { %2708 = vrot.lane.b32.xlu1 %v2700_v5, %s3309_s20  ;;  %v1989_v5 = vmul.f32 %v5963_v1, %v4081_v36 }
 0x439   : > { %1952 = vrot.lane.b32.xlu2 %v1945_v58, %s3309_s20 }
 0x43a   : > { %1086 = vrot.lane.b32.xlu0 %v1079_v60, %s3311_s24 }
 0x43b   : > { %v4593_v6 = vpop.permute.xlu2 %1285  ;;  %v4595_v41 = vpop.permute.xlu1 %1673 }
 0x43c   : > { %5958 = vst [vmem:[#allocation37_spill] sm:$0xff] %v4595_v41  ;;  %v4599_v12 = vpop.permute.xlu0 %2375 }
 0x43d   : > { %5959 = vst [vmem:[#allocation181_spill] sm:$0xff] %v4599_v12  ;;  %v4613_v12 = vstv %s3049_s9  ;;  %s2987_s9 = sld [smem:[#allocation7 + $0x32]] }
 0x43e   : > { %v2437_v61 = vmul.f32 0.0, %v4613_v12 }
 0x440   : > { %2445 = vrot.lane.b32.xlu1 %v2437_v61, %s3311_s24 }
 0x441   : > { %1974 = vrot.lane.b32.xlu2 %v1967_v7, %s3310_s27  ;;  %v1298_v7 = vmul.f32 %v5927_v9, %v4203_v28  ;;  %v2186_v9 = vmul.f32 %v5928_v38, %v4203_v28 }
 0x442   : > { %1283 = vrot.lane.b32.xlu0 %v1276_v25, %s3306_s25 }
 0x443   : > { %v4609_v58 = vpop.permute.xlu2 %1307  ;;  %v4611_v60 = vpop.permute.xlu1 %1695 }
 0x444   : > { %5961 = vst [vmem:[#allocation39_spill] sm:$0xff] %v4611_v60  ;;  %v4615_v41 = vpop.permute.xlu0 %2397 }
 0x445   : > { %5962 = vst [vmem:[#allocation182_spill] sm:$0xff] %v4615_v41 }
 0x448   : > { %2730 = vrot.lane.b32.xlu1 %v2722_v10, %s3310_s27 }
 0x449   : > { %1996 = vrot.lane.b32.xlu2 %v1989_v5, %s3311_s24  ;;  %v1320_v5 = vmul.f32 %v5931_v47, %v4203_v28 }
 0x44a   : > { %1305 = vrot.lane.b32.xlu0 %v1298_v7, %s3307_s22  ;;  %v656_v7 = vstv %s655_s15  ;;  %s3043_s15 = sld [smem:[#allocation7 + $0x36]] }
 0x44b   : > { %v4629_v25 = vpop.permute.xlu2 %1329  ;;  %v4631_v41 = vpop.permute.xlu1 %1888  ;;  %v658_v57 = vmul.f32 %v656_v7, %v4203_v28  ;;  %v659_v54 = vmul.f32 %v656_v7, %v4081_v36 }
 0x44c   : > { %5964 = vst [vmem:[#allocation41_spill] sm:$0xff] %v4629_v25  ;;  %v4633_v60 = vpop.permute.xlu0 %2640  ;;  %v4636_v61 = vadd.f32 %v4631_v41, %v1872_v50  ;;  %v5970_v25 = vld [vmem:[#allocation24_spill] sm:$0xff] }
 0x44d   : > { %5965 = vst [vmem:[#allocation183_spill] sm:$0xff] %v4633_v60 }
 0x451   : > { %2193 = vrot.lane.b32.xlu2 %v2186_v9, %s3306_s25  ;;  %v2208_v9 = vmul.f32 %v5932_v30, %v4203_v28 }
 0x452   : > { %1327 = vrot.lane.b32.xlu0 %v1320_v5, %s3308_s23  ;;  %v1342_v5 = vmul.f32 %v5884_v14, %v4081_v36 }
 0x453   : > { %v4647_v60 = vpop.permute.xlu2 %1592 }
 0x454   : > { %5967 = vst [vmem:[#allocation185_spill] sm:$0xff] %v4647_v60  ;;  %v674_v50 = vpop.permute.xlu0 %673  ;;  %v2744_v60 = vmul.f32 0.0, %v4655_v52 }
 0x455   : > { %v679_v38 = vsel %vm677_vm5, %v674_v50, %v4508_v39  ;;  %v678_v14 = vsel %vm677_vm5, %v5970_v25, %v674_v50  ;;  %v5973_v50 = vld [vmem:[#allocation26_spill] sm:$0xff] }
 0x456   : > { %v684_v47 = vadd.f32 %v679_v38, %v658_v57  ;;  %2752 = vrot.lane.b32.xlu1 %v2744_v60, %s3311_s24  ;;  %v657_v57 = vmul.f32 0.0, %v656_v7 }
 0x458   : > { %v683_v60 = vadd.f32 %v678_v14, %v657_v57  ;;  %v685_v14 = vadd.f32 %v4508_v39, %v659_v54 }
 0x459   : > { %2215 = vrot.lane.b32.xlu2 %v2208_v9, %s3307_s22  ;;  %v1364_v9 = vmul.f32 %v5889_v45, %v4081_v36 }
 0x45a   : > { %1349 = vrot.lane.b32.xlu0 %v1342_v5, %s3309_s20  ;;  %v5972_v5 = vld [vmem:[#allocation25_spill] sm:$0xff] }
 0x45b   : > { %v4662_v21 = vpop.permute.xlu2 %1614 }
 0x45c   : > { %5969 = vst [vmem:[#allocation187_spill] sm:$0xff] %v4662_v21  ;;  %v697_v10 = vpop.permute.xlu0 %696 }
 0x45d   : > { %v702_v30 = vsel %vm700_vm6, %v697_v10, %v4523_v33  ;;  %v701_v21 = vsel %vm700_vm6, %v5972_v5, %v697_v10 }
 0x45e   : > { %v707_v38 = vadd.f32 %v702_v30, %v684_v47  ;;  %v706_v47 = vadd.f32 %v701_v21, %v683_v60  ;;  %v1386_v21 = vmul.f32 %v5894_v29, %v4081_v36  ;;  %v801_v60 = vstv %s2973_s16  ;;  %s3015_s16 = sld [smem:[#allocation7 + $0x34]] }
 0x461   : > { %2237 = vrot.lane.b32.xlu2 %v2230_v59, %s3308_s23  ;;  %v5974_v59 = vld [vmem:[#allocation61_spill] sm:$0xff] }
 0x462   : > { %1371 = vrot.lane.b32.xlu0 %v1364_v9, %s3310_s27  ;;  %v2252_v57 = vmul.f32 %v5974_v59, %v4081_v36 }
 0x463   : > { %v4677_v52 = vpop.permute.xlu2 %1649 }
 0x464   : > { %v720_v25 = vpop.permute.xlu0 %719 }
 0x465   : > { %v724_v30 = vsel %vm723_vm7, %v5973_v50, %v720_v25  ;;  %v725_v45 = vsel %vm723_vm7, %v720_v25, %v4537_v32  ;;  %v708_v50 = vadd.f32 %v4523_v33, %v685_v14  ;;  %v802_v25 = vmul.f32 0.0, %v801_v60  ;;  %v5977_v14 = vld [vmem:[#allocation28_spill] sm:$0xff] }
 0x466   : > { %v729_v10 = vadd.f32 %v724_v30, %v706_v47  ;;  %v730_v5 = vadd.f32 %v725_v45, %v707_v38  ;;  %v5976_v30 = vld [vmem:[#allocation44_spill] sm:$0xff] }
 0x467   : > { %v731_v54 = vadd.f32 %v4537_v32, %v708_v50  ;;  %v1583_v50 = vmul.f32 %v5935_v15, %v4203_v28 }
 0x468   : > { %v752_v9 = vadd.f32 %v4435_v44, %v729_v10 }
 0x469   : > { %2259 = vrot.lane.b32.xlu2 %v2252_v57, %s3309_s20 }
 0x46a   : > { %v775_v7 = vadd.f32 %v4450_v26, %v752_v9  ;;  %1393 = vrot.lane.b32.xlu0 %v1386_v21, %s3311_s24  ;;  %v822_v9 = vsel %vm677_vm5, %v5977_v14, %v4192_v23  ;;  %v5978_v21 = vld [vmem:[#allocation64_spill] sm:$0xff] }
 0x46b   : > { %v4694_v38 = vpop.permute.xlu2 %1671 }
 0x46c   : > { %5975 = vst [vmem:[#allocation24_spill] sm:$0xff] %v4694_v38  ;;  %v797_v39 = vadd.f32 %v4465_v13, %v775_v7  ;;  %v743_v47 = vpop.permute.xlu0 %742  ;;  %v2274_v38 = vmul.f32 %v5978_v21, %v4081_v36  ;;  %v5979_v7 = vld [vmem:[#allocation30_spill] sm:$0xff] }
 0x46d   : > { %v747_v29 = vsel %vm746_vm8, %v4435_v44, %v743_v47  ;;  %v748_v45 = vsel %vm746_vm8, %v743_v47, %v5976_v30  ;;  %v844_v44 = vsel %vm700_vm6, %v5979_v7, %v4209_v63  ;;  %v5982_v30 = vld [vmem:[#allocation48_spill] sm:$0xff] }
 0x46e   : > { %v805_v33 = vadd.f32 %v802_v25, %v797_v39  ;;  %v753_v10 = vadd.f32 %v747_v29, %v730_v5  ;;  %v754_v57 = vadd.f32 %v748_v45, %v731_v54  ;;  %v5980_v5 = vld [vmem:[#allocation31_spill] sm:$0xff] }
 0x46f   : > { %v866_v54 = vsel %vm723_vm7, %v5980_v5, %v4224_v43 }
 0x470   : > { %v827_v32 = vadd.f32 %v822_v9, %v805_v33  ;;  %v5983_v9 = vld [vmem:[#allocation68_spill] sm:$0xff] }
 0x471   : > { %2281 = vrot.lane.b32.xlu2 %v2274_v38, %s3310_s27 }
 0x472   : > { %v849_v25 = vadd.f32 %v844_v44, %v827_v32  ;;  %1590 = vrot.lane.b32.xlu0 %v1583_v50, %s3306_s25  ;;  %v2296_v32 = vmul.f32 %v5983_v9, %v4081_v36  ;;  %v1605_v50 = vmul.f32 %v5939_v46, %v4203_v28 }
 0x473   : > { %v4717_v39 = vpop.permute.xlu2 %1693 }
 0x474   : > { %5981 = vst [vmem:[#allocation59_spill] sm:$0xff] %v4717_v39  ;;  %v766_v47 = vpop.permute.xlu0 %765  ;;  %v871_v29 = vadd.f32 %v866_v54, %v849_v25  ;;  %v5984_v54 = vld [vmem:[#allocation52_spill] sm:$0xff] }
 0x475   : > { %v770_v15 = vsel %vm769_vm9, %v4450_v26, %v766_v47  ;;  %v771_v45 = vsel %vm769_vm9, %v766_v47, %v5982_v30 }
 0x476   : > { %v776_v33 = vadd.f32 %v770_v15, %v753_v10  ;;  %v777_v38 = vadd.f32 %v771_v45, %v754_v57  ;;  %v893_v14 = vadd.f32 %v4190_v17, %v871_v29  ;;  %v1871_v10 = vmul.f32 %v4620_v2, %v4203_v28  ;;  %v6005_v17 = vld [vmem:[#allocation56_spill] sm:$0xff] }
 0x477   : > { %v803_v29 = vmul.f32 %v801_v60, %v4027_v4  ;;  %v804_v15 = vmul.f32 %v801_v60, %v4029_v56  ;;  %v1911_v60 = vpop.permute.xlu1 %1910 }
 0x478   : > { %v915_v7 = vadd.f32 %v4207_v62, %v893_v14  ;;  %v1870_v14 = vmul.f32 0.0, %v4620_v2  ;;  %v5987_v2 = vld [vmem:[#allocation111_spill] sm:$0xff] }
 0x479   : > { %2303 = vrot.lane.b32.xlu2 %v2296_v32, %s3311_s24 }
 0x47a   : > { %1612 = vrot.lane.b32.xlu0 %v1605_v50, %s3307_s22  ;;  %v937_v26 = vadd.f32 %v4222_v20, %v915_v7  ;;  %v5986_v50 = vld [vmem:[#allocation108_spill] sm:$0xff] }
 0x47b   : > { %v1887_v57 = vpop.permute.xlu2 %1886 }
 0x47c   : > { %v1891_v44 = vsel %vm677_vm5, %v1887_v57, %v4631_v41  ;;  %943 = vrot.lane.b32.xlu1 %v937_v26, %s3313_s11  ;;  %v789_v46 = vpop.permute.xlu0 %788  ;;  %v5985_v41 = vld [vmem:[#allocation74_spill] sm:$0xff]  ;;  %v1890_v7 = vsel %vm677_vm5, %v5986_v50, %v1887_v57 }
 0x47d   : > { %v1896_v25 = vadd.f32 %v1891_v44, %v1871_v10  ;;  %v792_v5 = vsel %vm389_vm1, %v4465_v13, %v789_v46  ;;  %v793_v47 = vsel %vm389_vm1, %v789_v46, %v5984_v54  ;;  %v2494_v32 = vmul.f32 %v5985_v41, %v4081_v36 }
 0x47e   : > { %v798_v30 = vadd.f32 %v792_v5, %v776_v33  ;;  %v799_v45 = vadd.f32 %v793_v47, %v777_v38  ;;  %v959_v10 = vstv %s2980_s26  ;;  %v1895_v33 = vadd.f32 %v1890_v7, %v1870_v14  ;;  %s3315_s26 = smov 49  }
 0x47f   : > { %v961_v57 = vmul.f32 %v959_v10, %v4203_v28  ;;  %v1922_v14 = vmul.f32 %v5954_v18, %v4203_v28  ;;  %v5992_v18 = vld [vmem:[#allocation85_spill] sm:$0xff] }
 0x480   : > { %v4748_v26 = vadd.f32 %v803_v29, %v798_v30  ;;  %v4750_v13 = vadd.f32 %v804_v15, %v799_v45  ;;  %v960_v45 = vmul.f32 0.0, %v959_v10 }
 0x481   : > { %2502 = vrot.lane.b32.xlu2 %v2494_v32, %s3306_s25  ;;  %v5990_v32 = vld [vmem:[#allocation32_spill] sm:$0xff] }
 0x482   : > { %1632 = vrot.lane.b32.xlu0 %v4088_v40, %s3308_s23  ;;  %v5989_v40 = vld [vmem:[#allocation78_spill] sm:$0xff] }
 0x483   : > { %v1909_v38 = vpop.permute.xlu2 %1908  ;;  %v2516_v30 = vmul.f32 %v5989_v40, %v4081_v36 }
 0x484   : > { %v1912_v44 = vsel %vm700_vm6, %v5987_v2, %v1909_v38  ;;  %v1913_v46 = vsel %vm700_vm6, %v1909_v38, %v1911_v60  ;;  %v977_v5 = vpop.permute.xlu0 %976  ;;  %v5991_v38 = vld [vmem:[#allocation33_spill] sm:$0xff] }
 0x485   : > { %v4759_v54 = vadd.f32 %v1912_v44, %v1895_v33  ;;  %v4761_v47 = vadd.f32 %v1913_v46, %v1896_v25  ;;  %v981_v29 = vsel %vm677_vm5, %v977_v5, %v4549_v35  ;;  %v980_v50 = vsel %vm677_vm5, %v5990_v32, %v977_v5 }
 0x486   : > { %v986_v15 = vadd.f32 %v981_v29, %v961_v57  ;;  %v985_v7 = vadd.f32 %v980_v50, %v960_v45  ;;  %v2656_v29 = vmul.f32 %v5992_v18, %v4029_v56  ;;  %v1944_v5 = vmul.f32 %v5957_v3, %v4203_v28 }
 0x487   : > { %5988 = vst [vmem:[#allocation25_spill] sm:$0xff] %v4759_v54  ;;  %v1966_v3 = vmul.f32 %v5960_v48, %v4203_v28  ;;  %v2251_v54 = vmul.f32 %v5974_v59, %v4203_v28 }
 0x489   : > { %2524 = vrot.lane.b32.xlu2 %v2516_v30, %s3307_s22 }
 0x48a   : > { %1928 = vrot.lane.b32.xlu0 %v1922_v14, %s3308_s23  ;;  %v5993_v14 = vld [vmem:[#allocation35_spill] sm:$0xff] }
 0x48b   : > { %v4773_v25 = vpop.permute.xlu2 %1930 }
 0x48c   : > { %v999_v33 = vpop.permute.xlu0 %998 }
 0x48d   : > { %v1002_v2 = vsel %vm700_vm6, %v5991_v38, %v999_v33  ;;  %v1003_v44 = vsel %vm700_vm6, %v999_v33, %v4561_v53  ;;  %v2677_v33 = vmul.f32 %v4567_v11, %v4029_v56 }
 0x48e   : > { %v1007_v46 = vadd.f32 %v1002_v2, %v985_v7  ;;  %v1008_v57 = vadd.f32 %v1003_v44, %v986_v15  ;;  %v5994_v2 = vld [vmem:[#allocation83_spill] sm:$0xff] }
 0x48f   : > { %v1935_v44 = vsel %vm723_vm7, %v4773_v25, %v5994_v2 }
 0x491   : > { %2664 = vrot.lane.b32.xlu2 %v2656_v29, %s3307_s22 }
 0x492   : > { %1950 = vrot.lane.b32.xlu0 %v1944_v5, %s3309_s20  ;;  %v5995_v5 = vld [vmem:[#allocation86_spill] sm:$0xff] }
 0x493   : > { %v4785_v30 = vpop.permute.xlu2 %1952 }
 0x494   : > { %v1021_v45 = vpop.permute.xlu0 %1020  ;;  %v1957_v48 = vsel %vm746_vm8, %v4785_v30, %v5995_v5 }
 0x495   : > { %v1024_v32 = vsel %vm723_vm7, %v5993_v14, %v1021_v45  ;;  %v1025_v50 = vsel %vm723_vm7, %v1021_v45, %v4577_v49 }
 0x496   : > { %v4791_v15 = vadd.f32 %v1024_v32, %v1007_v46  ;;  %v1030_v7 = vadd.f32 %v1025_v50, %v1008_v57  ;;  %v1919_v57 = vadd.f32 %v1911_v60, %v4636_v61  ;;  %v2414_v32 = vmul.f32 %v4581_v31, %v4029_v56  ;;  %v5996_v50 = vld [vmem:[#allocation88_spill] sm:$0xff] }
 0x497   : > { %v1988_v61 = vmul.f32 %v5963_v1, %v4203_v28 }
 0x498   : > { %v1941_v14 = vadd.f32 %v1935_v44, %v1919_v57  ;;  %v5997_v57 = vld [vmem:[#allocation91_spill] sm:$0xff] }
 0x499   : > { %2684 = vrot.lane.b32.xlu2 %v2677_v33, %s3308_s23 }
 0x49a   : > { %1972 = vrot.lane.b32.xlu0 %v1966_v3, %s3310_s27  ;;  %v1963_v60 = vadd.f32 %v1957_v48, %v1941_v14  ;;  %v4819_v3 = vstv %s3029_s13 }
 0x49b   : > { %v4799_v38 = vpop.permute.xlu2 %1974  ;;  %v2012_v48 = vmul.f32 %v4819_v3, %v4029_v56 }
 0x49c   : > { %v1043_v46 = vpop.permute.xlu0 %1042  ;;  %v1979_v33 = vsel %vm769_vm9, %v4799_v38, %v5996_v50 }
 0x49d   : > { %v1046_v29 = vsel %vm746_vm8, %v4480_v22, %v1043_v46  ;;  %v1985_v2 = vadd.f32 %v1979_v33, %v1963_v60  ;;  %v4837_v60 = vstv %s3036_s28 }
 0x49e   : > { %v1052_v45 = vadd.f32 %v1046_v29, %v1030_v7  ;;  %v962_v7 = vmul.f32 %v959_v10, %v4081_v36 }
 0x4a0   : > { %v987_v1 = vadd.f32 %v4549_v35, %v962_v7  ;;  %v2229_v7 = vmul.f32 %v5971_v55, %v4203_v28 }
 0x4a1   : > { %2421 = vrot.lane.b32.xlu2 %v2414_v32, %s3310_s27 }
 0x4a2   : > { %1994 = vrot.lane.b32.xlu0 %v1988_v61, %s3311_s24  ;;  %v1009_v10 = vadd.f32 %v4561_v53, %v987_v1  ;;  %v2699_v61 = vmul.f32 %v4597_v42, %v4029_v56  ;;  %v5999_v53 = vld [vmem:[#allocation73_spill] sm:$0xff] }
 0x4a3   : > { %v4822_v44 = vpop.permute.xlu2 %1996 }
 0x4a4   : > { %v2001_v29 = vsel %vm389_vm1, %v4822_v44, %v5997_v57  ;;  %v1065_v5 = vpop.permute.xlu0 %1064  ;;  %v5998_v57 = vld [vmem:[#allocation70_spill] sm:$0xff] }
 0x4a5   : > { %v2007_v14 = vadd.f32 %v2001_v29, %v1985_v2  ;;  %v1068_v32 = vsel %vm769_vm9, %v4495_v19, %v1065_v5  ;;  %v1047_v35 = vsel %vm746_vm8, %v1043_v46, %v5998_v57  ;;  %v1031_v2 = vadd.f32 %v4577_v49, %v1009_v10  ;;  %v4844_v29 = vpop.permute.xlu1 %2195  ;;  %v6000_v57 = vld [vmem:[#allocation76_spill] sm:$0xff] }
 0x4a6   : > { %v1074_v50 = vadd.f32 %v1068_v32, %v1052_v45  ;;  %v1069_v45 = vsel %vm769_vm9, %v1065_v5, %v5999_v53 }
 0x4a7   : > { %v4833_v33 = vadd.f32 %v2012_v48, %v2007_v14  ;;  %v1053_v1 = vadd.f32 %v1047_v35, %v1031_v2  ;;  %v2178_v48 = vmul.f32 %v4837_v60, %v4203_v28  ;;  %v4852_v14 = vstv %s2987_s9 }
 0x4a8   : > { %v1101_v5 = vmul.f32 %v4852_v14, %v4027_v4  ;;  %v2177_v2 = vmul.f32 0.0, %v4837_v60  ;;  %v1102_v53 = vmul.f32 %v4852_v14, %v4029_v56 }
 0x4a9   : > { %2706 = vrot.lane.b32.xlu2 %v2699_v61, %s3309_s20  ;;  %v1075_v32 = vadd.f32 %v1069_v45, %v1053_v1  ;;  %v2436_v45 = vmul.f32 %v4613_v12, %v4029_v56  ;;  %v6001_v1 = vld [vmem:[#allocation120_spill] sm:$0xff] }
 0x4aa   : > { %2235 = vrot.lane.b32.xlu0 %v2229_v7, %s3308_s23 }
 0x4ab   : > { %v2194_v46 = vpop.permute.xlu2 %2193 }
 0x4ac   : > { %v2198_v55 = vsel %vm677_vm5, %v2194_v46, %v4844_v29  ;;  %v1087_v49 = vpop.permute.xlu0 %1086 }
 0x4ad   : > { %v2203_v10 = vadd.f32 %v2198_v55, %v2178_v48  ;;  %v1090_v61 = vsel %vm389_vm1, %v4510_v34, %v1087_v49  ;;  %v1091_v35 = vsel %vm389_vm1, %v1087_v49, %v6000_v57  ;;  %v2197_v48 = vsel %vm677_vm5, %v6001_v1, %v2194_v46  ;;  %v2218_v49 = vpop.permute.xlu1 %2217 }
 0x4ae   : > { %v1096_v7 = vadd.f32 %v1090_v61, %v1074_v50  ;;  %v1097_v20 = vadd.f32 %v1091_v35, %v1075_v32  ;;  %v4874_v50 = vstv %s2994_s6  ;;  %v829_v32 = vadd.f32 %v4154_v16, %v4750_v13  ;;  %v6002_v35 = vld [vmem:[#allocation123_spill] sm:$0xff] }
 0x4af   : > { %v2202_v61 = vadd.f32 %v2197_v48, %v2177_v2  ;;  %v2721_v1 = vmul.f32 %v4643_v8, %v4029_v56  ;;  %v1267_v48 = vmul.f32 0.0, %v4874_v50  ;;  %v6011_v8 = vld [vmem:[#allocation161_spill] sm:$0xff] }
 0x4b0   : > { %v4869_v55 = vadd.f32 %v1101_v5, %v1096_v7  ;;  %v1105_v62 = vadd.f32 %v1102_v53, %v1097_v20  ;;  %v1268_v53 = vmul.f32 %v4874_v50, %v4203_v28  ;;  %v851_v13 = vadd.f32 %v4166_v24, %v829_v32 }
 0x4b1   : > { %2443 = vrot.lane.b32.xlu2 %v2436_v45, %s3311_s24 }
 0x4b2   : > { %2257 = vrot.lane.b32.xlu0 %v2251_v54, %s3309_s20  ;;  %v1127_v2 = vadd.f32 %v4188_v0, %v1105_v62  ;;  %v873_v32 = vadd.f32 %v4177_v37, %v851_v13  ;;  %v6010_v37 = vld [vmem:[#allocation80_spill] sm:$0xff] }
 0x4b3   : > { %v2216_v57 = vpop.permute.xlu2 %2215 }
 0x4b4   : > { %v2219_v46 = vsel %vm700_vm6, %v6002_v35, %v2216_v57  ;;  %v2220_v5 = vsel %vm700_vm6, %v2216_v57, %v2218_v49  ;;  %v1284_v7 = vpop.permute.xlu0 %1283  ;;  %v1149_v62 = vadd.f32 %v4205_v27, %v1127_v2  ;;  %v6007_v2 = vld [vmem:[#allocation186_spill] sm:$0xff] }
 0x4b5   : > { %v4882_v59 = vadd.f32 %v2219_v46, %v2202_v61  ;;  %v4884_v20 = vadd.f32 %v2220_v5, %v2203_v10  ;;  %v1288_v54 = vsel %vm677_vm5, %v1284_v7, %v4593_v6  ;;  %v2273_v10 = vmul.f32 %v5978_v21, %v4203_v28  ;;  %v6003_v61 = vld [vmem:[#allocation45_spill] sm:$0xff] }
 0x4b6   : > { %v1293_v45 = vadd.f32 %v1288_v54, %v1268_v53  ;;  %v1287_v57 = vsel %vm677_vm5, %v6003_v61, %v1284_v7  ;;  %v6004_v53 = vld [vmem:[#allocation47_spill] sm:$0xff]  ;;  %v889_v7 = vsel %vm746_vm8, %v4239_v51, %v6005_v17  ;;  %v2743_v27 = vmul.f32 %v6007_v2, %v4029_v56 }
 0x4b7   : > { %v1292_v46 = vadd.f32 %v1287_v57, %v1267_v48  ;;  %v6006_v61 = vld [vmem:[#allocation143_spill] sm:$0xff]  ;;  %v895_v43 = vadd.f32 %v889_v7, %v873_v32  ;;  %v2295_v48 = vmul.f32 %v5983_v9, %v4203_v28  ;;  %v6008_v57 = vld [vmem:[#allocation62_spill] sm:$0xff]  ;;  %v1187_v17 = vsel %vm746_vm8, %v6011_v8, %v6010_v37 }
 0x4b8   : > { %v1171_v13 = vadd.f32 %v6006_v61, %v1149_v62  ;;  %v6013_v9 = vld [vmem:[#allocation51_spill] sm:$0xff]  ;;  %v6018_v8 = vld [vmem:[#allocation162_spill] sm:$0xff] }
 0x4b9   : > { %2728 = vrot.lane.b32.xlu2 %v2721_v1, %s3310_s27  ;;  %v6017_v37 = vld [vmem:[#allocation87_spill] sm:$0xff] }
 0x4ba   : > { %2279 = vrot.lane.b32.xlu0 %v2273_v10, %s3310_s27 }
 0x4bb   : > { %v4903_v35 = vpop.permute.xlu2 %2237 }
 0x4bc   : > { %v1306_v5 = vpop.permute.xlu0 %1305 }
 0x4bd   : > { %v1309_v54 = vsel %vm700_vm6, %v6004_v53, %v1306_v5  ;;  %v1310_v21 = vsel %vm700_vm6, %v1306_v5, %v4609_v58  ;;  %v6009_v53 = vld [vmem:[#allocation150_spill] sm:$0xff] }
 0x4be   : > { %v1314_v1 = vadd.f32 %v1309_v54, %v1292_v46  ;;  %v1315_v10 = vadd.f32 %v1310_v21, %v1293_v45  ;;  %v911_v5 = vsel %vm769_vm9, %v6009_v53, %v6008_v57  ;;  %v1193_v46 = vadd.f32 %v1187_v17, %v1171_v13  ;;  %v4927_v54 = vpop.permute.xlu1 %2542  ;;  %v6014_v21 = vld [vmem:[#allocation41_spill] sm:$0xff]  ;;  %v6015_v57 = vld [vmem:[#allocation66_spill] sm:$0xff] }
 0x4bf   : > { %v917_v62 = vadd.f32 %v911_v5, %v895_v43  ;;  %6012 = vst [vmem:[#allocation26_spill] sm:$0xff] %v4927_v54  ;;  %v6016_v53 = vld [vmem:[#allocation153_spill] sm:$0xff]  ;;  %v2493_v17 = vmul.f32 %v5985_v41, %v4203_v28  ;;  %v6020_v54 = vld [vmem:[#allocation164_spill] sm:$0xff] }
 0x4c0   : > { %v933_v2 = vsel %vm389_vm1, %v6016_v53, %v6015_v57 }
 0x4c1   : > { %2750 = vrot.lane.b32.xlu2 %v2743_v27, %s3311_s24  ;;  %v939_v13 = vadd.f32 %v933_v2, %v917_v62  ;;  %v6022_v62 = vld [vmem:[#allocation103_spill] sm:$0xff] }
 0x4c2   : > { %2301 = vrot.lane.b32.xlu0 %v2295_v48, %s3311_s24  ;;  %v1209_v48 = vsel %vm769_vm9, %v6018_v8, %v6017_v37  ;;  %v2242_v41 = vsel %vm723_vm7, %v4903_v35, %v6022_v62  ;;  %v6024_v37 = vld [vmem:[#allocation106_spill] sm:$0xff]  ;;  %v6052_v8 = vld [vmem:[#allocation67_spill] sm:$0xff] }
 0x4c3   : > { %v4925_v45 = vpop.permute.xlu2 %2259  ;;  %v1215_v5 = vadd.f32 %v1209_v48, %v1193_v46 }
 0x4c4   : > { %v1328_v32 = vpop.permute.xlu0 %1327  ;;  %v2264_v48 = vsel %vm746_vm8, %v4925_v45, %v6024_v37 }
 0x4c5   : > { %v1331_v27 = vsel %vm723_vm7, %v6013_v9, %v1328_v32  ;;  %v1332_v7 = vsel %vm723_vm7, %v1328_v32, %v6014_v21  ;;  %v2179_v9 = vmul.f32 %v4837_v60, %v4081_v36  ;;  %v6019_v32 = vld [vmem:[#allocation90_spill] sm:$0xff] }
 0x4c6   : > { %v4939_v61 = vadd.f32 %v1331_v27, %v1314_v1  ;;  %v1337_v43 = vadd.f32 %v1332_v7, %v1315_v10  ;;  %v1231_v57 = vsel %vm389_vm1, %v6020_v54, %v6019_v32  ;;  %v6023_v27 = vld [vmem:[#allocation172_spill] sm:$0xff]  ;;  %v6026_v32 = vld [vmem:[#allocation109_spill] sm:$0xff] }
 0x4c7   : > { %v2204_v1 = vadd.f32 %v4844_v29, %v2179_v9  ;;  %v1237_v2 = vadd.f32 %v1231_v57, %v1215_v5  ;;  %v2515_v57 = vmul.f32 %v5989_v40, %v4203_v28  ;;  %v6049_v54 = vld [vmem:[#allocation57_spill] sm:$0xff] }
 0x4c9   : > { %947 = vrot.lane.b32.xlu2 %v939_v13, %s3313_s11  ;;  %v2226_v60 = vadd.f32 %v2218_v49, %v2204_v1  ;;  %v1243_v9 = vrot.slane %v1237_v2, 7  ;;  %v1269_v1 = vmul.f32 %v4874_v50, %v4081_v36  ;;  %v6030_v50 = vld [vmem:[#allocation174_spill] sm:$0xff] }
 0x4ca   : > { %2500 = vrot.lane.b32.xlu0 %v2493_v17, %s3306_s25  ;;  %v4961_v17 = vpop.permute.xlu1 %2564  ;;  %s3314_s25 = smov 50  }
 0x4cb   : > { %v4951_v10 = vpop.permute.xlu2 %2281  ;;  %6025 = vst [vmem:[#allocation44_spill] sm:$0xff] %v4961_v17  ;;  %v2248_v29 = vadd.f32 %v2242_v41, %v2226_v60  ;;  %v1294_v41 = vadd.f32 %v4593_v6, %v1269_v1  ;;  %v6029_v60 = vld [vmem:[#allocation112_spill] sm:$0xff]  ;;  %v6032_v1 = vld [vmem:[#allocation77_spill] sm:$0xff] }
 0x4cc   : > { %6021 = vst [vmem:[#allocation61_spill] sm:$0xff] %v4951_v10  ;;  %v1350_v46 = vpop.permute.xlu0 %1349  ;;  %v2286_v5 = vsel %vm769_vm9, %v4951_v10, %v6026_v32 }
 0x4cd   : > { %v1353_v7 = vsel %vm746_vm8, %v6023_v27, %v1350_v46  ;;  %v2270_v49 = vadd.f32 %v2264_v48, %v2248_v29 }
 0x4ce   : > { %v1359_v13 = vadd.f32 %v1353_v7, %v1337_v43  ;;  %v4972_v43 = vstv %s3043_s15  ;;  %s5486_s15 = scalar_lea.vmem [#allocation8], %s2954_s12  ;;  %s3072_s12 = sshll.u32 %s3390_s7, 6 }
 0x4cf   : > { %6027 = vst [vmem:[#allocation28_spill] sm:$0xff] %v4972_v43  ;;  %v2292_v62 = vadd.f32 %v2286_v5, %v2270_v49  ;;  %v2319_v37 = vmul.f32 %v4972_v43, %v4029_v56  ;;  %v6031_v5 = vld [vmem:[#allocation92_spill] sm:$0xff]  ;;  %s2846_s7 = scalar_lea.sflag [#allocation5], %s3466_s14 }
 0x4d1   : > { %1248 = vrot.lane.b32.xlu2 %v1243_v9, %s3314_s25  ;;  %v1316_v9 = vadd.f32 %v4609_v58, %v1294_v41 }
 0x4d2   : > { %2522 = vrot.lane.b32.xlu0 %v2515_v57, %s3307_s22  ;;  %v1354_v57 = vsel %vm746_vm8, %v1350_v46, %v6031_v5  ;;  %v4992_v17 = vpop.permute.xlu1 %2586 }
 0x4d3   : > { %v4974_v2 = vpop.permute.xlu2 %2303  ;;  %v1338_v6 = vadd.f32 %v6014_v21, %v1316_v9  ;;  %6033 = vst [vmem:[#allocation30_spill] sm:$0xff] %v4992_v17  ;;  %v6043_v17 = vld [vmem:[#allocation148_spill] sm:$0xff] }
 0x4d4   : > { %6028 = vst [vmem:[#allocation64_spill] sm:$0xff] %v4974_v2  ;;  %v2308_v40 = vsel %vm389_vm1, %v4974_v2, %v6029_v60  ;;  %v1372_v7 = vpop.permute.xlu0 %1371  ;;  %v2537_v60 = vmul.f32 %v6032_v1, %v4081_v36  ;;  %v6034_v2 = vld [vmem:[#allocation94_spill] sm:$0xff]  ;;  %v6039_v1 = vld [vmem:[#allocation81_spill] sm:$0xff] }
 0x4d5   : > { %v2314_v48 = vadd.f32 %v2308_v40, %v2292_v62  ;;  %v1375_v29 = vsel %vm769_vm9, %v6030_v50, %v1372_v7  ;;  %v1376_v62 = vsel %vm769_vm9, %v1372_v7, %v6034_v2  ;;  %v1360_v40 = vadd.f32 %v1354_v57, %v1338_v6 }
 0x4d6   : > { %v1381_v32 = vadd.f32 %v1375_v29, %v1359_v13  ;;  %v4999_v13 = vstv %s3001_s17 }
 0x4d7   : > { %v4987_v49 = vadd.f32 %v2319_v37, %v2314_v48  ;;  %v1382_v46 = vadd.f32 %v1376_v62, %v1360_v40  ;;  %v6036_v37 = vld [vmem:[#allocation176_spill] sm:$0xff]  ;;  %v1408_v9 = vmul.f32 %v4999_v13, %v4027_v4  ;;  %v1409_v2 = vmul.f32 %v4999_v13, %v4029_v56  ;;  %v6040_v62 = vld [vmem:[#allocation146_spill] sm:$0xff] }
 0x4d8   : > { %v6037_v48 = vld [vmem:[#allocation96_spill] sm:$0xff] }
 0x4da   : > { %2544 = vrot.lane.b32.xlu0 %v2537_v60, %s3308_s23  ;;  %v2559_v60 = vmul.f32 %v6039_v1, %v4081_v36 }
 0x4db   : > { %v4997_v58 = vpop.permute.xlu2 %2502 }
 0x4dc   : > { %6035 = vst [vmem:[#allocation31_spill] sm:$0xff] %v4997_v58  ;;  %v1394_v41 = vpop.permute.xlu0 %1393 }
 0x4dd   : > { %v1397_v21 = vsel %vm389_vm1, %v6036_v37, %v1394_v41  ;;  %v1398_v29 = vsel %vm389_vm1, %v1394_v41, %v6037_v48  ;;  %v5015_v41 = vpop.permute.xlu1 %2608 }
 0x4de   : > { %v1403_v7 = vadd.f32 %v1397_v21, %v1381_v32  ;;  %v1404_v5 = vadd.f32 %v1398_v29, %v1382_v46  ;;  %6041 = vst [vmem:[#allocation68_spill] sm:$0xff] %v5015_v41  ;;  %v6044_v32 = vld [vmem:[#allocation151_spill] sm:$0xff]  ;;  %v6045_v21 = vld [vmem:[#allocation98_spill] sm:$0xff]  ;;  %v6046_v29 = vld [vmem:[#allocation168_spill] sm:$0xff] }
 0x4e0   : > { %v5009_v57 = vadd.f32 %v1408_v9, %v1403_v7  ;;  %v1412_v6 = vadd.f32 %v1409_v2, %v1404_v5  ;;  %v1494_v9 = vsel %vm746_vm8, %v6046_v29, %v6045_v21  ;;  %v1573_v2 = vstv %s3008_s21  ;;  %v6047_v5 = vld [vmem:[#allocation84_spill] sm:$0xff]  ;;  %s2857_s21 = scalar_lea.hbm %s5542_s8, %s3072_s12 }
 0x4e1   : > { %v1574_v7 = vmul.f32 0.0, %v1573_v2 }
 0x4e2   : > { %6038 = vst [vmem:[#allocation48_spill] sm:$0xff] %v5009_v57  ;;  %v1434_v40 = vadd.f32 %v6040_v62, %v1412_v6  ;;  %2566 = vrot.lane.b32.xlu0 %v2559_v60, %s3309_s20  ;;  %v2581_v6 = vmul.f32 %v6047_v5, %v4081_v36  ;;  %v6048_v60 = vld [vmem:[#allocation101_spill] sm:$0xff] }
 0x4e3   : > { %v5017_v48 = vpop.permute.xlu2 %2524  ;;  %v1516_v41 = vsel %vm769_vm9, %v6049_v54, %v6048_v60 }
 0x4e4   : > { %6042 = vst [vmem:[#allocation52_spill] sm:$0xff] %v5017_v48  ;;  %v1456_v58 = vadd.f32 %v6043_v17, %v1434_v40  ;;  %v1591_v43 = vpop.permute.xlu0 %1590  ;;  %v6050_v48 = vld [vmem:[#allocation65_spill] sm:$0xff] }
 0x4e5   : > { %v1594_v40 = vsel %vm677_vm5, %v6050_v48, %v1591_v43 }
 0x4e6   : > { %v1478_v46 = vadd.f32 %v6044_v32, %v1456_v58  ;;  %v6051_v32 = vld [vmem:[#allocation104_spill] sm:$0xff]  ;;  %v1599_v53 = vadd.f32 %v1594_v40, %v1574_v7  ;;  %v6056_v7 = vld [vmem:[#allocation89_spill] sm:$0xff] }
 0x4e7   : > { %v1538_v21 = vsel %vm389_vm1, %v6052_v8, %v6051_v32  ;;  %v1575_v32 = vmul.f32 %v1573_v2, %v4203_v28  ;;  %v2603_v40 = vmul.f32 %v6056_v7, %v4081_v36 }
 0x4e8   : > { %v1500_v1 = vadd.f32 %v1494_v9, %v1478_v46  ;;  %v5037_v46 = vpop.permute.xlu1 %2401  ;;  %v6054_v9 = vld [vmem:[#allocation69_spill] sm:$0xff] }
 0x4ea   : > { %2588 = vrot.lane.b32.xlu0 %v2581_v6, %s3310_s27  ;;  %v1522_v58 = vadd.f32 %v1516_v41, %v1500_v1  ;;  %v1576_v6 = vmul.f32 %v1573_v2, %v4081_v36  ;;  %v6055_v41 = vld [vmem:[#allocation185_spill] sm:$0xff]  ;;  %v6061_v36 = vld [vmem:[#allocation99_spill] sm:$0xff] }
 0x4eb   : > { %v5035_v29 = vpop.permute.xlu2 %2664  ;;  %v1595_v1 = vsel %vm677_vm5, %v1591_v43, %v6055_v41 }
 0x4ec   : > { %6053 = vst [vmem:[#allocation74_spill] sm:$0xff] %v5035_v29  ;;  %v1613_v10 = vpop.permute.xlu0 %1612  ;;  %v1544_v5 = vadd.f32 %v1538_v21, %v1522_v58  ;;  %v1601_v58 = vadd.f32 %v6055_v41, %v1576_v6  ;;  %v6057_v21 = vld [vmem:[#allocation187_spill] sm:$0xff]  ;;  %v6062_v6 = vld [vmem:[#allocation34_spill] sm:$0xff] }
 0x4ed   : > { %v1616_v60 = vsel %vm700_vm6, %v6054_v9, %v1613_v10  ;;  %v1656_v41 = vsel %vm746_vm8, %v6062_v6, %v6061_v36 }
 0x4ee   : > { %v5041_v54 = vadd.f32 %v1616_v60, %v1599_v53  ;;  %v1550_v48 = vrot.slane %v1544_v5, 6  ;;  %v1617_v53 = vsel %vm700_vm6, %v1613_v10, %v6057_v21  ;;  %v1600_v5 = vadd.f32 %v1595_v1, %v1575_v32 }
 0x4ef   : > { %v1623_v9 = vadd.f32 %v6057_v21, %v1601_v58  ;;  %v1655_v1 = vsel %vm746_vm8, %v4677_v52, %v6062_v6  ;;  %v6064_v58 = vld [vmem:[#allocation37_spill] sm:$0xff] }
 0x4f0   : > { %1555 = vrot.lane.b32.xlu2 %v1550_v48, %s3315_s26  ;;  %v1622_v2 = vadd.f32 %v1617_v53, %v1600_v5  ;;  %v5057_v29 = vpop.permute.xlu1 %2686  ;;  %v6060_v48 = vld [vmem:[#allocation178_spill] sm:$0xff]  ;;  %v5070_v53 = vstv %s3015_s16  ;;  %s2858_s16 = sshll.u32 %s5486_s15, 4  ;;  %s2859_s16 = int_to_ptr.vmem [resolvable:$true] %s2858_s16 }
 0x4f1   : > { %6059 = vst [vmem:[#allocation111_spill] sm:$0xff] %v5057_v29  ;;  %v6072_v29 = vld [vmem:[#allocation46_spill] sm:$0xff] }
 0x4f2   : > { %2610 = vrot.lane.b32.xlu0 %v2603_v40, %s3311_s24  ;;  %v6063_v40 = vld [vmem:[#allocation102_spill] sm:$0xff]  ;;  %6065 = vst [vmem:[#allocation78_spill] sm:$0xff] %v5070_v53 }
 0x4f3   : > { %v5055_v43 = vpop.permute.xlu2 %2684  ;;  %v1678_v21 = vsel %vm769_vm9, %v6064_v58, %v6063_v40 }
 0x4f4   : > { %6058 = vst [vmem:[#allocation108_spill] sm:$0xff] %v5055_v43  ;;  %v1633_v60 = vpop.permute.xlu0 %1632  ;;  %v6068_v43 = vld [vmem:[#allocation39_spill] sm:$0xff] }
 0x4f5   : > { %v1634_v28 = vsel %vm723_vm7, %v6060_v48, %v1633_v60  ;;  %v1640_v7 = vadd.f32 %v1633_v60, %v1623_v9  ;;  %v2655_v9 = vmul.f32 %v5992_v18, %v4027_v4  ;;  %v6066_v60 = vld [vmem:[#allocation24_spill] sm:$0xff]  ;;  %v6069_v18 = vld [vmem:[#allocation43_spill] sm:$0xff] }
 0x4f6   : > { %v1639_v10 = vadd.f32 %v1634_v28, %v1622_v2  ;;  %v1677_v36 = vsel %vm769_vm9, %v6066_v60, %v6064_v58  ;;  %v6067_v2 = vld [vmem:[#allocation105_spill] sm:$0xff]  ;;  %v1710_v58 = vmul.f32 %v5070_v53, %v4027_v4 }
 0x4f7   : > { %v1662_v32 = vadd.f32 %v1656_v41, %v1640_v7  ;;  %v1700_v6 = vsel %vm389_vm1, %v6068_v43, %v6067_v2  ;;  %v1051_v7 = vadd.f32 %v4480_v22, %v4791_v15 }
 0x4f8   : > { %v1661_v5 = vadd.f32 %v1655_v1, %v1639_v10  ;;  %v1699_v10 = vsel %vm389_vm1, %v4717_v39, %v6068_v43  ;;  %v2037_v1 = vadd.f32 %v6069_v18, %v4833_v33  ;;  %v6070_v43 = vld [vmem:[#allocation71_spill] sm:$0xff] }
 0x4f9   : > { %v1684_v28 = vadd.f32 %v1678_v21, %v1662_v32  ;;  %v1711_v32 = vmul.f32 %v5070_v53, %v4029_v56  ;;  %v5101_v56 = vpop.permute.xlu1 %2423 }
 0x4fa   : > { %v1683_v41 = vadd.f32 %v1677_v36, %v1661_v5  ;;  %2662 = vrot.lane.b32.xlu0 %v2655_v9, %s3307_s22  ;;  %v1073_v5 = vadd.f32 %v4495_v19, %v1051_v7  ;;  %v6071_v36 = vld [vmem:[#allocation54_spill] sm:$0xff]  ;;  %v2059_v8 = vadd.f32 %v6072_v29, %v2037_v1  ;;  %v6075_v7 = vld [vmem:[#allocation93_spill] sm:$0xff]  ;;  %s3316_s22 = smov 47  }
 0x4fb   : > { %v1706_v40 = vadd.f32 %v1700_v6, %v1684_v28  ;;  %v5094_v15 = vpop.permute.xlu2 %2421  ;;  %v1730_v33 = vsel %vm677_vm5, %v6071_v36, %v6070_v43  ;;  %v1100_v36 = vmul.f32 0.0, %v4852_v14 }
 0x4fc   : > { %v1705_v21 = vadd.f32 %v1699_v10, %v1683_v41  ;;  %v5092_v2 = vpop.permute.xlu0 %1928  ;;  %v2676_v41 = vmul.f32 %v4567_v11, %v4027_v4  ;;  %v6073_v10 = vld [vmem:[#allocation169_spill] sm:$0xff]  ;;  %v1095_v1 = vadd.f32 %v4510_v34, %v1073_v5  ;;  %v6081_v5 = vld [vmem:[#allocation75_spill] sm:$0xff] }
 0x4fd   : > { %v1714_v22 = vadd.f32 %v1711_v32, %v1706_v40  ;;  %v6074_v32 = vld [vmem:[#allocation58_spill] sm:$0xff] }
 0x4fe   : > { %v1713_v9 = vadd.f32 %v1710_v58, %v1705_v21  ;;  %v1752_v40 = vsel %vm700_vm6, %v6074_v32, %v6073_v10  ;;  %v6076_v58 = vld [vmem:[#allocation17_spill] sm:$0xff]  ;;  %v6080_v32 = vld [vmem:[#allocation38_spill] sm:$0xff] }
 0x4ff   : > { %v1736_v28 = vadd.f32 %v6070_v43, %v1714_v22  ;;  %v2075_v21 = vsel %vm723_vm7, %v6076_v58, %v6075_v7  ;;  %v6077_v22 = vld [vmem:[#allocation163_spill] sm:$0xff] }
 0x500   : > { %v1735_v6 = vadd.f32 %v1730_v33, %v1713_v9  ;;  %v6078_v9 = vld [vmem:[#allocation154_spill] sm:$0xff]  ;;  %v2081_v43 = vadd.f32 %v2075_v21, %v2059_v8  ;;  %v1358_v33 = vadd.f32 %v6023_v27, %v4939_v61 }
 0x501   : > { %v1758_v19 = vadd.f32 %v6073_v10, %v1736_v28  ;;  %v1769_v11 = vsel %vm723_vm7, %v6078_v9, %v6077_v22  ;;  %v6079_v10 = vld [vmem:[#allocation72_spill] sm:$0xff]  ;;  %v6084_v9 = vld [vmem:[#allocation95_spill] sm:$0xff]  ;;  %v6085_v61 = vld [vmem:[#allocation18_spill] sm:$0xff] }
 0x502   : > { %v1757_v17 = vadd.f32 %v1752_v40, %v1735_v6  ;;  %2682 = vrot.lane.b32.xlu0 %v2676_v41, %s3308_s23  ;;  %v1791_v7 = vsel %vm746_vm8, %v6080_v32, %v6079_v10  ;;  %v6082_v6 = vld [vmem:[#allocation50_spill] sm:$0xff]  ;;  %v2097_v27 = vsel %vm746_vm8, %v6085_v61, %v6084_v9  ;;  %v1103_v10 = vadd.f32 %v1100_v36, %v1095_v1  ;;  %v6092_v36 = vld [vmem:[#allocation36_spill] sm:$0xff]  ;;  %s3317_s23 = smov 46  }
 0x503   : > { %v1775_v28 = vadd.f32 %v6077_v22, %v1758_v19  ;;  %v1813_v41 = vsel %vm769_vm9, %v6082_v6, %v6081_v5  ;;  %v6083_v40 = vld [vmem:[#allocation170_spill] sm:$0xff]  ;;  %v6086_v19 = vld [vmem:[#allocation171_spill] sm:$0xff]  ;;  %v5142_v53 = vpop.permute.xlu2 %2706  ;;  %v2413_v9 = vmul.f32 %v4581_v31, %v4027_v4 }
 0x504   : > { %v5125_v34 = vpop.permute.xlu0 %1950  ;;  %v1774_v14 = vadd.f32 %v1769_v11, %v1757_v17  ;;  %v1790_v8 = vsel %vm746_vm8, %v6083_v40, %v6080_v32  ;;  %v1812_v22 = vsel %vm769_vm9, %v6086_v19, %v6082_v6  ;;  %v1380_v17 = vadd.f32 %v6030_v50, %v1358_v33  ;;  %v6087_v11 = vld [vmem:[#allocation49_spill] sm:$0xff]  ;;  %6088 = vst [vmem:[#allocation32_spill] sm:$0xff] %v5142_v53  ;;  %v6091_v6 = vld [vmem:[#allocation156_spill] sm:$0xff]  ;;  %v5155_v33 = vpop.permute.xlu1 %2708 }
 0x505   : > { %v1797_v21 = vadd.f32 %v1791_v7, %v1775_v28  ;;  %v2344_v5 = vadd.f32 %v6087_v11, %v4987_v49  ;;  %v2103_v32 = vadd.f32 %v2097_v27, %v2081_v43  ;;  %v6089_v28 = vld [vmem:[#allocation79_spill] sm:$0xff]  ;;  %v6090_v7 = vld [vmem:[#allocation82_spill] sm:$0xff]  ;;  %v1120_v1 = vsel %vm677_vm5, %v6092_v36, %v6091_v6  ;;  %v6093_v50 = vld [vmem:[#allocation173_spill] sm:$0xff]  ;;  %6094 = vst [vmem:[#allocation33_spill] sm:$0xff] %v5155_v33 }
 0x506   : > { %v1796_v39 = vadd.f32 %v1790_v8, %v1774_v14  ;;  %v1835_v40 = vsel %vm389_vm1, %v6090_v7, %v6089_v28  ;;  %v1834_v49 = vsel %vm389_vm1, %v6093_v50, %v6090_v7  ;;  %v6095_v43 = vld [vmem:[#allocation97_spill] sm:$0xff]  ;;  %v1407_v27 = vmul.f32 0.0, %v4999_v13 }
 0x507   : > { %v1819_v57 = vadd.f32 %v1813_v41, %v1797_v21  ;;  %v6096_v41 = vld [vmem:[#allocation19_spill] sm:$0xff]  ;;  %v1125_v21 = vadd.f32 %v1120_v1, %v1103_v10  ;;  %v1934_v13 = vsel %vm723_vm7, %v5092_v2, %v4773_v25  ;;  %v6101_v10 = vld [vmem:[#allocation20_spill] sm:$0xff] }
 0x508   : > { %v1818_v62 = vadd.f32 %v1812_v22, %v1796_v39  ;;  %v2119_v8 = vsel %vm769_vm9, %v6096_v41, %v6095_v43  ;;  %v1402_v39 = vadd.f32 %v6036_v37, %v1380_v17  ;;  %v6097_v22 = vld [vmem:[#allocation53_spill] sm:$0xff]  ;;  %v6102_v17 = vld [vmem:[#allocation115_spill] sm:$0xff]  ;;  %v1940_v43 = vadd.f32 %v1934_v13, %v4761_v47 }
 0x509   : > { %v1841_v14 = vadd.f32 %v1835_v40, %v1819_v57  ;;  %v2366_v28 = vadd.f32 %v6097_v22, %v2344_v5  ;;  %v2125_v53 = vadd.f32 %v2119_v8, %v2103_v32  ;;  %v6098_v57 = vld [vmem:[#allocation158_spill] sm:$0xff]  ;;  %v6099_v40 = vld [vmem:[#allocation40_spill] sm:$0xff]  ;;  %v6103_v5 = vld [vmem:[#allocation23_spill] sm:$0xff]  ;;  %v2698_v8 = vmul.f32 %v4597_v42, %v4027_v4 }
 0x50a   : > { %2419 = vrot.lane.b32.xlu0 %v2413_v9, %s3310_s27  ;;  %v1840_v31 = vadd.f32 %v1834_v49, %v1818_v62  ;;  %v1142_v50 = vsel %vm700_vm6, %v6099_v40, %v6098_v57  ;;  %v6100_v62 = vld [vmem:[#allocation100_spill] sm:$0xff]  ;;  %v2382_v32 = vsel %vm723_vm7, %v6103_v5, %v6102_v17  ;;  %v1410_v1 = vadd.f32 %v1407_v27, %v1402_v39 }
 0x50b   : > { %v1847_v36 = vrot.slane %v1841_v14, 5  ;;  %v2141_v37 = vsel %vm389_vm1, %v6101_v10, %v6100_v62  ;;  %v1147_v9 = vadd.f32 %v1142_v50, %v1125_v21  ;;  %v2388_v49 = vadd.f32 %v2382_v32, %v2366_v28  ;;  %v5189_v62 = vpop.permute.xlu2 %2443  ;;  %v6107_v21 = vld [vmem:[#allocation55_spill] sm:$0xff] }
 0x50c   : > { %v5164_v7 = vpop.permute.xlu0 %1972  ;;  %v1846_v33 = vrot.slane %v1840_v31, 5  ;;  %v1956_v14 = vsel %vm746_vm8, %v5125_v34, %v4785_v30  ;;  %v2147_v25 = vadd.f32 %v2141_v37, %v2125_v53  ;;  %v6104_v31 = vld [vmem:[#allocation160_spill] sm:$0xff]  ;;  %v6108_v53 = vld [vmem:[#allocation27_spill] sm:$0xff]  ;;  %v2426_v42 = vsel %vm769_vm9, %v5094_v15, %v5101_v56  ;;  %v2446_v39 = vpop.permute.xlu1 %2445  ;;  %v6109_v56 = vld [vmem:[#allocation166_spill] sm:$0xff] }
 0x50d   : > { %1852 = vrot.lane.b32.xlu1 %v1847_v36, %s3310_s27  ;;  %v6105_v36 = vld [vmem:[#allocation42_spill] sm:$0xff]  ;;  %v1978_v50 = vsel %vm769_vm9, %v5164_v7, %v4799_v38  ;;  %v2404_v47 = vsel %vm746_vm8, %v6108_v53, %v5037_v46  ;;  %v1962_v27 = vadd.f32 %v1956_v14, %v1940_v43  ;;  %v2448_v17 = vsel %vm389_vm1, %v5189_v62, %v2446_v39  ;;  %v6110_v14 = vld [vmem:[#allocation60_spill] sm:$0xff]  ;;  %v6111_v43 = vld [vmem:[#allocation147_spill] sm:$0xff] }
 0x50e   : > { %1850 = vrot.lane.b32.xlu2 %v1846_v33, %s3310_s27  ;;  %v1164_v40 = vsel %vm723_vm7, %v6105_v36, %v6104_v31  ;;  %v6106_v33 = vld [vmem:[#allocation165_spill] sm:$0xff]  ;;  %v2410_v13 = vadd.f32 %v2404_v47, %v2388_v49  ;;  %v2153_v37 = vrot.slane %v2147_v25, 4 }
 0x50f   : > { %v1427_v30 = vsel %vm677_vm5, %v6107_v21, %v6106_v33  ;;  %v1169_v38 = vadd.f32 %v1164_v40, %v1147_v9  ;;  %v1984_v32 = vadd.f32 %v1978_v50, %v1962_v27  ;;  %v2011_v9 = vmul.f32 %v4819_v3, %v4027_v4  ;;  %v6113_v27 = vld [vmem:[#allocation16_spill] sm:$0xff] }
 0x510   : > { %v1432_v28 = vadd.f32 %v1427_v30, %v1410_v1  ;;  %v2432_v21 = vadd.f32 %v2426_v42, %v2410_v13  ;;  %v1449_v1 = vsel %vm700_vm6, %v6110_v14, %v6109_v56  ;;  %v2435_v30 = vmul.f32 %v4613_v12, %v4027_v4  ;;  %v6114_v13 = vld [vmem:[#allocation167_spill] sm:$0xff] }
 0x511   : > { %v823_v42 = vsel %vm677_vm5, %v4192_v23, %v4154_v16  ;;  %v2053_v39 = vsel %vm700_vm6, %v6113_v27, %v6072_v29  ;;  %v1638_v16 = vadd.f32 %v6060_v48, %v5041_v54  ;;  %v845_v29 = vsel %vm700_vm6, %v4209_v63, %v4166_v24  ;;  %v6117_v14 = vld [vmem:[#allocation175_spill] sm:$0xff]  ;;  %v6118_v48 = vld [vmem:[#allocation177_spill] sm:$0xff] }
 0x512   : > { %2704 = vrot.lane.b32.xlu0 %v2698_v8, %s3309_s20  ;;  %v2454_v25 = vadd.f32 %v2448_v17, %v2432_v21  ;;  %v1191_v8 = vadd.f32 %v6111_v43, %v1169_v38  ;;  %v1454_v40 = vadd.f32 %v1449_v1, %v1432_v28  ;;  %v828_v12 = vadd.f32 %v823_v42, %v4748_v26  ;;  %v6123_v42 = vld [vmem:[#allocation138_spill] sm:$0xff]  ;;  %s3050_s20 = sld [smem:[#allocation7 + $0x6]] }
 0x513   : > { %v2074_v1 = vsel %vm723_vm7, %v6117_v14, %v6076_v58  ;;  %v1121_v54 = vsel %vm677_vm5, %v6091_v6, %v4188_v0  ;;  %v2096_v24 = vsel %vm746_vm8, %v6118_v48, %v6085_v61  ;;  %v6122_v6 = vld [vmem:[#allocation179_spill] sm:$0xff] }
 0x514   : > { %v5206_v36 = vpop.permute.xlu0 %1994  ;;  %v2460_v17 = vrot.slane %v2454_v25, 3  ;;  %v850_v58 = vadd.f32 %v845_v29, %v828_v12  ;;  %v1126_v25 = vadd.f32 %v1121_v54, %v4869_v55  ;;  %v2118_v61 = vsel %vm769_vm9, %v6122_v6, %v6096_v41 }
 0x515   : > { %v2000_v46 = vsel %vm389_vm1, %v5206_v36, %v4822_v44  ;;  %2158 = vrot.lane.b32.xlu1 %v2153_v37, %s3316_s22  ;;  %v6112_v44 = vld [vmem:[#allocation15_spill] sm:$0xff] }
 0x516   : > { %v2006_v49 = vadd.f32 %v2000_v46, %v1984_v32  ;;  %v2031_v47 = vsel %vm677_vm5, %v6112_v44, %v6069_v18  ;;  %v6115_v37 = vld [vmem:[#allocation63_spill] sm:$0xff]  ;;  %v6116_v32 = vld [vmem:[#allocation149_spill] sm:$0xff] }
 0x517   : > { %v1471_v28 = vsel %vm723_vm7, %v6115_v37, %v6114_v13  ;;  %v1213_v18 = vadd.f32 %v6116_v32, %v1191_v8  ;;  %v6125_v37 = vld [vmem:[#allocation141_spill] sm:$0xff] }
 0x518   : > { %v2014_v50 = vadd.f32 %v2011_v9, %v2006_v49  ;;  %v1476_v21 = vadd.f32 %v1471_v28, %v1454_v40  ;;  %v1143_v55 = vsel %vm700_vm6, %v6098_v57, %v6125_v37  ;;  %v6126_v28 = vld [vmem:[#allocation180_spill] sm:$0xff]  ;;  %v6139_v37 = vld [vmem:[#allocation25_spill] sm:$0xff] }
 0x51a   : > { %v2036_v38 = vadd.f32 %v2031_v47, %v2014_v50  ;;  %2441 = vrot.lane.b32.xlu0 %v2435_v30, %s3311_s24  ;;  %v1660_v50 = vadd.f32 %v4677_v52, %v1638_v16  ;;  %v6121_v30 = vld [vmem:[#allocation184_spill] sm:$0xff]  ;;  %v2140_v52 = vsel %vm389_vm1, %v6126_v28, %v6101_v10  ;;  %v6128_v10 = vld [vmem:[#allocation139_spill] sm:$0xff] }
 0x51b   : > { %v2720_v47 = vmul.f32 %v6121_v30, %v4027_v4  ;;  %v6133_v30 = vld [vmem:[#allocation78_spill] sm:$0xff] }
 0x51c   : > { %v2058_v23 = vadd.f32 %v2053_v39, %v2036_v38  ;;  %v2236_v46 = vpop.permute.xlu0 %2235  ;;  %v6124_v39 = vld [vmem:[#allocation145_spill] sm:$0xff]  ;;  %v1682_v16 = vadd.f32 %v6066_v60, %v1660_v50 }
 0x51d   : > { %v2241_v26 = vsel %vm723_vm7, %v2236_v46, %v4903_v35  ;;  %v2246_v9 = vadd.f32 %v2236_v46, %v4882_v59  ;;  %2465 = vrot.lane.b32.xlu1 %v2460_v17, %s3317_s23  ;;  %v6119_v35 = vld [vmem:[#allocation152_spill] sm:$0xff]  ;;  %v6120_v59 = vld [vmem:[#allocation155_spill] sm:$0xff]  ;;  %v1148_v17 = vadd.f32 %v1143_v55, %v1126_v25  ;;  %v1939_v55 = vadd.f32 %v5092_v2, %v6139_v37  ;;  %v6142_v2 = vld [vmem:[#allocation153_spill] sm:$0xff] }
 0x51e   : > { %v2080_v63 = vadd.f32 %v2074_v1, %v2058_v23  ;;  %v2247_v49 = vadd.f32 %v2241_v26, %v4884_v20  ;;  %v1235_v8 = vadd.f32 %v6119_v35, %v1213_v18  ;;  %v1498_v40 = vadd.f32 %v6120_v59, %v1476_v21  ;;  %v6127_v21 = vld [vmem:[#allocation157_spill] sm:$0xff]  ;;  %v6129_v26 = vld [vmem:[#allocation143_spill] sm:$0xff]  ;;  %v6153_v37 = vld [vmem:[#allocation64_spill] sm:$0xff] }
 0x51f   : > { %v867_v20 = vsel %vm723_vm7, %v6124_v39, %v6123_v42  ;;  %v888_v1 = vsel %vm746_vm8, %v6128_v10, %v4239_v51  ;;  %v1165_v54 = vsel %vm723_vm7, %v6104_v31, %v6129_v26  ;;  %v6135_v31 = vld [vmem:[#allocation186_spill] sm:$0xff] }
 0x520   : > { %v2102_v0 = vadd.f32 %v2096_v24, %v2080_v63  ;;  %v872_v12 = vadd.f32 %v867_v20, %v850_v58  ;;  %v1241_v18 = vrot.slane %v1235_v8, 7  ;;  %v1520_v41 = vadd.f32 %v6127_v21, %v1498_v40  ;;  %v6130_v58 = vld [vmem:[#allocation146_spill] sm:$0xff]  ;;  %v6131_v8 = vld [vmem:[#allocation159_spill] sm:$0xff]  ;;  %v6132_v40 = vld [vmem:[#allocation48_spill] sm:$0xff] }
 0x521   : > { %v1428_v60 = vsel %vm677_vm5, %v6106_v33, %v6130_v58  ;;  %v1170_v25 = vadd.f32 %v1165_v54, %v1148_v17  ;;  %v6137_v42 = vld [vmem:[#allocation142_spill] sm:$0xff]  ;;  %v6138_v33 = vld [vmem:[#allocation161_spill] sm:$0xff] }
 0x522   : > { %2726 = vrot.lane.b32.xlu0 %v2720_v47, %s3310_s27  ;;  %v2124_v38 = vadd.f32 %v2118_v61, %v2102_v0  ;;  %v1433_v50 = vadd.f32 %v1428_v60, %v6132_v40  ;;  %v1709_v47 = vmul.f32 0.0, %v6133_v30  ;;  %v6134_v0 = vld [vmem:[#allocation59_spill] sm:$0xff]  ;;  %v6136_v61 = vld [vmem:[#allocation150_spill] sm:$0xff]  ;;  %v1186_v20 = vsel %vm746_vm8, %v6111_v43, %v6138_v33 }
 0x523   : > { %v1704_v51 = vadd.f32 %v6134_v0, %v1682_v16  ;;  %v910_v39 = vsel %vm769_vm9, %v6137_v42, %v6136_v61  ;;  %v6144_v54 = vld [vmem:[#allocation162_spill] sm:$0xff]  ;;  %v6152_v61 = vld [vmem:[#allocation28_spill] sm:$0xff] }
 0x524   : > { %v2258_v23 = vpop.permute.xlu0 %2257  ;;  %v2146_v46 = vadd.f32 %v2140_v52, %v2124_v38  ;;  %v6140_v52 = vld [vmem:[#allocation148_spill] sm:$0xff]  ;;  %v6145_v60 = vld [vmem:[#allocation54_spill] sm:$0xff]  ;;  %v2317_v42 = vmul.f32 0.0, %v6152_v61 }
 0x525   : > { %v2263_v29 = vsel %vm746_vm8, %v2258_v23, %v4925_v45  ;;  %v2268_v57 = vadd.f32 %v2258_v23, %v2246_v9  ;;  %1244 = vrot.lane.b32.xlu1 %v1241_v18, %s3314_s25  ;;  %v1542_v45 = vadd.f32 %v6131_v8, %v1520_v41  ;;  %v894_v9 = vadd.f32 %v888_v1, %v872_v12  ;;  %v6143_v1 = vld [vmem:[#allocation144_spill] sm:$0xff] }
 0x526   : > { %v2269_v24 = vadd.f32 %v2263_v29, %v2247_v49  ;;  %v2152_v63 = vrot.slane %v2146_v46, 4  ;;  %v2742_v49 = vmul.f32 %v6135_v31, %v4027_v4  ;;  %v1450_v38 = vsel %vm700_vm6, %v6109_v56, %v6140_v52  ;;  %v6141_v29 = vld [vmem:[#allocation61_spill] sm:$0xff]  ;;  %v6154_v52 = vld [vmem:[#allocation114_spill] sm:$0xff] }
 0x527   : > { %v1548_v12 = vrot.slane %v1542_v45, 6  ;;  %v916_v17 = vadd.f32 %v910_v39, %v894_v9  ;;  %v1192_v18 = vadd.f32 %v1186_v20, %v1170_v25  ;;  %v1455_v41 = vadd.f32 %v1450_v38, %v1433_v50  ;;  %v6147_v45 = vld [vmem:[#allocation151_spill] sm:$0xff] }
 0x528   : > { %2156 = vrot.lane.b32.xlu2 %v2152_v63, %s3316_s22  ;;  %v1712_v16 = vadd.f32 %v1709_v47, %v1704_v51  ;;  %v1961_v23 = vadd.f32 %v5125_v34, %v1939_v55  ;;  %v932_v26 = vsel %vm389_vm1, %v6143_v1, %v6142_v2  ;;  %v1208_v56 = vsel %vm769_vm9, %v6116_v32, %v6144_v54  ;;  %v6146_v34 = vld [vmem:[#allocation107_spill] sm:$0xff]  ;;  %v6148_v32 = vld [vmem:[#allocation164_spill] sm:$0xff]  ;;  %v6150_v51 = vld [vmem:[#allocation110_spill] sm:$0xff] }
 0x529   : > { %v1729_v25 = vsel %vm677_vm5, %v6146_v34, %v6145_v60  ;;  %v938_v9 = vadd.f32 %v932_v26, %v916_v17  ;;  %v1214_v40 = vadd.f32 %v1208_v56, %v1192_v18  ;;  %v2010_v47 = vmul.f32 0.0, %v4819_v3  ;;  %v6156_v18 = vld [vmem:[#allocation125_spill] sm:$0xff]  ;;  %v6158_v1 = vld [vmem:[#allocation154_spill] sm:$0xff]  ;;  %v6160_v60 = vld [vmem:[#allocation67_spill] sm:$0xff] }
 0x52a   : > { %2748 = vrot.lane.b32.xlu0 %v2742_v49, %s3311_s24  ;;  %v1983_v63 = vadd.f32 %v5164_v7, %v1961_v23  ;;  %v1734_v30 = vadd.f32 %v1729_v25, %v1712_v16  ;;  %v1230_v7 = vsel %vm389_vm1, %v6119_v35, %v6148_v32  ;;  %v2030_v38 = vsel %vm677_vm5, %v6154_v52, %v6112_v44  ;;  %v6157_v16 = vld [vmem:[#allocation57_spill] sm:$0xff]  ;;  %v6169_v52 = vld [vmem:[#allocation127_spill] sm:$0xff]  ;;  %s3318_s24 = smov 45  }
 0x52b   : > { %v1236_v3 = vadd.f32 %v1230_v7, %v1214_v40  ;;  %v1515_v23 = vsel %vm769_vm9, %v6127_v21, %v6157_v16  ;;  %v2483_v54 = vstv %s3050_s20  ;;  %v1537_v34 = vsel %vm389_vm1, %v6131_v8, %v6160_v60 }
 0x52c   : > { %v2280_v46 = vpop.permute.xlu0 %2279  ;;  %v2005_v0 = vadd.f32 %v5206_v36, %v1983_v63  ;;  %v2484_v7 = vmul.f32 0.0, %v2483_v54 }
 0x52d   : > { %v2285_v43 = vsel %vm769_vm9, %v2280_v46, %v6141_v29  ;;  %v2290_v10 = vadd.f32 %v2280_v46, %v2268_v57  ;;  %1551 = vrot.lane.b32.xlu1 %v1548_v12, %s3315_s26  ;;  %v1472_v57 = vsel %vm723_vm7, %v6114_v13, %v6147_v45  ;;  %v6151_v13 = vld [vmem:[#allocation168_spill] sm:$0xff]  ;;  %v2318_v12 = vmul.f32 %v6152_v61, %v4027_v4  ;;  %v6165_v61 = vld [vmem:[#allocation173_spill] sm:$0xff] }
 0x52e   : > { %v2291_v58 = vadd.f32 %v2285_v43, %v2269_v24  ;;  %v1477_v50 = vadd.f32 %v1472_v57, %v1455_v41  ;;  %v6149_v24 = vld [vmem:[#allocation58_spill] sm:$0xff]  ;;  %v1493_v49 = vsel %vm746_vm8, %v6120_v59, %v6151_v13  ;;  %v2013_v39 = vadd.f32 %v2010_v47, %v2005_v0  ;;  %v6155_v59 = vld [vmem:[#allocation21_spill] sm:$0xff]  ;;  %v6161_v45 = vld [vmem:[#allocation140_spill] sm:$0xff] }
 0x52f   : > { %v1751_v31 = vsel %vm700_vm6, %v6150_v51, %v6149_v24  ;;  %v2337_v41 = vsel %vm677_vm5, %v6156_v18, %v6155_v59  ;;  %v1242_v29 = vrot.slane %v1236_v3, 7  ;;  %v2338_v44 = vsel %vm677_vm5, %v6155_v59, %v6087_v11  ;;  %v6164_v51 = vld [vmem:[#allocation118_spill] sm:$0xff]  ;;  %v6166_v3 = vld [vmem:[#allocation121_spill] sm:$0xff] }
 0x530   : > { %v1499_v33 = vadd.f32 %v1493_v49, %v1477_v50  ;;  %v1756_v20 = vadd.f32 %v1751_v31, %v1734_v30  ;;  %v2035_v43 = vadd.f32 %v2030_v38, %v2013_v39  ;;  %v2485_v57 = vmul.f32 %v2483_v54, %v6161_v45  ;;  %v6162_v50 = vld [vmem:[#allocation170_spill] sm:$0xff]  ;;  %v6163_v30 = vld [vmem:[#allocation31_spill] sm:$0xff] }
 0x532   : > { %945 = vrot.lane.b32.xlu0 %v938_v9, %s3313_s11  ;;  %v1521_v2 = vadd.f32 %v1515_v23, %v1499_v33  ;;  %v1773_v26 = vadd.f32 %v6158_v1, %v1756_v20  ;;  %s5457_s11 = sld [smem:[#allocation2]] }
 0x534   : > { %v2302_v36 = vpop.permute.xlu0 %2301  ;;  %v1543_v40 = vadd.f32 %v1537_v34, %v1521_v2  ;;  %v1795_v11 = vadd.f32 %v6162_v50, %v1773_v26  ;;  %v6173_v2 = vld [vmem:[#allocation44_spill] sm:$0xff] }
 0x535   : > { %v2307_v35 = vsel %vm389_vm1, %v2302_v36, %v6153_v37  ;;  %v2312_v55 = vadd.f32 %v2302_v36, %v2290_v10  ;;  %v6167_v36 = vld [vmem:[#allocation52_spill] sm:$0xff] }
 0x536   : > { %v2313_v17 = vadd.f32 %v2307_v35, %v2291_v58  ;;  %v6159_v58 = vld [vmem:[#allocation117_spill] sm:$0xff]  ;;  %v1549_v24 = vrot.slane %v1543_v40, 6  ;;  %v6174_v26 = vld [vmem:[#allocation116_spill] sm:$0xff] }
 0x537   : > { %v2320_v46 = vadd.f32 %v2317_v42, %v2312_v55  ;;  %v2052_v21 = vsel %vm700_vm6, %v6159_v58, %v6113_v27  ;;  %v1817_v27 = vadd.f32 %v6086_v19, %v1795_v11  ;;  %v6168_v55 = vld [vmem:[#allocation22_spill] sm:$0xff]  ;;  %v6177_v50 = vld [vmem:[#allocation68_spill] sm:$0xff] }
 0x538   : > { %v2321_v10 = vadd.f32 %v2318_v12, %v2313_v17  ;;  %v2057_v25 = vadd.f32 %v2052_v21, %v2035_v43  ;;  %v2359_v38 = vsel %vm700_vm6, %v6169_v52, %v6168_v55  ;;  %v2360_v12 = vsel %vm700_vm6, %v6168_v55, %v6097_v22  ;;  %v6172_v43 = vld [vmem:[#allocation113_spill] sm:$0xff]  ;;  %v6176_v21 = vld [vmem:[#allocation119_spill] sm:$0xff] }
 0x539   : > { %v2342_v56 = vadd.f32 %v2337_v41, %v2320_v46  ;;  %v1839_v42 = vadd.f32 %v6165_v61, %v1817_v27  ;;  %v6171_v46 = vld [vmem:[#allocation26_spill] sm:$0xff] }
 0x53a   : > { %v2343_v63 = vadd.f32 %v2338_v44, %v2321_v10  ;;  %1246 = vrot.lane.b32.xlu0 %v1242_v29, %s3314_s25  ;;  %v2079_v32 = vadd.f32 %v6117_v14, %v2057_v25 }
 0x53b   : > { %v1845_v19 = vrot.slane %v1839_v42, 5  ;;  %v2364_v17 = vadd.f32 %v2359_v38, %v2342_v56  ;;  %v6181_v42 = vld [vmem:[#allocation74_spill] sm:$0xff] }
 0x53c   : > { %v2501_v9 = vpop.permute.xlu0 %2500  ;;  %v2101_v31 = vadd.f32 %v6118_v48, %v2079_v32  ;;  %v2365_v18 = vadd.f32 %v2360_v12, %v2343_v63  ;;  %v6175_v63 = vld [vmem:[#allocation30_spill] sm:$0xff] }
 0x53d   : > { %v2505_v47 = vsel %vm677_vm5, %v2501_v9, %v6163_v30  ;;  %v2504_v8 = vsel %vm677_vm5, %v6164_v51, %v2501_v9 }
 0x53e   : > { %v2510_v0 = vadd.f32 %v2505_v47, %v2485_v57  ;;  %v2509_v13 = vadd.f32 %v2504_v8, %v2484_v7  ;;  %v2123_v37 = vadd.f32 %v6122_v6, %v2101_v31  ;;  %v6170_v6 = vld [vmem:[#allocation137_spill] sm:$0xff]  ;;  %v6179_v7 = vld [vmem:[#allocation136_spill] sm:$0xff]  ;;  %v2731_v8 = vpop.permute.xlu1 %2730 }
 0x53f   : > { %v2486_v16 = vmul.f32 %v2483_v54, %v6170_v6 }
 0x540   : > { %v2145_v48 = vadd.f32 %v6126_v28, %v2123_v37  ;;  %v6184_v37 = vld [vmem:[#allocation33_spill] sm:$0xff] }
 0x541   : > { %v2511_v23 = vadd.f32 %v6163_v30, %v2486_v16  ;;  %v6178_v30 = vld [vmem:[#allocation122_spill] sm:$0xff] }
 0x542   : > { %1553 = vrot.lane.b32.xlu0 %v1549_v24, %s3315_s26  ;;  %v2151_v59 = vrot.slane %v2145_v48, 4  ;;  %s2860_s26 = sshll.u32 %s2857_s21, 4  ;;  %s2861_s26 = int_to_ptr.hbm [resolvable:$true] %s2860_s26 }
 0x543   : > { %v2533_v22 = vadd.f32 %v6167_v36, %v2511_v23 }
 0x544   : > { %v2523_v49 = vpop.permute.xlu0 %2522 }
 0x545   : > { %v2526_v39 = vsel %vm700_vm6, %v6166_v3, %v2523_v49  ;;  %v2527_v14 = vsel %vm700_vm6, %v2523_v49, %v6167_v36  ;;  %v6180_v49 = vld [vmem:[#allocation29_spill] sm:$0xff]  ;;  %v6182_v36 = vld [vmem:[#allocation111_spill] sm:$0xff] }
 0x546   : > { %v2531_v33 = vadd.f32 %v2526_v39, %v2509_v13  ;;  %v2532_v20 = vadd.f32 %v2527_v14, %v2510_v0  ;;  %v5404_v0 = vpop.permute.xlu2 %2728  ;;  %v6183_v14 = vld [vmem:[#allocation108_spill] sm:$0xff]  ;;  %v2753_v38 = vpop.permute.xlu1 %2752 }
 0x547   : > { %v2733_v52 = vsel %vm769_vm9, %v5404_v0, %v2731_v8 }
 0x54a   : > { %1848 = vrot.lane.b32.xlu0 %v1845_v19, %s3310_s27  ;;  %s3057_s27 = sld [smem:[#allocation7 + $0x37]] }
 0x54c   : > { %v2545_v35 = vpop.permute.xlu0 %2544 }
 0x54d   : > { %v2548_v29 = vsel %vm723_vm7, %v6171_v46, %v2545_v35  ;;  %v2549_v10 = vsel %vm723_vm7, %v2545_v35, %v6172_v43  ;;  %v6185_v35 = vld [vmem:[#allocation32_spill] sm:$0xff] }
 0x54e   : > { %v2554_v56 = vadd.f32 %v2548_v29, %v2532_v20  ;;  %v2555_v54 = vadd.f32 %v2549_v10, %v2533_v22  ;;  %v2689_v20 = vsel %vm723_vm7, %v6183_v14, %v6182_v36  ;;  %v2751_v48 = vpop.permute.xlu2 %2750  ;;  %v6186_v10 = vld [vmem:[#allocation181_spill] sm:$0xff] }
 0x54f   : > { %v2381_v22 = vsel %vm723_vm7, %v6186_v10, %v6103_v5 }
 0x550   : > { %v2623_v45 = vstv %s3057_s27 }
 0x551   : > { %v2625_v32 = vmul.f32 %v2623_v45, %v4027_v4  ;;  %v2626_v24 = vmul.f32 %v2623_v45, %v6179_v7  ;;  %v2711_v4 = vsel %vm746_vm8, %v6185_v35, %v6184_v37 }
 0x552   : > { %2154 = vrot.lane.b32.xlu0 %v2151_v59, %s3316_s22  ;;  %v2755_v59 = vsel %vm389_vm1, %v2751_v48, %v2753_v38  ;;  %s3244_s22 = sshra.s32 %s2861_s26, 4  ;;  %s3245_s22 = int_to_ptr.hbm [resolvable:$true] %s3244_s22 }
 0x553   : > { %p3251_p0 = scmp.lt.s32.totalorder %s3245_s22, %s5542_s8 }
 0x554   : > { %v2567_v41 = vpop.permute.xlu0 %2566 }
 0x555   : > { %v2570_v1 = vsel %vm746_vm8, %v6173_v2, %v2567_v41  ;;  %v2571_v44 = vsel %vm746_vm8, %v2567_v41, %v6174_v26  ;;  %v2387_v26 = vadd.f32 %v2381_v22, %v2365_v18 }
 0x556   : > { %v2576_v34 = vadd.f32 %v2570_v1, %v2554_v56  ;;  %v2577_v25 = vadd.f32 %v2571_v44, %v2555_v54  ;;  %v2386_v1 = vadd.f32 %v6186_v10, %v2364_v17  ;;  %v6187_v56 = vld [vmem:[#allocation182_spill] sm:$0xff] }
 0x557   : > { %v2403_v54 = vsel %vm746_vm8, %v6187_v56, %v6108_v53 }
 0x55c   : > { %v2589_v28 = vpop.permute.xlu0 %2588 }
 0x55d   : > { %v2592_v58 = vsel %vm769_vm9, %v6175_v63, %v2589_v28  ;;  %v2593_v60 = vsel %vm769_vm9, %v2589_v28, %v6176_v21  ;;  %v2553_v28 = vadd.f32 %v6171_v46, %v2531_v33  ;;  %v2409_v46 = vadd.f32 %v2403_v54, %v2387_v26 }
 0x55e   : > { %v2598_v57 = vadd.f32 %v2592_v58, %v2576_v34  ;;  %v2599_v9 = vadd.f32 %v2593_v60, %v2577_v25  ;;  %v2408_v58 = vadd.f32 %v6187_v56, %v2386_v1  ;;  %v2624_v21 = vmul.f32 0.0, %v2623_v45 }
 0x55f   : > { %v2575_v29 = vadd.f32 %v6173_v2, %v2553_v28 }
 0x561   : > { %v2597_v44 = vadd.f32 %v6175_v63, %v2575_v29  ;;  %v651_v29 = vld [vmem:[%s5539_s5 + $0x8] sm:$0x7f] }
 0x563   : > { %v2619_v2 = vadd.f32 %v6177_v50, %v2597_v44  ;;  %v653_v44 = vstv %s5457_s11 }
 0x564   : > { %v2611_v40 = vpop.permute.xlu0 %2610 }
 0x565   : > { %v2614_v11 = vsel %vm389_vm1, %v6177_v50, %v2611_v40  ;;  %v2615_v47 = vsel %vm389_vm1, %v2611_v40, %v6178_v30  ;;  %v2627_v25 = vadd.f32 %v2624_v21, %v2619_v2  ;;  %v6189_v40 = vld [vmem:[#allocation124_spill] sm:$0xff] }
 0x566   : > { %v2620_v27 = vadd.f32 %v2614_v11, %v2598_v57  ;;  %v2621_v51 = vadd.f32 %v2615_v47, %v2599_v9  ;;  %v6188_v9 = vld [vmem:[#allocation183_spill] sm:$0xff]  ;;  %v6190_v11 = vld [vmem:[#allocation126_spill] sm:$0xff] }
 0x568   : > { %v2628_v31 = vadd.f32 %v2625_v32, %v2620_v27  ;;  %v2629_v13 = vadd.f32 %v2626_v24, %v2621_v51 }
 0x56a   : > { %v2651_v61 = vadd.f32 %v6180_v49, %v2629_v13 }
 0x56c   : > { %v2673_v3 = vadd.f32 %v6181_v42, %v2651_v61  ;;  %v2663_v39 = vpop.permute.xlu0 %2662 }
 0x56d   : > { %v2666_v45 = vsel %vm700_vm6, %v6190_v11, %v2663_v39  ;;  %v2667_v30 = vsel %vm700_vm6, %v2663_v39, %v6181_v42 }
 0x56e   : > { %v2695_v19 = vadd.f32 %v2689_v20, %v2673_v3 }
 0x570   : > { %v2717_v55 = vadd.f32 %v2711_v4, %v2695_v19  ;;  %v948_v4 = vpop.permute.xlu2 %947 }
 0x572   : > { %v2739_v12 = vadd.f32 %v2733_v52, %v2717_v55 }
 0x574   : > { %v2683_v41 = vpop.permute.xlu0 %2682  ;;  %v2761_v6 = vadd.f32 %v2755_v59, %v2739_v12 }
 0x575   : > { %v2688_v24 = vsel %vm723_vm7, %v2683_v41, %v6183_v14 }
 0x576   : > { %v2767_v16 = vrot.slane %v2761_v6, 2 }
 0x578   : > { %2772 = vrot.lane.b32.xlu1 %v2767_v16, %s3318_s24  ;;  %v1249_v52 = vpop.permute.xlu2 %1248 }
 0x57c   : > { %v2420_v23 = vpop.permute.xlu0 %2419 }
 0x57d   : > { %v2425_v33 = vsel %vm769_vm9, %v2420_v23, %v5094_v15  ;;  %v2430_v60 = vadd.f32 %v2420_v23, %v2408_v58  ;;  %v2644_v15 = vsel %vm677_vm5, %v6189_v40, %v6188_v9 }
 0x57e   : > { %v2431_v5 = vadd.f32 %v2425_v33, %v2409_v46  ;;  %v2649_v50 = vadd.f32 %v2644_v15, %v2627_v25 }
 0x580   : > { %v2671_v7 = vadd.f32 %v2666_v45, %v2649_v50  ;;  %v1556_v12 = vpop.permute.xlu2 %1555 }
 0x582   : > { %v2693_v51 = vadd.f32 %v2683_v41, %v2671_v7 }
 0x584   : > { %v2705_v43 = vpop.permute.xlu0 %2704 }
 0x585   : > { %v2710_v8 = vsel %vm746_vm8, %v2705_v43, %v6185_v35  ;;  %v2715_v61 = vadd.f32 %v2705_v43, %v2693_v51  ;;  %v944_v35 = vpop.permute.xlu1 %943  ;;  %v650_v51 = vld [vmem:[%s5539_s5] sm:$0x7f] }
 0x588   : > { %v1851_v6 = vpop.permute.xlu2 %1850 }
 0x58c   : > { %v2442_v34 = vpop.permute.xlu0 %2441 }
 0x58d   : > { %v2447_v17 = vsel %vm389_vm1, %v2442_v34, %v5189_v62  ;;  %v2452_v18 = vadd.f32 %v2442_v34, %v2430_v60  ;;  %v2645_v62 = vsel %vm677_vm5, %v6188_v9, %v6180_v49  ;;  %v1853_v55 = vpop.permute.xlu1 %1852 }
 0x58e   : > { %v2453_v63 = vadd.f32 %v2447_v17, %v2431_v5  ;;  %v2650_v47 = vadd.f32 %v2645_v62, %v2628_v31  ;;  %v1855_v54 = vsel %vm769_vm9, %v1851_v6, %v1853_v55 }
 0x58f   : > { %v2458_v57 = vrot.slane %v2452_v18, 3  ;;  %v1859_v2 = vmul.f32 %v1855_v54, %v651_v29 }
 0x590   : > { %v2459_v53 = vrot.slane %v2453_v63, 3  ;;  %v2672_v27 = vadd.f32 %v2667_v30, %v2650_v47  ;;  %v2157_v23 = vpop.permute.xlu2 %2156 }
 0x591   : > { %2461 = vrot.lane.b32.xlu0 %v2458_v57, %s3317_s23  ;;  %v1863_v63 = vrot.slane %v1859_v2, 3 }
 0x592   : > { %2463 = vrot.lane.b32.xlu2 %v2459_v53, %s3317_s23  ;;  %v2694_v13 = vadd.f32 %v2688_v24, %v2672_v27  ;;  %s3246_s23 = scalar_lea.hbm %s3245_s22, 64 }
 0x593   : > { %p3247_p4 = scmp.ne.s32.totalorder %s3245_s22, %s3246_s23 }
 0x594   : > { %v2727_v32 = vpop.permute.xlu0 %2726  ;;  %v2716_v3 = vadd.f32 %v2710_v8, %v2694_v13 }
 0x595   : > { %v2732_v49 = vsel %vm769_vm9, %v2727_v32, %v5404_v0  ;;  %v2737_v36 = vadd.f32 %v2727_v32, %v2715_v61  ;;  %v2159_v0 = vpop.permute.xlu1 %2158  ;;  %p3248_p6 = pnand %p3247_p4, %p3421_p11 }
 0x596   : > { %v2738_v20 = vadd.f32 %v2732_v49, %v2716_v3  ;;  %v2162_v5 = vsel %vm2160_vm12, %v2157_v23, %v2159_v0 }
 0x597   : > { %v2166_v25 = vmul.f32 %v2162_v5, %v651_v29  ;;  %v6191_v5 = vld [vmem:[#allocation131_spill] sm:$0xff]  ;;  %p3249_p13 = pneg %p3248_p6 }
 0x599   : > { %v2170_v9 = vrot.slane %v2166_v25, 4 }
 0x59c   : > { %v2749_v42 = vpop.permute.xlu0 %2748 }
 0x59d   : > { %v2754_v31 = vsel %vm389_vm1, %v2749_v42, %v2751_v48  ;;  %v2759_v39 = vadd.f32 %v2749_v42, %v2737_v36  ;;  %v2466_v41 = vpop.permute.xlu1 %2465  ;;  %vm949_vm1 = vcmask 416768  }
 0x59e   : > { %v2760_v19 = vadd.f32 %v2754_v31, %v2738_v20 }
 0x59f   : > { %v2765_v37 = vrot.slane %v2759_v39, 2 }
 0x5a0   : > { %v2766_v14 = vrot.slane %v2760_v19, 2 }
 0x5a1   : > { %2768 = vrot.lane.b32.xlu0 %v2765_v37, %s3318_s24 }
 0x5a2   : > { %2770 = vrot.lane.b32.xlu2 %v2766_v14, %s3318_s24  ;;  %s3250_s24 = scalar_lea.hbm %s5542_s8, 128 }
 0x5a3   : > { %p3252_p3 = scmp.lt.s32.totalorder %s3250_s24, %s3246_s23 }
 0x5a4   : > { %v946_v38 = vpop.permute.xlu0 %945 }
 0x5a5   : > { %v1245_v28 = vpop.permute.xlu1 %1244  ;;  %v951_v43 = vsel %vm949_vm1, %v946_v38, %v948_v4  ;;  %v950_v8 = vsel %vm949_vm1, %v944_v35, %v946_v38  ;;  %p3253_p5 = por %p3252_p3, %p3251_p0 }
 0x5a6   : > { %v955_v1 = vmul.f32 %v951_v43, %v651_v29  ;;  %v954_v3 = vmul.f32 %v950_v8, %v650_v51 }
 0x5a7   : > { %p3254_p8 = pnand %p3253_p5, %p3249_p13 }
 0x5a8   : > { %v957_v58 = vadd.f32 %v955_v1, %v653_v44  ;;  %v956_v14 = vadd.f32 %v954_v3, %v653_v44 }
 0x5ac   : > { %v1247_v59 = vpop.permute.xlu0 %1246 }
 0x5ad   : > { %v1252_v16 = vsel %vm1250_vm10, %v1247_v59, %v1249_v52  ;;  %v1552_v21 = vpop.permute.xlu1 %1551  ;;  %v1251_v24 = vsel %vm1250_vm10, %v1245_v28, %v1247_v59 }
 0x5ae   : > { %v1256_v22 = vmul.f32 %v1252_v16, %v651_v29  ;;  %v1255_v61 = vmul.f32 %v1251_v24, %v650_v51 }
 0x5b0   : > { %v1260_v56 = vrot.slane %v1256_v22, 1  ;;  %v1259_v31 = vrot.slane %v1255_v61, 1 }
 0x5b2   : > { %v1264_v60 = vadd.f32 %v1260_v56, %v957_v58  ;;  %v1263_v52 = vadd.f32 %v1259_v31, %v956_v14 }
 0x5b4   : > { %v1554_v48 = vpop.permute.xlu0 %1553 }
 0x5b5   : > { %v1559_v10 = vsel %vm1557_vm11, %v1554_v48, %v1556_v12  ;;  %v1558_v13 = vsel %vm1557_vm11, %v1552_v21, %v1554_v48 }
 0x5b6   : > { %v1563_v26 = vmul.f32 %v1559_v10, %v651_v29  ;;  %v1562_v36 = vmul.f32 %v1558_v13, %v650_v51  ;;  %v6196_v13 = vld [vmem:[#allocation132_spill] sm:$0xff] }
 0x5b8   : > { %v1567_v33 = vrot.slane %v1563_v26, 2  ;;  %v1566_v4 = vrot.slane %v1562_v36, 2  ;;  %v6198_v36 = vld [vmem:[#allocation128_spill] sm:$0xff] }
 0x5ba   : > { %v1571_v17 = vadd.f32 %v1567_v33, %v1264_v60  ;;  %v1570_v12 = vadd.f32 %v1566_v4, %v1263_v52 }
 0x5bc   : > { %v1849_v18 = vpop.permute.xlu0 %1848  ;;  %v1867_v53 = vadd.f32 %v1863_v63, %v1571_v17  ;;  %v6192_v17 = vld [vmem:[#allocation133_spill] sm:$0xff]  ;;  %v6193_v63 = vld [vmem:[#allocation135_spill] sm:$0xff] }
 0x5bd   : > { %v1854_v49 = vsel %vm769_vm9, %v1849_v18, %v1851_v6 }
 0x5be   : > { %v2174_v62 = vadd.f32 %v2170_v9, %v1867_v53  ;;  %v1858_v39 = vmul.f32 %v1854_v49, %v650_v51  ;;  %v6194_v53 = vld [vmem:[#allocation129_spill] sm:$0xff]  ;;  %v6197_v49 = vld [vmem:[#allocation134_spill] sm:$0xff] }
 0x5c0   : > { %v1862_v38 = vrot.slane %v1858_v39, 3 }
 0x5c4   : > { %v2155_v32 = vpop.permute.xlu0 %2154 }
 0x5c5   : > { %v2161_v42 = vsel %vm2160_vm12, %v2155_v32, %v2157_v23 }
 0x5c6   : > { %v2165_v55 = vmul.f32 %v2161_v42, %v650_v51 }
 0x5c8   : > { %v2169_v59 = vrot.slane %v2165_v55, 4 }
 0x5ea   : > { %v2773_v40 = vpop.permute.xlu1 %2772 }
 0x5ec   : > { %v2464_v46 = vpop.permute.xlu2 %2463 }
 0x5ed   : > { %v2469_v34 = vsel %vm2467_vm13, %v2464_v46, %v2466_v41  ;;  %v1866_v41 = vadd.f32 %v1862_v38, %v1570_v12 }
 0x5ee   : > { %v2473_v57 = vmul.f32 %v2469_v34, %v651_v29 }
 0x5ef   : > { %v2173_v28 = vadd.f32 %v2169_v59, %v1866_v41 }
 0x5f0   : > { %v2477_v15 = vrot.slane %v2473_v57, 5 }
 0x5f2   : > { %v2481_v30 = vadd.f32 %v2477_v15, %v2174_v62 }
 0x5fc   : > { %v2771_v11 = vpop.permute.xlu2 %2770 }
 0x5fd   : > { %v2776_v45 = vsel %vm2774_vm14, %v2771_v11, %v2773_v40 }
 0x5fe   : > { %v2780_v50 = vmul.f32 %v2776_v45, %v651_v29 }
 0x600   : > { %v2784_v47 = vrot.slane %v2780_v50, 6 }
 0x602   : > { %v2788_v7 = vadd.f32 %v2784_v47, %v2481_v30 }
 0x603   : > { %v2462_v20 = vpop.permute.xlu0 %2461 }
 0x604   : > { %v3065_v27 = vmul.f32 -1.442695, %v2788_v7  ;;  %v2468_v37 = vsel %vm2467_vm13, %v2462_v20, %v2464_v46 }
 0x605   : > { %v2472_v0 = vmul.f32 %v2468_v37, %v650_v51 }
 0x606   : > { %3169 = vpow2.f32 %v3065_v27 }
 0x607   : > { %v2476_v6 = vrot.slane %v2472_v0, 5 }
 0x609   : > { %v2480_v10 = vadd.f32 %v2476_v6, %v2173_v28 }
 0x60c   : > { %v3170_v19 = vpop.eup %3169 }
 0x60d   : > { %v2796_v35 = vadd.f32 1.0, %v3170_v19 }
 0x60f   : > { %3171 = vrcp.f32 %v2796_v35  ;;  %v2823_v26 = vand.u32 2147483648, %v2796_v35  ;;  %v2821_v54 = vand.u32 2147483647, %v2796_v35  ;;  %vm2817_vm0 = vweird.f32 %v2796_v35 }
 0x611   : > { %v2824_v46 = vor.u32 1.1754944e-38, %v2823_v26  ;;  %vm2822_vm3 = vcmp.eq.f32.partialorder %v2821_v54, 8.507059e+37 }
 0x613   : > { %v2769_v48 = vpop.permute.xlu0 %2768 }
 0x614   : > { %v2775_v16 = vsel %vm2774_vm14, %v2769_v48, %v2771_v11 }
 0x615   : > { %v3172_v23 = vpop.eup %3171  ;;  %v2779_v29 = vmul.f32 %v2775_v16, %v650_v51  ;;  %v6195_v51 = vld [vmem:[#allocation130_spill] sm:$0xff] }
 0x616   : > { %v2813_v43 = vmul.f32 %v3172_v23, %v2796_v35  ;;  %vm2818_vm15 = vweird.f32 %v3172_v23 }
 0x617   : > { %v2783_v22 = vrot.slane %v2779_v29, 6  ;;  %vm2819_vm2 = vmor %vm2817_vm0, %vm2818_vm15 }
 0x618   : > { %v2814_v1 = vsub.f32 1.0, %v2813_v43 }
 0x619   : > { %v2787_v44 = vadd.f32 %v2783_v22, %v2480_v10 }
 0x61a   : > { %v2815_v56 = vmul.f32 %v3172_v23, %v2814_v1 }
 0x61b   : > { %v3064_v58 = vmul.f32 -1.442695, %v2787_v44 }
 0x61c   : > { %v2816_v33 = vadd.f32 %v3172_v23, %v2815_v56 }
 0x61d   : > { %3173 = vpow2.f32 %v3064_v58 }
 0x61e   : > { %v2820_v2 = vsel %vm2819_vm2, %v3172_v23, %v2816_v33 }
 0x61f   : > { %v2825_v21 = vsel %vm2822_vm3, %v2824_v46, %v2820_v2 }
 0x620   : > { %v2828_v60 = vperm.slane %v2825_v21, 0 }
 0x622   : > { %v2830_v34 = vmul.f32 %v2828_v60, %v6191_v5  ;;  %v2832_v18 = vmul.f32 %v2828_v60, %v6192_v17  ;;  %v2834_v25 = vmul.f32 %v2828_v60, %v6193_v63  ;;  %v2836_v9 = vmul.f32 %v2828_v60, %v6194_v53 }
 0x623   : > { %v3174_v57 = vpop.eup %3173 }
 0x624   : > { %2838 = vst [vmem:[%s5486_s15 + $0x8] sm:$0xff] %v2830_v34  ;;  %v2795_v40 = vadd.f32 1.0, %v3174_v57 }
 0x625   : > { %2840 = vst [vmem:[%s5486_s15 + $0x18] sm:$0xff] %v2832_v18 }
 0x626   : > { %2842 = vst [vmem:[%s5486_s15 + $0x28] sm:$0xff] %v2834_v25  ;;  %3175 = vrcp.f32 %v2795_v40  ;;  %v2808_v62 = vand.u32 2147483648, %v2795_v40  ;;  %v2806_v30 = vand.u32 2147483647, %v2795_v40  ;;  %vm2802_vm5 = vweird.f32 %v2795_v40 }
 0x627   : > { %2844 = vst [vmem:[%s5486_s15 + $0x38] sm:$0xff] %v2836_v9 }
 0x628   : > { %v2809_v32 = vor.u32 1.1754944e-38, %v2808_v62  ;;  %vm2807_vm7 = vcmp.eq.f32.partialorder %v2806_v30, 8.507059e+37 }
 0x62c   : > { %v3176_v15 = vpop.eup %3175 }
 0x62d   : > { %v2798_v11 = vmul.f32 %v3176_v15, %v2795_v40  ;;  %vm2803_vm4 = vweird.f32 %v3176_v15 }
 0x62e   : > { %vm2804_vm6 = vmor %vm2802_vm5, %vm2803_vm4 }
 0x62f   : > { %v2799_v45 = vsub.f32 1.0, %v2798_v11 }
 0x631   : > { %v2800_v50 = vmul.f32 %v3176_v15, %v2799_v45 }
 0x633   : > { %v2801_v47 = vadd.f32 %v3176_v15, %v2800_v50 }
 0x635   : > { %v2805_v7 = vsel %vm2804_vm6, %v3176_v15, %v2801_v47 }
 0x636   : > { %v2810_v24 = vsel %vm2807_vm7, %v2809_v32, %v2805_v7 }
 0x637   : > { %v2827_v27 = vperm.slane %v2810_v24, 0 }
 0x639   : > { %v2829_v8 = vmul.f32 %v2827_v27, %v6195_v51  ;;  %v2831_v61 = vmul.f32 %v2827_v27, %v6196_v13  ;;  %v2833_v3 = vmul.f32 %v2827_v27, %v6197_v49  ;;  %v2835_v20 = vmul.f32 %v2827_v27, %v6198_v36 }
 0x63b   : > { %2837 = vst [vmem:[%s5486_s15] sm:$0xff] %v2829_v8 }
 0x63c   : > { %2839 = vst [vmem:[%s5486_s15 + $0x10] sm:$0xff] %v2831_v61 }
 0x63d   : > { %2841 = vst [vmem:[%s5486_s15 + $0x20] sm:$0xff] %v2833_v3 }
 0x63e   : > { %2843 = vst [vmem:[%s5486_s15 + $0x30] sm:$0xff] %v2835_v20 }
 0x63f   : > { %3257 = shalt.err (!%p3254_p8)
}
 0x640   : > { %s3319_s14 = smov 256   ;;  %s3320_s28 = smov 16  }
 0x641   : > { %3081 = dma.vmem_to_hbm [thread:$0]  (%p3421_p11), %s2859_s16, 1024, %s2861_s26, %s2846_s7, %s3319_s14, %s3319_s14, %s3320_s28  }
 0x642 PF: > { %s2875_s9 = sand.u32 1, %s3288_s29   ;;  %p6199_p9 = scmp.ge.s32.totalorder %s3300_s10, 2 }
 0x643   : > { %s2876_s6 = scalar_lea.sflag [#allocation5], %s2875_s9 }
 0x644   : > { %p3092_p10 = pnand %p6199_p9, %p3425_p12 }
 0x646   : > { %p3093_p1 = pneg %p3092_p10 }
 0x648   : > { %3283 = dma.done.wait (%p3093_p1), %s2876_s6, 1024  }
 0x649   : > { %3285 = vsyncadd (%p3093_p1), %s2876_s6, 4294966272  ;;  %s6200_s10 = sld [smem:[#allocation13_spill]]  ;;  %s6203_s29 = smov %s3292_s30 }
 0x64a   : > { %s6201_s15 = sld [smem:[#allocation12_spill]] }
 0x64b   : > { %s6202_s9 = sld [smem:[#allocation14_spill]] }
 0x64f   : > { %p23_p2 = scmp.ge.s32.totalorder %s6200_s10, 4  }
 0x650   : > { %s6204_s30 = smov %s6201_s15 }
 0x651   :  { %25 = sbr.rel (!%p23_p2) target bundleno = 9 (0x9), region = 102 }
 0x656   :  { %2882 = vsyncpa [#allocation4], 1 }
 0x657   :  { %2884 = vsyncpa [#allocation4 + $0x1], 1 }
 0x658   :  { %2885 = vsyncpa [#allocation5], 1 }
 0x659   :  { %2887 = vsyncpa [#allocation5 + $0x1], 1 }
 0x65a   :  { %2888 = vsyncpa [#allocation6], 1 }
 0x65b   :  { %2890 = vsyncpa [#allocation6 + $0x1], 1 }

</bundles_post_ra>
